<compile_context>
chip_gen: v6e
topology: v6e:2x2x1
jax: 0.10.0
libtpu: 0.0.40
codegen_flags: <defaults>
</compile_context>

<pallas_src>
import functools

import jax
import jax.numpy as jnp
from jax import lax
from jax.experimental import pallas as pl
from jax.experimental.pallas import tpu as pltpu

BN_EPS = 1e-5
# Safe on every generation (raises v5e's 16 MiB default, fits v7x's 64 MiB
# physical with headroom).
_VMEM_LIMIT = 32 * 1024 * 1024


def _round_up(x, m):
    return (x + m - 1) // m * m


def _pick_tco(cpad):
    return 256 if cpad % 256 == 0 else 128


# ---------------------------------------------------------------------------
# Pass 1: block-1 conv (single im2col MXU matmul) + per-image BN stats.
# Output rows are already in block-2's padded-flattened layout (borders = 0).
# ---------------------------------------------------------------------------
def _conv1_stats_kernel(xc_ref, w_ref, vmask_ref, y_ref, stats_ref):
    """
    xc_ref:    (R2, K1)  bf16  channel-im2col rows (border rows are zero)
    w_ref:     (K1, tco) bf16  flattened conv-1 weights (one Cout tile)
    vmask_ref: (1, R2)   f32   1.0 on interior (valid-pixel) rows
    y_ref:     (R2, tco) bf16  raw conv-1 output, block-2 padded layout
    stats_ref: (2, tco)  f32   per-image partial [sum, sum_of_squares]
    """
    acc = jnp.dot(xc_ref[...], w_ref[...], preferred_element_type=jnp.float32)
    y_ref[...] = acc.astype(y_ref.dtype)          # bf16 intermediate (stats use f32 acc)

    m = vmask_ref[...]                            # masked MXU row-reduction
    stats_ref[0:1, :] = jnp.dot(m, acc, preferred_element_type=jnp.float32)
    stats_ref[1:2, :] = jnp.dot(m, acc * acc, preferred_element_type=jnp.float32)


def conv1_pass(xcol, w1, vmask1):
    N, R2, K1 = xcol.shape
    Cpad = w1.shape[-1]
    tco = _pick_tco(Cpad)
    nco = Cpad // tco

    return pl.pallas_call(
        _conv1_stats_kernel,
        grid=(nco, N),
        in_specs=[
            pl.BlockSpec((None, R2, K1), lambda co, n: (n, 0, 0)),
            pl.BlockSpec((K1, tco), lambda co, n: (0, co)),
            pl.BlockSpec((1, R2), lambda co, n: (0, 0)),
        ],
        out_specs=(
            pl.BlockSpec((None, R2, tco), lambda co, n: (n, 0, co)),
            pl.BlockSpec((None, 2, tco), lambda co, n: (n, 0, co)),
        ),
        out_shape=(
            jax.ShapeDtypeStruct((N, R2, Cpad), jnp.bfloat16),
            jax.ShapeDtypeStruct((N, 2, Cpad), jnp.float32),
        ),
        compiler_params=pltpu.CompilerParams(
            dimension_semantics=("parallel", "parallel"),
            vmem_limit_bytes=_VMEM_LIMIT,
        ),
    )(xcol, w1, vmask1)


# ---------------------------------------------------------------------------
# Pass 2: fused [BN1 + ReLU + conv-2 zero padding] + 3x3 conv-2 as 9 shifted
# MXU matmuls with a value-resident accumulator + per-image BN-2 stats.
# ---------------------------------------------------------------------------
def _bn_conv2_stats_kernel(y1_ref, scale_ref, shift_ref, rowmask_ref, w_ref,
                           vmask_ref, y2_ref, stats_ref, xact_ref, *, W, M):
    """
    y1_ref:      (R2, C1)     bf16  raw conv-1 output, padded-flattened layout
    scale_ref:   (1, C1)      f32   gamma1 * rsqrt(var1 + eps)
    shift_ref:   (1, C1)      f32   beta1 - mean1 * scale1
    rowmask_ref: (R2, 1)      f32   1.0 on interior rows (conv-2 zero padding)
    w_ref:       (9, C1, tco) bf16  tap-major conv-2 weights (one Cout tile)
    vmask_ref:   (1, M)       f32   1.0 on valid output rows (junk cols excl.)
    y2_ref:      (M, tco)     f32   raw conv-2 output (junk rows included)
    stats_ref:   (2, tco)     f32   per-image partial [sum, sum_of_squares]
    xact_ref:    (R2, C1)     bf16  VMEM scratch: post-BN/ReLU activation
    """
    # Fused BN1 + ReLU, hoisted out of the 9-tap loop; border rows are forced
    # to zero so they act as the conv-2 zero padding (where() is NaN-safe).
    xact = y1_ref[...].astype(jnp.float32) * scale_ref[...] + shift_ref[...]
    xact = jnp.maximum(xact, 0.0)
    xact = jnp.where(rowmask_ref[...] > 0.0, xact, 0.0)
    xact_ref[...] = xact.astype(xact_ref.dtype)

    # 3x3 conv as 9 shift-and-accumulate matmuls; accumulate in a value
    # (first tap assigns) -> no per-tap VMEM read-modify-write.
    acc = None
    for dy in range(3):
        for dx in range(3):
            off = dy * (W + 2) + dx                       # static row shift
            lhs = xact_ref[pl.ds(off, M), :]              # (M, C1) bf16
            p = jnp.dot(lhs, w_ref[dy * 3 + dx],
                        preferred_element_type=jnp.float32)
            acc = p if acc is None else acc + p

    y2_ref[...] = acc.astype(y2_ref.dtype)

    m = vmask_ref[...]                                    # junk columns masked
    stats_ref[0:1, :] = jnp.dot(m, acc, preferred_element_type=jnp.float32)
    stats_ref[1:2, :] = jnp.dot(m, acc * acc, preferred_element_type=jnp.float32)


def bn_conv2_pass(y1, scale1, shift1, rowmask, w2, vmask2, H, W):
    N, R2, C1 = y1.shape
    Cpad = w2.shape[-1]
    M = H * (W + 2)
    tco = _pick_tco(Cpad)
    nco = Cpad // tco

    kernel = functools.partial(_bn_conv2_stats_kernel, W=W, M=M)
    return pl.pallas_call(
        kernel,
        grid=(nco, N),
        in_specs=[
            pl.BlockSpec((None, R2, C1), lambda co, n: (n, 0, 0)),
            pl.BlockSpec((1, C1), lambda co, n: (0, 0)),
            pl.BlockSpec((1, C1), lambda co, n: (0, 0)),
            pl.BlockSpec((R2, 1), lambda co, n: (0, 0)),
            pl.BlockSpec((9, C1, tco), lambda co, n: (0, 0, co)),
            pl.BlockSpec((1, M), lambda co, n: (0, 0)),
        ],
        out_specs=(
            pl.BlockSpec((None, M, tco), lambda co, n: (n, 0, co)),
            pl.BlockSpec((None, 2, tco), lambda co, n: (n, 0, co)),
        ),
        out_shape=(
            jax.ShapeDtypeStruct((N, M, Cpad), jnp.float32),
            jax.ShapeDtypeStruct((N, 2, Cpad), jnp.float32),
        ),
        scratch_shapes=[pltpu.VMEM((R2, C1), jnp.bfloat16)],
        compiler_params=pltpu.CompilerParams(
            dimension_semantics=("parallel", "parallel"),
            vmem_limit_bytes=_VMEM_LIMIT,
        ),
    )(y1, scale1, shift1, rowmask, w2, vmask2)


# ---------------------------------------------------------------------------
# Pass 3: final BN + ReLU, wide lane-dense tiles (full padded Cout per image).
# ---------------------------------------------------------------------------
def _bn_relu_kernel(y_ref, scale_ref, shift_ref, o_ref):
    y = y_ref[...].astype(jnp.float32) * scale_ref[...] + shift_ref[...]
    o_ref[...] = jnp.maximum(y, 0.0).astype(o_ref.dtype)


def bn_relu_pass(y2, scale2, shift2):
    N, M, Cpad = y2.shape
    return pl.pallas_call(
        _bn_relu_kernel,
        grid=(N,),
        in_specs=[
            pl.BlockSpec((None, M, Cpad), lambda n: (n, 0, 0)),
            pl.BlockSpec((1, Cpad), lambda n: (0, 0)),
            pl.BlockSpec((1, Cpad), lambda n: (0, 0)),
        ],
        out_specs=pl.BlockSpec((None, M, Cpad), lambda n: (n, 0, 0)),
        out_shape=jax.ShapeDtypeStruct((N, M, Cpad), jnp.float32),
        compiler_params=pltpu.CompilerParams(
            dimension_semantics=("parallel",),
            vmem_limit_bytes=_VMEM_LIMIT,
        ),
    )(y2, scale2, shift2)


# ---------------------------------------------------------------------------
# Wrapper / glue.
# ---------------------------------------------------------------------------
def _bn_scale_shift(partial_stats, gamma, beta, count):
    """Reduce per-image partial stats and fold BN into a (scale, shift) pair."""
    stats = jnp.sum(partial_stats, axis=0)                # (2, Cpad) — tiny
    mean = stats[0:1, :] / count
    var = stats[1:2, :] / count - mean * mean
    var = jnp.maximum(var, 0.0)
    scale = gamma * lax.rsqrt(var + BN_EPS)
    shift = beta - mean * scale
    return scale, shift


def bridge_forward(x_nchw, params):
    """Bridge forward. x_nchw: (N, Cin, H, W) -> (N, Cout, H, W)."""
    p1, p2 = params
    x = jnp.transpose(x_nchw, (0, 2, 3, 1)).astype(jnp.float32)   # NHWC
    N, H, W, Cin = x.shape
    count = float(N * H * W)                                       # valid BN elems

    Wp = W + 2
    Rv = (H + 2) * Wp                    # rows of the padded-flattened layout
    R2 = _round_up(Rv + 2, 8)            # + tap-shift overflow, sublane-aligned
    M = H * Wp                           # conv-output rows (incl. junk columns)

    # Constant masks (tiny).
    rp = jnp.arange(R2, dtype=jnp.int32)
    hp, wpos = rp // Wp, rp % Wp
    interior = ((hp >= 1) & (hp <= H) & (wpos >= 1) & (wpos <= W) & (rp < Rv))
    interior = interior.astype(jnp.float32)
    vmask1 = interior.reshape(1, R2)     # stats mask, pass 1
    rowmask = interior.reshape(R2, 1)    # conv-2 zero-padding mask, pass 2
    vmask2 = (jnp.arange(M, dtype=jnp.int32) % Wp < W)
    vmask2 = vmask2.astype(jnp.float32).reshape(1, M)

    # Block-1 channel-only im2col (cheap because Cin is small); laid out so
    # that the im2col row index equals the block-2 padded-flattened row index
    # (border rows are zero, so the raw conv output is exactly 0 there).
    # TODO(synk): for large in_channels switch block 1 to the shifted-tap conv
    #             used in block 2 instead of HBM-materialized im2col.
    xp = jnp.pad(x, ((0, 0), (1, 1), (1, 1), (0, 0)))              # (N,H+2,W+2,Cin)
    taps = [xp[:, dy:dy + H, dx:dx + W, :] for dy in range(3) for dx in range(3)]
    col = jnp.concatenate(taps, axis=-1)                           # (N,H,W,9*Cin)
    col = jnp.pad(col, ((0, 0), (1, 1), (1, 1), (0, 0)))           # zero borders
    col = col.reshape(N, Rv, 9 * Cin)
    K1 = p1["w_col"].shape[0]
    col = jnp.pad(col, ((0, 0), (0, R2 - Rv), (0, K1 - 9 * Cin)))
    xcol = col.astype(jnp.bfloat16)

    # Pass 1: conv-1 + per-image BN-1 stats (output already in block-2 layout).
    y1, st1 = conv1_pass(xcol, p1["w_col"], vmask1)
    scale1, shift1 = _bn_scale_shift(st1, p1["gamma"], p1["beta"], count)

    # Pass 2: fused BN-1 + ReLU + conv-2 + per-image BN-2 stats.
    y2, st2 = bn_conv2_pass(y1, scale1, shift1, rowmask, p2["w_flat"], vmask2, H, W)
    scale2, shift2 = _bn_scale_shift(st2, p2["gamma"], p2["beta"], count)

    # Pass 3: final BN + ReLU.
    out = bn_relu_pass(y2, scale2, shift2)

    cout = p2["gamma_raw"].shape[0]
    out = out.reshape(N, H, Wp, -1)[:, :, :W, :cout]   # strip junk cols / pad chans
    return jnp.transpose(out, (0, 3, 1, 2)).astype(jnp.float32)


def init_bridge_params(key, in_channels, out_channels):
    """Deterministic synthetic parameters (not a checkpoint load)."""
    cout_pad = _round_up(out_channels, 128)              # lane-dense Cout
    k1w, k1b, k1g, k1be, k2w, k2b, k2g, k2be = jax.random.split(key, 8)

    def pad_vec(v):
        return jnp.zeros((1, cout_pad), jnp.float32).at[0, :out_channels].set(v)

    # Block 1: Cin -> Cout, weights flattened for the channel-im2col matmul.
    w1 = 0.1 * jax.random.normal(k1w, (3, 3, in_channels, out_channels), jnp.float32)
    b1 = 0.05 * jax.random.normal(k1b, (out_channels,), jnp.float32)
    g1 = 1.0 + 0.1 * jax.random.normal(k1g, (out_channels,), jnp.float32)
    be1 = 0.05 * jax.random.normal(k1be, (out_channels,), jnp.float32)
    K1 = _round_up(9 * in_channels, 128)
    w1_col = jnp.zeros((K1, cout_pad), jnp.float32)
    w1_col = w1_col.at[:9 * in_channels, :out_channels].set(
        w1.reshape(9 * in_channels, out_channels))
    p1 = dict(
        w_col=w1_col.astype(jnp.bfloat16),
        gamma=pad_vec(g1), beta=pad_vec(be1),
        # Raw params kept for the pure-JAX reference.  The conv bias is never
        # applied in the kernels: it cancels exactly under training-mode BN
        # (the reference applies it and still matches).
        w_raw=w1, b_raw=b1, gamma_raw=g1, beta_raw=be1,
    )

    # Block 2: Cout -> Cout, tap-major weights for the shifted-tap conv.
    w2 = 0.1 * jax.random.normal(k2w, (3, 3, out_channels, out_channels), jnp.float32)
    b2 = 0.05 * jax.random.normal(k2b, (out_channels,), jnp.float32)
    g2 = 1.0 + 0.1 * jax.random.normal(k2g, (out_channels,), jnp.float32)
    be2 = 0.05 * jax.random.normal(k2be, (out_channels,), jnp.float32)
    w2_pad = jnp.zeros((3, 3, cout_pad, cout_pad), jnp.float32)
    w2_pad = w2_pad.at[:, :, :out_channels, :out_channels].set(w2)
    p2 = dict(
        w_flat=w2_pad.reshape(9, cout_pad, cout_pad).astype(jnp.bfloat16),
        gamma=pad_vec(g2), beta=pad_vec(be2),
        w_raw=w2, b_raw=b2, gamma_raw=g2, beta_raw=be2,
    )
    return [p1, p2]


def bridge_reference(x_nchw, params):
    """Pure-JAX reference (bf16 conv inputs, f32 accumulation/BN, bias applied)."""
    x = jnp.transpose(x_nchw, (0, 2, 3, 1)).astype(jnp.float32)
    for p in params:
        w = p["w_raw"]
        cin = w.shape[2]
        xin = x[..., :cin].astype(jnp.bfloat16)
        y = lax.conv_general_dilated(
            xin, w.astype(jnp.bfloat16),
            window_strides=(1, 1), padding="SAME",
            dimension_numbers=("NHWC", "HWIO", "NHWC"),
            preferred_element_type=jnp.float32)
        y = y + p["b_raw"]                       # cancels under train-mode BN
        mean = jnp.mean(y, axis=(0, 1, 2), keepdims=True)
        var = jnp.mean((y - mean) ** 2, axis=(0, 1, 2), keepdims=True)
        y = (y - mean) * lax.rsqrt(var + BN_EPS) * p["gamma_raw"] + p["beta_raw"]
        x = jnp.maximum(y, 0.0)
    return jnp.transpose(x, (0, 3, 1, 2))


if __name__ == "__main__":
    key = jax.random.PRNGKey(0)
    k_x, k_p = jax.random.split(key)

    N, Cin, Cout, H, W = 2, 4, 8, 16, 16
    x = jax.random.normal(k_x, (N, Cin, H, W), jnp.float32)   # NCHW, like PyTorch
    params = init_bridge_params(k_p, Cin, Cout)

    y = jax.jit(bridge_forward)(x, params)
    y = jax.block_until_ready(y)

    assert y.shape == (N, Cout, H, W), y.shape
    assert bool(jnp.all(jnp.isfinite(y)))
    assert bool(jnp.all(y >= 0.0))   # ReLU output

    y_ref = jax.jit(bridge_reference)(x, params)
    y_ref = jax.block_until_ready(y_ref)
    max_err = float(jnp.max(jnp.abs(y - y_ref)))
    assert bool(jnp.allclose(y, y_ref, atol=5e-2, rtol=5e-2)), max_err

    print("KERNEL_OK")
</pallas_src>

<mosaic_0001>
module attributes {stable_mosaic.version = 11 : i64} {
  func.func @_conv1_stats_kernel(%arg0: i32, %arg1: i32, %arg2: memref<1x328x128xbf16, #tpu.memory_space<vmem>>, %arg3: memref<128x128xbf16, #tpu.memory_space<vmem>>, %arg4: memref<1x328xf32, #tpu.memory_space<vmem>>, %arg5: memref<1x328x128xbf16, #tpu.memory_space<vmem>>, %arg6: memref<1x2x128xf32, #tpu.memory_space<vmem>>) attributes {dimension_semantics = [#tpu.dimension_semantics<parallel>, #tpu.dimension_semantics<parallel>], iteration_bounds = array<i64: 1, 2>, scalar_prefetch = 0 : i64, scratch_operands = 0 : i64, tpu.core_type = #tpu.core_type<tc>, window_params = [{transform_indices = @transform_0, window_bounds = array<i64: 1, 328, 128>}, {transform_indices = @transform_1, window_bounds = array<i64: 128, 128>}, {pipeline_mode = #tpu.pipeline_mode<synchronous>, transform_indices = @transform_2, window_bounds = array<i64: 1, 328>}, {transform_indices = @transform_3, window_bounds = array<i64: 1, 328, 128>}, {transform_indices = @transform_4, window_bounds = array<i64: 1, 2, 128>}]} {
    %c0 = arith.constant 0 : index
    %c0_0 = arith.constant 0 : index
    %c0_1 = arith.constant 0 : index
    %0 = vector.load %arg2[%c0, %c0_0, %c0_1] : memref<1x328x128xbf16, #tpu.memory_space<vmem>>, vector<1x328x128xbf16>
    %1 = vector.shape_cast %0 : vector<1x328x128xbf16> to vector<328x128xbf16>
    %c0_2 = arith.constant 0 : index
    %c0_3 = arith.constant 0 : index
    %2 = vector.load %arg3[%c0_2, %c0_3] : memref<128x128xbf16, #tpu.memory_space<vmem>>, vector<128x128xbf16>
    %cst = arith.constant dense<0.000000e+00> : vector<328x128xf32>
    %3 = tpu.matmul %1, %2, %cst {dimension_numbers = #tpu.dot_dimension_numbers<[1], [0], [0], [1], [0, 0, 1, 1], [], []>} : vector<328x128xbf16>, vector<128x128xbf16>, vector<328x128xf32> -> vector<328x128xf32>
    %4 = arith.truncf %3 : vector<328x128xf32> to vector<328x128xbf16>
    %c0_4 = arith.constant 0 : index
    %c0_5 = arith.constant 0 : index
    %c0_6 = arith.constant 0 : index
    %5 = vector.load %arg5[%c0_4, %c0_5, %c0_6] : memref<1x328x128xbf16, #tpu.memory_space<vmem>>, vector<1x328x128xbf16>
    %6 = vector.shape_cast %5 : vector<1x328x128xbf16> to vector<328x128xbf16>
    %7 = vector.shape_cast %4 : vector<328x128xbf16> to vector<1x328x128xbf16>
    tpu.vector_store %arg5[%c0_4, %c0_5, %c0_6], %7 {strides = array<i32>} : memref<1x328x128xbf16, #tpu.memory_space<vmem>>, vector<1x328x128xbf16>,
    %c0_7 = arith.constant 0 : index
    %c0_8 = arith.constant 0 : index
    %8 = vector.load %arg4[%c0_7, %c0_8] : memref<1x328xf32, #tpu.memory_space<vmem>>, vector<1x328xf32>
    %cst_9 = arith.constant dense<0.000000e+00> : vector<1x128xf32>
    %9 = tpu.matmul %8, %3, %cst_9 {dimension_numbers = #tpu.dot_dimension_numbers<[1], [0], [0], [1], [0, 0, 1, 1], [], []>} : vector<1x328xf32>, vector<328x128xf32>, vector<1x128xf32> -> vector<1x128xf32>
    %c0_10 = arith.constant 0 : index
    %c0_11 = arith.constant 0 : index
    %c0_12 = arith.constant 0 : index
    %10 = vector.load %arg6[%c0_10, %c0_11, %c0_12] : memref<1x2x128xf32, #tpu.memory_space<vmem>>, vector<1x1x128xf32>
    %11 = vector.shape_cast %10 : vector<1x1x128xf32> to vector<1x128xf32>
    %12 = vector.shape_cast %9 : vector<1x128xf32> to vector<1x1x128xf32>
    tpu.vector_store %arg6[%c0_10, %c0_11, %c0_12], %12 {strides = array<i32>} : memref<1x2x128xf32, #tpu.memory_space<vmem>>, vector<1x1x128xf32>,
    %13 = arith.mulf %3, %3 : vector<328x128xf32>
    %cst_13 = arith.constant dense<0.000000e+00> : vector<1x128xf32>
    %14 = tpu.matmul %8, %13, %cst_13 {dimension_numbers = #tpu.dot_dimension_numbers<[1], [0], [0], [1], [0, 0, 1, 1], [], []>} : vector<1x328xf32>, vector<328x128xf32>, vector<1x128xf32> -> vector<1x128xf32>
    %c0_14 = arith.constant 0 : index
    %c1 = arith.constant 1 : index
    %c0_15 = arith.constant 0 : index
    %15 = vector.load %arg6[%c0_14, %c1, %c0_15] : memref<1x2x128xf32, #tpu.memory_space<vmem>>, vector<1x1x128xf32>
    %16 = vector.shape_cast %15 : vector<1x1x128xf32> to vector<1x128xf32>
    %17 = vector.shape_cast %14 : vector<1x128xf32> to vector<1x1x128xf32>
    tpu.vector_store %arg6[%c0_14, %c1, %c0_15], %17 {strides = array<i32>} : memref<1x2x128xf32, #tpu.memory_space<vmem>>, vector<1x1x128xf32>,
    return
  }
  func.func @transform_0(%arg0: i32, %arg1: i32) -> (i32, i32, i32) {
    %c0_i32 = arith.constant 0 : i32
    %c0_i32_0 = arith.constant 0 : i32
    %c0_i32_1 = arith.constant 0 : i32
    return %arg1, %c0_i32, %c0_i32_0 : i32, i32, i32
  }
  func.func @transform_1(%arg0: i32, %arg1: i32) -> (i32, i32) {
    %c0_i32 = arith.constant 0 : i32
    %c0_i32_0 = arith.constant 0 : i32
    return %c0_i32, %arg0 : i32, i32
  }
  func.func @transform_2(%arg0: i32, %arg1: i32) -> (i32, i32) {
    %c0_i32 = arith.constant 0 : i32
    %c0_i32_0 = arith.constant 0 : i32
    %c0_i32_1 = arith.constant 0 : i32
    return %c0_i32, %c0_i32_0 : i32, i32
  }
  func.func @transform_3(%arg0: i32, %arg1: i32) -> (i32, i32, i32) {
    %c0_i32 = arith.constant 0 : i32
    %c0_i32_0 = arith.constant 0 : i32
    return %arg1, %c0_i32, %arg0 : i32, i32, i32
  }
  func.func @transform_4(%arg0: i32, %arg1: i32) -> (i32, i32, i32) {
    %c0_i32 = arith.constant 0 : i32
    %c0_i32_0 = arith.constant 0 : i32
    return %arg1, %c0_i32, %arg0 : i32, i32, i32
  }
}

module attributes {stable_mosaic.version = 11 : i64} {
  func.func @_bn_conv2_stats_kernel(%arg0: i32, %arg1: i32, %arg2: memref<1x328x128xbf16, #tpu.memory_space<vmem>>, %arg3: memref<1x128xf32, #tpu.memory_space<vmem>>, %arg4: memref<1x128xf32, #tpu.memory_space<vmem>>, %arg5: memref<328x1xf32, #tpu.memory_space<vmem>>, %arg6: memref<9x128x128xbf16, #tpu.memory_space<vmem>>, %arg7: memref<1x288xf32, #tpu.memory_space<vmem>>, %arg8: memref<1x288x128xf32, #tpu.memory_space<vmem>>, %arg9: memref<1x2x128xf32, #tpu.memory_space<vmem>>, %arg10: memref<328x128xbf16, #tpu.memory_space<vmem>>) attributes {dimension_semantics = [#tpu.dimension_semantics<parallel>, #tpu.dimension_semantics<parallel>], iteration_bounds = array<i64: 1, 2>, scalar_prefetch = 0 : i64, scratch_operands = 1 : i64, tpu.core_type = #tpu.core_type<tc>, window_params = [{transform_indices = @transform_0, window_bounds = array<i64: 1, 328, 128>}, {pipeline_mode = #tpu.pipeline_mode<synchronous>, transform_indices = @transform_1, window_bounds = array<i64: 1, 128>}, {pipeline_mode = #tpu.pipeline_mode<synchronous>, transform_indices = @transform_2, window_bounds = array<i64: 1, 128>}, {pipeline_mode = #tpu.pipeline_mode<synchronous>, transform_indices = @transform_3, window_bounds = array<i64: 328, 1>}, {transform_indices = @transform_4, window_bounds = array<i64: 9, 128, 128>}, {pipeline_mode = #tpu.pipeline_mode<synchronous>, transform_indices = @transform_5, window_bounds = array<i64: 1, 288>}, {transform_indices = @transform_6, window_bounds = array<i64: 1, 288, 128>}, {transform_indices = @transform_7, window_bounds = array<i64: 1, 2, 128>}]} {
    %c0 = arith.constant 0 : index
    %c0_0 = arith.constant 0 : index
    %c0_1 = arith.constant 0 : index
    %0 = vector.load %arg2[%c0, %c0_0, %c0_1] : memref<1x328x128xbf16, #tpu.memory_space<vmem>>, vector<1x328x128xbf16>
    %1 = vector.shape_cast %0 : vector<1x328x128xbf16> to vector<328x128xbf16>
    %2 = arith.extf %1 : vector<328x128xbf16> to vector<328x128xf32>
    %c0_2 = arith.constant 0 : index
    %c0_3 = arith.constant 0 : index
    %3 = vector.load %arg3[%c0_2, %c0_3] : memref<1x128xf32, #tpu.memory_space<vmem>>, vector<1x128xf32>
    %4 = vector.broadcast %3 : vector<1x128xf32> to vector<328x128xf32>
    %5 = arith.mulf %2, %4 : vector<328x128xf32>
    %c0_4 = arith.constant 0 : index
    %c0_5 = arith.constant 0 : index
    %6 = vector.load %arg4[%c0_4, %c0_5] : memref<1x128xf32, #tpu.memory_space<vmem>>, vector<1x128xf32>
    %7 = vector.broadcast %6 : vector<1x128xf32> to vector<328x128xf32>
    %8 = arith.addf %5, %7 : vector<328x128xf32>
    %cst = arith.constant 0.000000e+00 : f32
    %9 = vector.broadcast %cst : f32 to vector<328x128xf32>
    %10 = arith.maximumf %8, %9 : vector<328x128xf32>
    %c0_6 = arith.constant 0 : index
    %c0_7 = arith.constant 0 : index
    %11 = vector.load %arg5[%c0_6, %c0_7] : memref<328x1xf32, #tpu.memory_space<vmem>>, vector<328x1xf32>
    %cst_8 = arith.constant 0.000000e+00 : f32
    %12 = vector.broadcast %cst_8 : f32 to vector<328x1xf32>
    %13 = arith.cmpf ogt, %11, %12 : vector<328x1xf32>
    %cst_9 = arith.constant 0.000000e+00 : f32
    %14 = vector.shape_cast %13 : vector<328x1xi1> to vector<328x1xi1>
    %15 = vector.broadcast %14 : vector<328x1xi1> to vector<328x128xi1>
    %16 = vector.broadcast %cst_9 : f32 to vector<328x128xf32>
    %17 = arith.select %15, %10, %16 : vector<328x128xi1>, vector<328x128xf32>
    %18 = arith.truncf %17 : vector<328x128xf32> to vector<328x128xbf16>
    %c0_10 = arith.constant 0 : index
    %c0_11 = arith.constant 0 : index
    %19 = vector.load %arg10[%c0_10, %c0_11] : memref<328x128xbf16, #tpu.memory_space<vmem>>, vector<328x128xbf16>
    tpu.vector_store %arg10[%c0_10, %c0_11], %18 {strides = array<i32>} : memref<328x128xbf16, #tpu.memory_space<vmem>>, vector<328x128xbf16>,
    %c0_12 = arith.constant 0 : index
    %c0_13 = arith.constant 0 : index
    %20 = vector.load %arg10[%c0_12, %c0_13] : memref<328x128xbf16, #tpu.memory_space<vmem>>, vector<288x128xbf16>
    %c0_14 = arith.constant 0 : index
    %c0_15 = arith.constant 0 : index
    %c0_16 = arith.constant 0 : index
    %21 = vector.load %arg6[%c0_14, %c0_15, %c0_16] : memref<9x128x128xbf16, #tpu.memory_space<vmem>>, vector<1x128x128xbf16>
    %22 = vector.shape_cast %21 : vector<1x128x128xbf16> to vector<128x128xbf16>
    %cst_17 = arith.constant dense<0.000000e+00> : vector<288x128xf32>
    %23 = tpu.matmul %20, %22, %cst_17 {dimension_numbers = #tpu.dot_dimension_numbers<[1], [0], [0], [1], [0, 0, 1, 1], [], []>} : vector<288x128xbf16>, vector<128x128xbf16>, vector<288x128xf32> -> vector<288x128xf32>
    %c1 = arith.constant 1 : index
    %c0_18 = arith.constant 0 : index
    %24 = vector.load %arg10[%c1, %c0_18] : memref<328x128xbf16, #tpu.memory_space<vmem>>, vector<288x128xbf16>
    %c1_19 = arith.constant 1 : index
    %c0_20 = arith.constant 0 : index
    %c0_21 = arith.constant 0 : index
    %25 = vector.load %arg6[%c1_19, %c0_20, %c0_21] : memref<9x128x128xbf16, #tpu.memory_space<vmem>>, vector<1x128x128xbf16>
    %26 = vector.shape_cast %25 : vector<1x128x128xbf16> to vector<128x128xbf16>
    %cst_22 = arith.constant dense<0.000000e+00> : vector<288x128xf32>
    %27 = tpu.matmul %24, %26, %cst_22 {dimension_numbers = #tpu.dot_dimension_numbers<[1], [0], [0], [1], [0, 0, 1, 1], [], []>} : vector<288x128xbf16>, vector<128x128xbf16>, vector<288x128xf32> -> vector<288x128xf32>
    %28 = arith.addf %23, %27 : vector<288x128xf32>
    %c2 = arith.constant 2 : index
    %c0_23 = arith.constant 0 : index
    %29 = vector.load %arg10[%c2, %c0_23] : memref<328x128xbf16, #tpu.memory_space<vmem>>, vector<288x128xbf16>
    %c2_24 = arith.constant 2 : index
    %c0_25 = arith.constant 0 : index
    %c0_26 = arith.constant 0 : index
    %30 = vector.load %arg6[%c2_24, %c0_25, %c0_26] : memref<9x128x128xbf16, #tpu.memory_space<vmem>>, vector<1x128x128xbf16>
    %31 = vector.shape_cast %30 : vector<1x128x128xbf16> to vector<128x128xbf16>
    %cst_27 = arith.constant dense<0.000000e+00> : vector<288x128xf32>
    %32 = tpu.matmul %29, %31, %cst_27 {dimension_numbers = #tpu.dot_dimension_numbers<[1], [0], [0], [1], [0, 0, 1, 1], [], []>} : vector<288x128xbf16>, vector<128x128xbf16>, vector<288x128xf32> -> vector<288x128xf32>
    %33 = arith.addf %28, %32 : vector<288x128xf32>
    %c18 = arith.constant 18 : index
    %c0_28 = arith.constant 0 : index
    %34 = vector.load %arg10[%c18, %c0_28] : memref<328x128xbf16, #tpu.memory_space<vmem>>, vector<288x128xbf16>
    %c3 = arith.constant 3 : index
    %c0_29 = arith.constant 0 : index
    %c0_30 = arith.constant 0 : index
    %35 = vector.load %arg6[%c3, %c0_29, %c0_30] : memref<9x128x128xbf16, #tpu.memory_space<vmem>>, vector<1x128x128xbf16>
    %36 = vector.shape_cast %35 : vector<1x128x128xbf16> to vector<128x128xbf16>
    %cst_31 = arith.constant dense<0.000000e+00> : vector<288x128xf32>
    %37 = tpu.matmul %34, %36, %cst_31 {dimension_numbers = #tpu.dot_dimension_numbers<[1], [0], [0], [1], [0, 0, 1, 1], [], []>} : vector<288x128xbf16>, vector<128x128xbf16>, vector<288x128xf32> -> vector<288x128xf32>
    %38 = arith.addf %33, %37 : vector<288x128xf32>
    %c19 = arith.constant 19 : index
    %c0_32 = arith.constant 0 : index
    %39 = vector.load %arg10[%c19, %c0_32] : memref<328x128xbf16, #tpu.memory_space<vmem>>, vector<288x128xbf16>
    %c4 = arith.constant 4 : index
    %c0_33 = arith.constant 0 : index
    %c0_34 = arith.constant 0 : index
    %40 = vector.load %arg6[%c4, %c0_33, %c0_34] : memref<9x128x128xbf16, #tpu.memory_space<vmem>>, vector<1x128x128xbf16>
    %41 = vector.shape_cast %40 : vector<1x128x128xbf16> to vector<128x128xbf16>
    %cst_35 = arith.constant dense<0.000000e+00> : vector<288x128xf32>
    %42 = tpu.matmul %39, %41, %cst_35 {dimension_numbers = #tpu.dot_dimension_numbers<[1], [0], [0], [1], [0, 0, 1, 1], [], []>} : vector<288x128xbf16>, vector<128x128xbf16>, vector<288x128xf32> -> vector<288x128xf32>
    %43 = arith.addf %38, %42 : vector<288x128xf32>
    %c20 = arith.constant 20 : index
    %c0_36 = arith.constant 0 : index
    %44 = vector.load %arg10[%c20, %c0_36] : memref<328x128xbf16, #tpu.memory_space<vmem>>, vector<288x128xbf16>
    %c5 = arith.constant 5 : index
    %c0_37 = arith.constant 0 : index
    %c0_38 = arith.constant 0 : index
    %45 = vector.load %arg6[%c5, %c0_37, %c0_38] : memref<9x128x128xbf16, #tpu.memory_space<vmem>>, vector<1x128x128xbf16>
    %46 = vector.shape_cast %45 : vector<1x128x128xbf16> to vector<128x128xbf16>
    %cst_39 = arith.constant dense<0.000000e+00> : vector<288x128xf32>
    %47 = tpu.matmul %44, %46, %cst_39 {dimension_numbers = #tpu.dot_dimension_numbers<[1], [0], [0], [1], [0, 0, 1, 1], [], []>} : vector<288x128xbf16>, vector<128x128xbf16>, vector<288x128xf32> -> vector<288x128xf32>
    %48 = arith.addf %43, %47 : vector<288x128xf32>
    %c36 = arith.constant 36 : index
    %c0_40 = arith.constant 0 : index
    %49 = vector.load %arg10[%c36, %c0_40] : memref<328x128xbf16, #tpu.memory_space<vmem>>, vector<288x128xbf16>
    %c6 = arith.constant 6 : index
    %c0_41 = arith.constant 0 : index
    %c0_42 = arith.constant 0 : index
    %50 = vector.load %arg6[%c6, %c0_41, %c0_42] : memref<9x128x128xbf16, #tpu.memory_space<vmem>>, vector<1x128x128xbf16>
    %51 = vector.shape_cast %50 : vector<1x128x128xbf16> to vector<128x128xbf16>
    %cst_43 = arith.constant dense<0.000000e+00> : vector<288x128xf32>
    %52 = tpu.matmul %49, %51, %cst_43 {dimension_numbers = #tpu.dot_dimension_numbers<[1], [0], [0], [1], [0, 0, 1, 1], [], []>} : vector<288x128xbf16>, vector<128x128xbf16>, vector<288x128xf32> -> vector<288x128xf32>
    %53 = arith.addf %48, %52 : vector<288x128xf32>
    %c37 = arith.constant 37 : index
    %c0_44 = arith.constant 0 : index
    %54 = vector.load %arg10[%c37, %c0_44] : memref<328x128xbf16, #tpu.memory_space<vmem>>, vector<288x128xbf16>
    %c7 = arith.constant 7 : index
    %c0_45 = arith.constant 0 : index
    %c0_46 = arith.constant 0 : index
    %55 = vector.load %arg6[%c7, %c0_45, %c0_46] : memref<9x128x128xbf16, #tpu.memory_space<vmem>>, vector<1x128x128xbf16>
    %56 = vector.shape_cast %55 : vector<1x128x128xbf16> to vector<128x128xbf16>
    %cst_47 = arith.constant dense<0.000000e+00> : vector<288x128xf32>
    %57 = tpu.matmul %54, %56, %cst_47 {dimension_numbers = #tpu.dot_dimension_numbers<[1], [0], [0], [1], [0, 0, 1, 1], [], []>} : vector<288x128xbf16>, vector<128x128xbf16>, vector<288x128xf32> -> vector<288x128xf32>
    %58 = arith.addf %53, %57 : vector<288x128xf32>
    %c38 = arith.constant 38 : index
    %c0_48 = arith.constant 0 : index
    %59 = vector.load %arg10[%c38, %c0_48] : memref<328x128xbf16, #tpu.memory_space<vmem>>, vector<288x128xbf16>
    %c8 = arith.constant 8 : index
    %c0_49 = arith.constant 0 : index
    %c0_50 = arith.constant 0 : index
    %60 = vector.load %arg6[%c8, %c0_49, %c0_50] : memref<9x128x128xbf16, #tpu.memory_space<vmem>>, vector<1x128x128xbf16>
    %61 = vector.shape_cast %60 : vector<1x128x128xbf16> to vector<128x128xbf16>
    %cst_51 = arith.constant dense<0.000000e+00> : vector<288x128xf32>
    %62 = tpu.matmul %59, %61, %cst_51 {dimension_numbers = #tpu.dot_dimension_numbers<[1], [0], [0], [1], [0, 0, 1, 1], [], []>} : vector<288x128xbf16>, vector<128x128xbf16>, vector<288x128xf32> -> vector<288x128xf32>
    %63 = arith.addf %58, %62 : vector<288x128xf32>
    %c0_52 = arith.constant 0 : index
    %c0_53 = arith.constant 0 : index
    %c0_54 = arith.constant 0 : index
    %64 = vector.load %arg8[%c0_52, %c0_53, %c0_54] : memref<1x288x128xf32, #tpu.memory_space<vmem>>, vector<1x288x128xf32>
    %65 = vector.shape_cast %64 : vector<1x288x128xf32> to vector<288x128xf32>
    %66 = vector.shape_cast %63 : vector<288x128xf32> to vector<1x288x128xf32>
    tpu.vector_store %arg8[%c0_52, %c0_53, %c0_54], %66 {strides = array<i32>} : memref<1x288x128xf32, #tpu.memory_space<vmem>>, vector<1x288x128xf32>,
    %c0_55 = arith.constant 0 : index
    %c0_56 = arith.constant 0 : index
    %67 = vector.load %arg7[%c0_55, %c0_56] : memref<1x288xf32, #tpu.memory_space<vmem>>, vector<1x288xf32>
    %cst_57 = arith.constant dense<0.000000e+00> : vector<1x128xf32>
    %68 = tpu.matmul %67, %63, %cst_57 {dimension_numbers = #tpu.dot_dimension_numbers<[1], [0], [0], [1], [0, 0, 1, 1], [], []>} : vector<1x288xf32>, vector<288x128xf32>, vector<1x128xf32> -> vector<1x128xf32>
    %c0_58 = arith.constant 0 : index
    %c0_59 = arith.constant 0 : index
    %c0_60 = arith.constant 0 : index
    %69 = vector.load %arg9[%c0_58, %c0_59, %c0_60] : memref<1x2x128xf32, #tpu.memory_space<vmem>>, vector<1x1x128xf32>
    %70 = vector.shape_cast %69 : vector<1x1x128xf32> to vector<1x128xf32>
    %71 = vector.shape_cast %68 : vector<1x128xf32> to vector<1x1x128xf32>
    tpu.vector_store %arg9[%c0_58, %c0_59, %c0_60], %71 {strides = array<i32>} : memref<1x2x128xf32, #tpu.memory_space<vmem>>, vector<1x1x128xf32>,
    %72 = arith.mulf %63, %63 : vector<288x128xf32>
    %cst_61 = arith.constant dense<0.000000e+00> : vector<1x128xf32>
    %73 = tpu.matmul %67, %72, %cst_61 {dimension_numbers = #tpu.dot_dimension_numbers<[1], [0], [0], [1], [0, 0, 1, 1], [], []>} : vector<1x288xf32>, vector<288x128xf32>, vector<1x128xf32> -> vector<1x128xf32>
    %c0_62 = arith.constant 0 : index
    %c1_63 = arith.constant 1 : index
    %c0_64 = arith.constant 0 : index
    %74 = vector.load %arg9[%c0_62, %c1_63, %c0_64] : memref<1x2x128xf32, #tpu.memory_space<vmem>>, vector<1x1x128xf32>
    %75 = vector.shape_cast %74 : vector<1x1x128xf32> to vector<1x128xf32>
    %76 = vector.shape_cast %73 : vector<1x128xf32> to vector<1x1x128xf32>
    tpu.vector_store %arg9[%c0_62, %c1_63, %c0_64], %76 {strides = array<i32>} : memref<1x2x128xf32, #tpu.memory_space<vmem>>, vector<1x1x128xf32>,
    return
  }
  func.func @transform_0(%arg0: i32, %arg1: i32) -> (i32, i32, i32) {
    %c0_i32 = arith.constant 0 : i32
    %c0_i32_0 = arith.constant 0 : i32
    %c0_i32_1 = arith.constant 0 : i32
    return %arg1, %c0_i32, %c0_i32_0 : i32, i32, i32
  }
  func.func @transform_1(%arg0: i32, %arg1: i32) -> (i32, i32) {
    %c0_i32 = arith.constant 0 : i32
    %c0_i32_0 = arith.constant 0 : i32
    %c0_i32_1 = arith.constant 0 : i32
    return %c0_i32, %c0_i32_0 : i32, i32
  }
  func.func @transform_2(%arg0: i32, %arg1: i32) -> (i32, i32) {
    %c0_i32 = arith.constant 0 : i32
    %c0_i32_0 = arith.constant 0 : i32
    %c0_i32_1 = arith.constant 0 : i32
    return %c0_i32, %c0_i32_0 : i32, i32
  }
  func.func @transform_3(%arg0: i32, %arg1: i32) -> (i32, i32) {
    %c0_i32 = arith.constant 0 : i32
    %c0_i32_0 = arith.constant 0 : i32
    %c0_i32_1 = arith.constant 0 : i32
    return %c0_i32, %c0_i32_0 : i32, i32
  }
  func.func @transform_4(%arg0: i32, %arg1: i32) -> (i32, i32, i32) {
    %c0_i32 = arith.constant 0 : i32
    %c0_i32_0 = arith.constant 0 : i32
    %c0_i32_1 = arith.constant 0 : i32
    return %c0_i32, %c0_i32_0, %arg0 : i32, i32, i32
  }
  func.func @transform_5(%arg0: i32, %arg1: i32) -> (i32, i32) {
    %c0_i32 = arith.constant 0 : i32
    %c0_i32_0 = arith.constant 0 : i32
    %c0_i32_1 = arith.constant 0 : i32
    return %c0_i32, %c0_i32_0 : i32, i32
  }
  func.func @transform_6(%arg0: i32, %arg1: i32) -> (i32, i32, i32) {
    %c0_i32 = arith.constant 0 : i32
    %c0_i32_0 = arith.constant 0 : i32
    return %arg1, %c0_i32, %arg0 : i32, i32, i32
  }
  func.func @transform_7(%arg0: i32, %arg1: i32) -> (i32, i32, i32) {
    %c0_i32 = arith.constant 0 : i32
    %c0_i32_0 = arith.constant 0 : i32
    return %arg1, %c0_i32, %arg0 : i32, i32, i32
  }
}

module attributes {stable_mosaic.version = 11 : i64} {
  func.func @_bn_relu_kernel(%arg0: i32, %arg1: memref<1x288x128xf32, #tpu.memory_space<vmem>>, %arg2: memref<1x128xf32, #tpu.memory_space<vmem>>, %arg3: memref<1x128xf32, #tpu.memory_space<vmem>>, %arg4: memref<1x288x128xf32, #tpu.memory_space<vmem>>) attributes {dimension_semantics = [#tpu.dimension_semantics<parallel>], iteration_bounds = array<i64: 2>, scalar_prefetch = 0 : i64, scratch_operands = 0 : i64, tpu.core_type = #tpu.core_type<tc>, window_params = [{transform_indices = @transform_0, window_bounds = array<i64: 1, 288, 128>}, {pipeline_mode = #tpu.pipeline_mode<synchronous>, transform_indices = @transform_1, window_bounds = array<i64: 1, 128>}, {pipeline_mode = #tpu.pipeline_mode<synchronous>, transform_indices = @transform_2, window_bounds = array<i64: 1, 128>}, {transform_indices = @transform_3, window_bounds = array<i64: 1, 288, 128>}]} {
    %c0 = arith.constant 0 : index
    %c0_0 = arith.constant 0 : index
    %c0_1 = arith.constant 0 : index
    %0 = vector.load %arg1[%c0, %c0_0, %c0_1] : memref<1x288x128xf32, #tpu.memory_space<vmem>>, vector<1x288x128xf32>
    %1 = vector.shape_cast %0 : vector<1x288x128xf32> to vector<288x128xf32>
    %c0_2 = arith.constant 0 : index
    %c0_3 = arith.constant 0 : index
    %2 = vector.load %arg2[%c0_2, %c0_3] : memref<1x128xf32, #tpu.memory_space<vmem>>, vector<1x128xf32>
    %3 = vector.broadcast %2 : vector<1x128xf32> to vector<288x128xf32>
    %4 = arith.mulf %1, %3 : vector<288x128xf32>
    %c0_4 = arith.constant 0 : index
    %c0_5 = arith.constant 0 : index
    %5 = vector.load %arg3[%c0_4, %c0_5] : memref<1x128xf32, #tpu.memory_space<vmem>>, vector<1x128xf32>
    %6 = vector.broadcast %5 : vector<1x128xf32> to vector<288x128xf32>
    %7 = arith.addf %4, %6 : vector<288x128xf32>
    %cst = arith.constant 0.000000e+00 : f32
    %8 = vector.broadcast %cst : f32 to vector<288x128xf32>
    %9 = arith.maximumf %7, %8 : vector<288x128xf32>
    %c0_6 = arith.constant 0 : index
    %c0_7 = arith.constant 0 : index
    %c0_8 = arith.constant 0 : index
    %10 = vector.load %arg4[%c0_6, %c0_7, %c0_8] : memref<1x288x128xf32, #tpu.memory_space<vmem>>, vector<1x288x128xf32>
    %11 = vector.shape_cast %10 : vector<1x288x128xf32> to vector<288x128xf32>
    %12 = vector.shape_cast %9 : vector<288x128xf32> to vector<1x288x128xf32>
    tpu.vector_store %arg4[%c0_6, %c0_7, %c0_8], %12 {strides = array<i32>} : memref<1x288x128xf32, #tpu.memory_space<vmem>>, vector<1x288x128xf32>,
    return
  }
  func.func @transform_0(%arg0: i32) -> (i32, i32, i32) {
    %c0_i32 = arith.constant 0 : i32
    %c0_i32_0 = arith.constant 0 : i32
    %c0_i32_1 = arith.constant 0 : i32
    return %arg0, %c0_i32, %c0_i32_0 : i32, i32, i32
  }
  func.func @transform_1(%arg0: i32) -> (i32, i32) {
    %c0_i32 = arith.constant 0 : i32
    %c0_i32_0 = arith.constant 0 : i32
    %c0_i32_1 = arith.constant 0 : i32
    return %c0_i32, %c0_i32_0 : i32, i32
  }
  func.func @transform_2(%arg0: i32) -> (i32, i32) {
    %c0_i32 = arith.constant 0 : i32
    %c0_i32_0 = arith.constant 0 : i32
    %c0_i32_1 = arith.constant 0 : i32
    return %c0_i32, %c0_i32_0 : i32, i32
  }
  func.func @transform_3(%arg0: i32) -> (i32, i32, i32) {
    %c0_i32 = arith.constant 0 : i32
    %c0_i32_0 = arith.constant 0 : i32
    %c0_i32_1 = arith.constant 0 : i32
    return %arg0, %c0_i32, %c0_i32_0 : i32, i32, i32
  }
}

</mosaic_0001>

<bundles_post_ra>
// kernel: bridge_forward.5
= control target key start
LH: loop header
LB: loop body
LE: loop exit
PB: predicated region body
PF: predicated region fallthrough
CT: control target
= control target key end

     0   :  { %s468_s12 = smov 0   ;;  %s643_s0 = inlined_call_operand.vmem [shape: f32[2,288,128], index: 0, kind: input, shape index: {}]   ;;  %s644_s1 = inlined_call_operand.vmem [shape: f32[1,128], index: 1, kind: input, shape index: {}]   ;;  %s645_s2 = inlined_call_operand.vmem [shape: f32[1,128], index: 2, kind: input, shape index: {}]   ;;  %s646_s3 = inlined_call_operand.vmem [shape: f32[2,288,128], index: 3, kind: output, shape index: {}]  }
   0x1 LB: > { %s420_s13 = sadd.s32 4294967295, %s446_s12   ;;  %p424_p0 = scmp.ge.s32.totalorder %s446_s12, 1  ;;  %s446_s12 = sphi %s468_s12, %s13_s12  }
   0x2   : > { %p137_p1 = scmp.lt.s32.totalorder %s446_s12, 3 }
   0x4   : > { %p138_p2 = pnand %p424_p0, %p137_p1 }
   0x5   : > { %p161_p3 = scmp.lt.s32.totalorder (!%p138_p2), %s420_s13, 1 }
   0x6   : > { %141 = sbr.rel (%p138_p2) target bundleno = 48 (0x30), region = 32 }
   0xb   : > { %s648_s13 = smov (!%p161_p3, %s420_s13), 1  ;;  %v479_v0 = vld [vmem:[%s644_s1] ss:$0 sm:$0xff] }
   0xc   : > { %s431_s14 = smul.u32 288, %s648_s13  ;;  %v489_v1 = vld [vmem:[%s645_s2] ss:$0 sm:$0xff] }
   0xe   : > { %s484_s19 = scalar_lea.vmem %s643_s0, %s431_s14  ;;  %s512_s24 = scalar_lea.vmem %s646_s3, %s431_s14 }
   0xf   : > { %v171_v2 = vld [vmem:[%s484_s19] sm:$0xff]  ;;  %v172_v3 = vld [vmem:[%s484_s19 + $0x8] sm:$0xff]  ;;  %v173_v4 = vld [vmem:[%s484_s19 + $0x10] sm:$0xff] }
  0x10   : > { %v214_v5 = vmul.f32 %v479_v0, %v171_v2  ;;  %v215_v6 = vmul.f32 %v479_v0, %v172_v3  ;;  %v216_v7 = vmul.f32 %v479_v0, %v173_v4  ;;  %v174_v8 = vld [vmem:[%s484_s19 + $0x18] sm:$0xff]  ;;  %v175_v9 = vld [vmem:[%s484_s19 + $0x20] sm:$0xff]  ;;  %v176_v10 = vld [vmem:[%s484_s19 + $0x28] sm:$0xff] }
  0x11   : > { %v217_v11 = vmul.f32 %v479_v0, %v174_v8  ;;  %v218_v12 = vmul.f32 %v479_v0, %v175_v9  ;;  %v219_v13 = vmul.f32 %v479_v0, %v176_v10  ;;  %v177_v14 = vld [vmem:[%s484_s19 + $0x30] sm:$0xff]  ;;  %v178_v15 = vld [vmem:[%s484_s19 + $0x38] sm:$0xff]  ;;  %v179_v24 = vld [vmem:[%s484_s19 + $0x40] sm:$0xff] }
  0x12   : > { %v257_v16 = vadd.f32 %v489_v1, %v214_v5  ;;  %v258_v17 = vadd.f32 %v489_v1, %v215_v6  ;;  %v259_v18 = vadd.f32 %v489_v1, %v216_v7  ;;  %v220_v19 = vmul.f32 %v479_v0, %v177_v14  ;;  %v180_v25 = vld [vmem:[%s484_s19 + $0x48] sm:$0xff]  ;;  %v181_v26 = vld [vmem:[%s484_s19 + $0x50] sm:$0xff]  ;;  %v182_v31 = vld [vmem:[%s484_s19 + $0x58] sm:$0xff] }
  0x13   : > { %v260_v20 = vadd.f32 %v489_v1, %v217_v11  ;;  %v261_v21 = vadd.f32 %v489_v1, %v218_v12  ;;  %v262_v22 = vadd.f32 %v489_v1, %v219_v13  ;;  %v221_v23 = vmul.f32 %v479_v0, %v178_v15  ;;  %v183_v32 = vld [vmem:[%s484_s19 + $0x60] sm:$0xff]  ;;  %v184_v33 = vld [vmem:[%s484_s19 + $0x68] sm:$0xff]  ;;  %v185_v38 = vld [vmem:[%s484_s19 + $0x70] sm:$0xff] }
  0x14   : > { %v293_v27 = vmax.f32 %v257_v16, 0.0  ;;  %v294_v28 = vmax.f32 %v258_v17, 0.0  ;;  %v295_v29 = vmax.f32 %v259_v18, 0.0  ;;  %v263_v30 = vadd.f32 %v489_v1, %v220_v19  ;;  %v186_v43 = vld [vmem:[%s484_s19 + $0x78] sm:$0xff]  ;;  %v187_v56 = vld [vmem:[%s484_s19 + $0x80] sm:$0xff]  ;;  %v188_v57 = vld [vmem:[%s484_s19 + $0x88] sm:$0xff] }
  0x15   : > { %v296_v34 = vmax.f32 %v260_v20, 0.0  ;;  %v297_v35 = vmax.f32 %v261_v21, 0.0  ;;  %v298_v36 = vmax.f32 %v262_v22, 0.0  ;;  %v264_v37 = vadd.f32 %v489_v1, %v221_v23  ;;  %v189_v58 = vld [vmem:[%s484_s19 + $0x90] sm:$0xff]  ;;  %v190_v63 = vld [vmem:[%s484_s19 + $0x98] sm:$0xff]  ;;  %v191_v2 = vld [vmem:[%s484_s19 + $0xa0] sm:$0xff] }
  0x16   : > { %329 = vst [vmem:[%s512_s24] sm:$0xff] %v293_v27  ;;  %330 = vst [vmem:[%s512_s24 + $0x8] sm:$0xff] %v294_v28  ;;  %v299_v39 = vmax.f32 %v263_v30, 0.0  ;;  %v222_v40 = vmul.f32 %v479_v0, %v179_v24  ;;  %v223_v41 = vmul.f32 %v479_v0, %v180_v25  ;;  %v224_v42 = vmul.f32 %v479_v0, %v181_v26  ;;  %v192_v3 = vld [vmem:[%s484_s19 + $0xa8] sm:$0xff]  ;;  %v193_v8 = vld [vmem:[%s484_s19 + $0xb0] sm:$0xff] }
  0x17   : > { %331 = vst [vmem:[%s512_s24 + $0x10] sm:$0xff] %v295_v29  ;;  %332 = vst [vmem:[%s512_s24 + $0x18] sm:$0xff] %v296_v34  ;;  %v300_v44 = vmax.f32 %v264_v37, 0.0  ;;  %v225_v45 = vmul.f32 %v479_v0, %v182_v31  ;;  %v226_v46 = vmul.f32 %v479_v0, %v183_v32  ;;  %v227_v47 = vmul.f32 %v479_v0, %v184_v33  ;;  %v194_v13 = vld [vmem:[%s484_s19 + $0xb8] sm:$0xff]  ;;  %v195_v26 = vld [vmem:[%s484_s19 + $0xc0] sm:$0xff] }
  0x18   : > { %333 = vst [vmem:[%s512_s24 + $0x20] sm:$0xff] %v297_v35  ;;  %334 = vst [vmem:[%s512_s24 + $0x28] sm:$0xff] %v298_v36  ;;  %v265_v48 = vadd.f32 %v489_v1, %v222_v40  ;;  %v266_v49 = vadd.f32 %v489_v1, %v223_v41  ;;  %v267_v50 = vadd.f32 %v489_v1, %v224_v42  ;;  %v196_v27 = vld [vmem:[%s484_s19 + $0xc8] sm:$0xff]  ;;  %v197_v28 = vld [vmem:[%s484_s19 + $0xd0] sm:$0xff] }
  0x19   : > { %335 = vst [vmem:[%s512_s24 + $0x30] sm:$0xff] %v299_v39  ;;  %v228_v51 = vmul.f32 %v479_v0, %v185_v38  ;;  %336 = vst [vmem:[%s512_s24 + $0x38] sm:$0xff] %v300_v44  ;;  %v268_v52 = vadd.f32 %v489_v1, %v225_v45  ;;  %v269_v53 = vadd.f32 %v489_v1, %v226_v46  ;;  %v198_v33 = vld [vmem:[%s484_s19 + $0xd8] sm:$0xff]  ;;  %v199_v34 = vld [vmem:[%s484_s19 + $0xe0] sm:$0xff] }
  0x1a   : > { %v270_v54 = vadd.f32 %v489_v1, %v227_v47  ;;  %v229_v55 = vmul.f32 %v479_v0, %v186_v43  ;;  %v301_v59 = vmax.f32 %v265_v48, 0.0  ;;  %v302_v60 = vmax.f32 %v266_v49, 0.0  ;;  %v200_v35 = vld [vmem:[%s484_s19 + $0xe8] sm:$0xff]  ;;  %v201_v40 = vld [vmem:[%s484_s19 + $0xf0] sm:$0xff]  ;;  %v202_v45 = vld [vmem:[%s484_s19 + $0xf8] sm:$0xff] }
  0x1b   : > { %v303_v61 = vmax.f32 %v267_v50, 0.0  ;;  %v271_v62 = vadd.f32 %v489_v1, %v228_v51  ;;  %v304_v4 = vmax.f32 %v268_v52, 0.0  ;;  %v305_v5 = vmax.f32 %v269_v53, 0.0 }
  0x1c   : > { %v306_v6 = vmax.f32 %v270_v54, 0.0  ;;  %v272_v7 = vadd.f32 %v489_v1, %v229_v55  ;;  %337 = vst [vmem:[%s512_s24 + $0x40] sm:$0xff] %v301_v59  ;;  %338 = vst [vmem:[%s512_s24 + $0x48] sm:$0xff] %v302_v60  ;;  %v230_v10 = vmul.f32 %v479_v0, %v187_v56  ;;  %v231_v11 = vmul.f32 %v479_v0, %v188_v57  ;;  %v204_v59 = vld [vmem:[%s484_s19 + $0x108] sm:$0xff]  ;;  %v205_v60 = vld [vmem:[%s484_s19 + $0x110] sm:$0xff] }
  0x1d   : > { %339 = vst [vmem:[%s512_s24 + $0x50] sm:$0xff] %v303_v61  ;;  %v307_v9 = vmax.f32 %v271_v62, 0.0  ;;  %v232_v12 = vmul.f32 %v479_v0, %v189_v58  ;;  %340 = vst [vmem:[%s512_s24 + $0x58] sm:$0xff] %v304_v4  ;;  %v233_v15 = vmul.f32 %v479_v0, %v190_v63  ;;  %v234_v16 = vmul.f32 %v479_v0, %v191_v2  ;;  %v203_v58 = vld [vmem:[%s484_s19 + $0x100] sm:$0xff] }
  0x1e   : > { %341 = vst [vmem:[%s512_s24 + $0x60] sm:$0xff] %v305_v5  ;;  %342 = vst [vmem:[%s512_s24 + $0x68] sm:$0xff] %v306_v6  ;;  %v308_v14 = vmax.f32 %v272_v7, 0.0  ;;  %v235_v17 = vmul.f32 %v479_v0, %v192_v3  ;;  %v273_v18 = vadd.f32 %v489_v1, %v230_v10  ;;  %v274_v19 = vadd.f32 %v489_v1, %v231_v11  ;;  %v206_v3 = vld [vmem:[%s484_s19 + $0x118] sm:$0xff] }
  0x1f   : > { %343 = vst [vmem:[%s512_s24 + $0x70] sm:$0xff] %v307_v9  ;;  %v275_v20 = vadd.f32 %v489_v1, %v232_v12  ;;  %v236_v21 = vmul.f32 %v479_v0, %v193_v8  ;;  %v276_v22 = vadd.f32 %v489_v1, %v233_v15  ;;  %v277_v23 = vadd.f32 %v489_v1, %v234_v16 }
  0x20   : > { %344 = vst [vmem:[%s512_s24 + $0x78] sm:$0xff] %v308_v14  ;;  %v278_v24 = vadd.f32 %v489_v1, %v235_v17  ;;  %v237_v25 = vmul.f32 %v479_v0, %v194_v13  ;;  %v309_v29 = vmax.f32 %v273_v18, 0.0  ;;  %v310_v30 = vmax.f32 %v274_v19, 0.0 }
  0x21   : > { %v311_v31 = vmax.f32 %v275_v20, 0.0  ;;  %v279_v32 = vadd.f32 %v489_v1, %v236_v21  ;;  %v312_v36 = vmax.f32 %v276_v22, 0.0  ;;  %v313_v37 = vmax.f32 %v277_v23, 0.0 }
  0x22   : > { %v314_v38 = vmax.f32 %v278_v24, 0.0  ;;  %v280_v39 = vadd.f32 %v489_v1, %v237_v25  ;;  %345 = vst [vmem:[%s512_s24 + $0x80] sm:$0xff] %v309_v29  ;;  %346 = vst [vmem:[%s512_s24 + $0x88] sm:$0xff] %v310_v30  ;;  %v238_v42 = vmul.f32 %v479_v0, %v195_v26  ;;  %v239_v43 = vmul.f32 %v479_v0, %v196_v27 }
  0x23   : > { %347 = vst [vmem:[%s512_s24 + $0x90] sm:$0xff] %v311_v31  ;;  %v315_v41 = vmax.f32 %v279_v32, 0.0  ;;  %v240_v44 = vmul.f32 %v479_v0, %v197_v28  ;;  %348 = vst [vmem:[%s512_s24 + $0x98] sm:$0xff] %v312_v36  ;;  %v241_v47 = vmul.f32 %v479_v0, %v198_v33  ;;  %v242_v48 = vmul.f32 %v479_v0, %v199_v34 }
  0x24   : > { %349 = vst [vmem:[%s512_s24 + $0xa0] sm:$0xff] %v313_v37  ;;  %350 = vst [vmem:[%s512_s24 + $0xa8] sm:$0xff] %v314_v38  ;;  %v316_v46 = vmax.f32 %v280_v39, 0.0  ;;  %v243_v49 = vmul.f32 %v479_v0, %v200_v35  ;;  %v281_v50 = vadd.f32 %v489_v1, %v238_v42  ;;  %v282_v51 = vadd.f32 %v489_v1, %v239_v43 }
  0x25   : > { %351 = vst [vmem:[%s512_s24 + $0xb0] sm:$0xff] %v315_v41  ;;  %v283_v52 = vadd.f32 %v489_v1, %v240_v44  ;;  %v244_v53 = vmul.f32 %v479_v0, %v201_v40  ;;  %v284_v54 = vadd.f32 %v489_v1, %v241_v47  ;;  %v285_v55 = vadd.f32 %v489_v1, %v242_v48 }
  0x26   : > { %352 = vst [vmem:[%s512_s24 + $0xb8] sm:$0xff] %v316_v46  ;;  %v286_v56 = vadd.f32 %v489_v1, %v243_v49  ;;  %v245_v57 = vmul.f32 %v479_v0, %v202_v45  ;;  %v317_v61 = vmax.f32 %v281_v50, 0.0  ;;  %v318_v62 = vmax.f32 %v282_v51, 0.0 }
  0x27   : > { %v319_v63 = vmax.f32 %v283_v52, 0.0  ;;  %v287_v2 = vadd.f32 %v489_v1, %v244_v53  ;;  %v320_v4 = vmax.f32 %v284_v54, 0.0  ;;  %v321_v5 = vmax.f32 %v285_v55, 0.0 }
  0x28   : > { %v322_v6 = vmax.f32 %v286_v56, 0.0  ;;  %v288_v7 = vadd.f32 %v489_v1, %v245_v57  ;;  %353 = vst [vmem:[%s512_s24 + $0xc0] sm:$0xff] %v317_v61  ;;  %354 = vst [vmem:[%s512_s24 + $0xc8] sm:$0xff] %v318_v62  ;;  %v246_v9 = vmul.f32 %v479_v0, %v203_v58  ;;  %v247_v10 = vmul.f32 %v479_v0, %v204_v59 }
  0x29   : > { %355 = vst [vmem:[%s512_s24 + $0xd0] sm:$0xff] %v319_v63  ;;  %v323_v8 = vmax.f32 %v287_v2, 0.0  ;;  %v248_v11 = vmul.f32 %v479_v0, %v205_v60  ;;  %356 = vst [vmem:[%s512_s24 + $0xd8] sm:$0xff] %v320_v4  ;;  %v249_v13 = vmul.f32 %v479_v0, %v206_v3 }
  0x2a   : > { %357 = vst [vmem:[%s512_s24 + $0xe0] sm:$0xff] %v321_v5  ;;  %358 = vst [vmem:[%s512_s24 + $0xe8] sm:$0xff] %v322_v6  ;;  %v324_v12 = vmax.f32 %v288_v7, 0.0  ;;  %v289_v14 = vadd.f32 %v489_v1, %v246_v9  ;;  %v290_v15 = vadd.f32 %v489_v1, %v247_v10 }
  0x2b   : > { %359 = vst [vmem:[%s512_s24 + $0xf0] sm:$0xff] %v323_v8  ;;  %v291_v16 = vadd.f32 %v489_v1, %v248_v11  ;;  %v292_v17 = vadd.f32 %v489_v1, %v249_v13 }
  0x2c   : > { %360 = vst [vmem:[%s512_s24 + $0xf8] sm:$0xff] %v324_v12  ;;  %v325_v18 = vmax.f32 %v289_v14, 0.0  ;;  %v326_v19 = vmax.f32 %v290_v15, 0.0 }
  0x2d   : > { %v327_v20 = vmax.f32 %v291_v16, 0.0  ;;  %v328_v21 = vmax.f32 %v292_v17, 0.0 }
  0x2e   : > { %361 = vst [vmem:[%s512_s24 + $0x100] sm:$0xff] %v325_v18  ;;  %362 = vst [vmem:[%s512_s24 + $0x108] sm:$0xff] %v326_v19 }
  0x2f   : > { %363 = vst [vmem:[%s512_s24 + $0x110] sm:$0xff] %v327_v20  ;;  %364 = vst [vmem:[%s512_s24 + $0x118] sm:$0xff] %v328_v21 }
  0x30 PF: > { %s13_s12 = sadd.s32 1, %s446_s12  }
  0x31   : > { %p10_p4 = scmp.ge.s32.totalorder %s13_s12, 4  }
  0x33   :  { %12 = sbr.rel (!%p10_p4) target bundleno = 1 (0x1), region = 62 }

// kernel: bridge_forward.3
= control target key start
LH: loop header
LB: loop body
LE: loop exit
PB: predicated region body
PF: predicated region fallthrough
CT: control target
= control target key end

     0   :  { %s1993_s15 = smov 0   ;;  %s1995_s16 = smov 0   ;;  %s2445_s0 = inlined_call_operand.vmem [shape: bf16[2,328,128], index: 0, kind: input, shape index: {}]   ;;  %s2446_s1 = inlined_call_operand.vmem [shape: bf16[128,128], index: 1, kind: input, shape index: {}]   ;;  %s2447_s2 = inlined_call_operand.vmem [shape: f32[1,328], index: 2, kind: input, shape index: {}]   ;;  %s2448_s3 = inlined_call_operand.vmem [shape: bf16[2,328,128], index: 3, kind: output, shape index: {0}]   ;;  %s2449_s4 = inlined_call_operand.vmem [shape: f32[2,2,128], index: 4, kind: output, shape index: {1}]  }
   0x1   :  { %s1997_s17 = smov 0  }
   0x2 LB: > { %s24_s18 = sadd.s32 1, %s1960_s16  ;;  %p1371_p0 = scmp.ge.s32.totalorder %s1964_s17, 1  ;;  %s1964_s17 = sphi %s1997_s17, %s15_s17   ;;  %s1960_s16 = sphi %s1995_s16, %s2451_s16   ;;  %s1956_s15 = sphi %s1993_s15, %s2450_s15  }
   0x3   : > { %p25_p1 = scmp.ge.s32.totalorder %s24_s18, 2  ;;  %p190_p2 = scmp.lt.s32.totalorder %s1964_s17, 3 }
   0x5   : > { %s2453_s18 = smov (%p25_p1, %s24_s18), 0  ;;  %p191_p3 = pnand %p1371_p0, %p190_p2 }
   0x6   : > { %p230_p4 = scmp.lt.s32.totalorder (!%p191_p3), %s1956_s15, 1 }
   0x7   : > { %194 = sbr.rel (%p191_p3) target bundleno = 646 (0x286), region = 32 }
   0xc   : > { %v1913_v0 = vld [vmem:[%s2446_s1 + $0x38] sm:$0xff]   ;;  %v1966_v1 = vmov 0.0   ;;  %v1914_v2 = vld [vmem:[%s2446_s1 + $0x30] sm:$0xff]   ;;  %vm1967_vm0 = vmmov 0   ;;  %s2455_s15 = smov (!%p230_p4, %s1956_s15), 1  ;;  %v1915_v3 = vld [vmem:[%s2446_s1 + $0x28] sm:$0xff]   ;;  %v892_v41 = vlaneseq }
   0xd   : > { %1728 = vmatprep.subr.bf16.mxu0 %v1966_v1  ;;  %1870 = vmatprep.subr.bf16.mxu1 %v1966_v1  ;;  %s1886_s25 = smul.u32 164, %s2455_s15  ;;  %v1916_v4 = vld [vmem:[%s2446_s1 + $0x20] sm:$0xff]   ;;  %v1917_v5 = vld [vmem:[%s2446_s1 + $0x18] sm:$0xff]   ;;  %v1918_v6 = vld [vmem:[%s2446_s1 + $0x10] sm:$0xff]   ;;  %vm906_vm1 = vcmask 588800   ;;  %s1374_s22 = sshll.u32 %s2455_s15, 1 }
   0xe   : > { %1729 = vmatpush3.bf16.msra.mxu0 %v1913_v0  ;;  %1744 = vmatprep.mubr.msk.bf16.mxu0 %vm1967_vm0, %v1966_v1  ;;  %v1919_v7 = vld [vmem:[%s2446_s1 + $0x8] sm:$0xff]   ;;  %v1920_v8 = vld [vmem:[%s2446_s1] sm:$0xff]   ;;  %v893_v44 = vshrl.u32 %v892_v41, 7 }
   0xf   : > { %1730 = vmatprep.subr.bf16.mxu0 %v1966_v1  ;;  %1878 = vmatpush3.bf16.msra.mxu1 %v1913_v0  ;;  %s2037_s28 = scalar_lea.vmem %s2445_s0, %s1886_s25  ;;  %s2133_s19 = scalar_lea.vmem %s2448_s3, %s1886_s25  ;;  %v890_v50 = vld [vmem:[%s2447_s2] sm:$0x7] }
  0x10   : > { %1871 = vmatprep.subr.bf16.mxu1 %v1966_v1  ;;  %1804 = vmatprep.mubr.msk.bf16.mxu1 %vm1967_vm0, %v1966_v1  ;;  %v1921_v9 = vld [vmem:[%s2037_s28] sm:$0xff]   ;;  %v1928_v10 = vld [vmem:[%s2037_s28 + $0x78] sm:$0xff]   ;;  %v1922_v11 = vld [vmem:[%s2037_s28 + $0x8] sm:$0xff]   ;;  %v898_v47 = vsub.s32 1, %v893_v44  ;;  %v894_v51 = vsub.s32 0, %v893_v44  ;;  %v902_v58 = vsub.s32 2, %v893_v44  ;;  %s253_s25 = scalar_lea.vmem %s2449_s4, %s1374_s22 }
  0x11   : > { %v1937_v12 = vld [vmem:[%s2037_s28 + $0x80] sm:$0xff]   ;;  %v1923_v13 = vld [vmem:[%s2037_s28 + $0x10] sm:$0xff]   ;;  %v1938_v14 = vld [vmem:[%s2037_s28 + $0x88] sm:$0xff]  }
  0x12   : > { %1731 = vmatpush3.bf16.msra.mxu0 %v1914_v2  ;;  %v1924_v15 = vld [vmem:[%s2037_s28 + $0x18] sm:$0xff]   ;;  %v1939_v16 = vld [vmem:[%s2037_s28 + $0x90] sm:$0xff]   ;;  %v1925_v17 = vld [vmem:[%s2037_s28 + $0x20] sm:$0xff]   ;;  %v2161_v54 = vrot.slane %v890_v50, %v898_v47  ;;  %v2164_v56 = vrot.slane %v890_v50, %v894_v51  ;;  %v2172_v61 = vrot.slane %v890_v50, %v902_v58 }
  0x13   : > { %1732 = vmatprep.subr.bf16.mxu0 %v1966_v1  ;;  %1879 = vmatpush3.bf16.msra.mxu1 %v1914_v2  ;;  %v1940_v18 = vld [vmem:[%s2037_s28 + $0x98] sm:$0xff]   ;;  %v1926_v19 = vld [vmem:[%s2037_s28 + $0x28] sm:$0xff]   ;;  %v1941_v20 = vld [vmem:[%s2037_s28 + $0xa0] ss:$0 sps:$4 sm:$0xff]  }
  0x14   : > { %1872 = vmatprep.subr.bf16.mxu1 %v1966_v1  ;;  %v1927_v21 = vld [vmem:[%s2037_s28 + $0x30] sm:$0xff]   ;;  %v1929_v22 = vld [vmem:[%s2037_s28 + $0x38] sm:$0xff]   ;;  %v1930_v23 = vld [vmem:[%s2037_s28 + $0x40] sm:$0xff]  }
  0x15   : > { %v1931_v24 = vld [vmem:[%s2037_s28 + $0x48] sm:$0xff]   ;;  %v1932_v25 = vld [vmem:[%s2037_s28 + $0x50] sm:$0xff]   ;;  %v1933_v26 = vld [vmem:[%s2037_s28 + $0x58] sm:$0xff]  }
  0x16   : > { %1733 = vmatpush3.bf16.msra.mxu0 %v1915_v3  ;;  %v1934_v27 = vld [vmem:[%s2037_s28 + $0x60] sm:$0xff]   ;;  %v1935_v28 = vld [vmem:[%s2037_s28 + $0x68] sm:$0xff]   ;;  %v1936_v29 = vld [vmem:[%s2037_s28 + $0x70] sm:$0xff]  }
  0x17   : > { %1734 = vmatprep.subr.bf16.mxu0 %v1966_v1  ;;  %1880 = vmatpush3.bf16.msra.mxu1 %v1915_v3 }
  0x18   : > { %1873 = vmatprep.subr.bf16.mxu1 %v1966_v1 }
  0x1a   : > { %1735 = vmatpush3.bf16.msra.mxu0 %v1916_v4 }
  0x1b   : > { %1736 = vmatprep.subr.bf16.mxu0 %v1966_v1  ;;  %1881 = vmatpush3.bf16.msra.mxu1 %v1916_v4 }
  0x1c   : > { %1874 = vmatprep.subr.bf16.mxu1 %v1966_v1 }
  0x1e   : > { %1737 = vmatpush3.bf16.msra.mxu0 %v1917_v5 }
  0x1f   : > { %1738 = vmatprep.subr.bf16.mxu0 %v1966_v1  ;;  %1882 = vmatpush3.bf16.msra.mxu1 %v1917_v5 }
  0x20   : > { %1875 = vmatprep.subr.bf16.mxu1 %v1966_v1 }
  0x22   : > { %1739 = vmatpush3.bf16.msra.mxu0 %v1918_v6 }
  0x23   : > { %1740 = vmatprep.subr.bf16.mxu0 %v1966_v1  ;;  %1883 = vmatpush3.bf16.msra.mxu1 %v1918_v6 }
  0x24   : > { %1876 = vmatprep.subr.bf16.mxu1 %v1966_v1 }
  0x26   : > { %1741 = vmatpush3.bf16.msra.mxu0 %v1919_v7 }
  0x27   : > { %1742 = vmatprep.subr.bf16.mxu0 %v1966_v1  ;;  %1884 = vmatpush3.bf16.msra.mxu1 %v1919_v7 }
  0x28   : > { %1877 = vmatprep.subr.bf16.mxu1 %v1966_v1 }
  0x2a   : > { %1743 = vmatpush3.bf16.msra.mxu0 %v1920_v8 }
  0x2b   : > { %1885 = vmatpush3.bf16.msra.mxu1 %v1920_v8 }
  0x2d   : > { %1745 = vmatmul.mubr.bf16.vlgmr.msra.gmra.mxu0 %v1921_v9 }
  0x2e   : > { %1748 = vmatprep.mubr.msk.bf16.mxu0 %vm1967_vm0, %v1966_v1  ;;  %1805 = vmatmul.mubr.bf16.vlgmr.msra.gmra.mxu1 %v1928_v10 }
  0x2f   : > { %1808 = vmatprep.mubr.msk.bf16.mxu1 %vm1967_vm0, %v1966_v1 }
  0x35   : > { %1749 = vmatmul.mubr.bf16.gmra.mxu0 %v1922_v11 }
  0x36   : > { %1752 = vmatprep.mubr.msk.bf16.mxu0 %vm1967_vm0, %v1966_v1  ;;  %1809 = vmatmul.mubr.bf16.gmra.mxu1 %v1937_v12 }
  0x37   : > { %1812 = vmatprep.mubr.msk.bf16.mxu1 %vm1967_vm0, %v1966_v1 }
  0x3d   : > { %1753 = vmatmul.mubr.bf16.gmra.mxu0 %v1923_v13 }
  0x3e   : > { %1756 = vmatprep.mubr.msk.bf16.mxu0 %vm1967_vm0, %v1966_v1  ;;  %1813 = vmatmul.mubr.bf16.gmra.mxu1 %v1938_v14 }
  0x3f   : > { %1816 = vmatprep.mubr.msk.bf16.mxu1 %vm1967_vm0, %v1966_v1 }
  0x45   : > { %1757 = vmatmul.mubr.bf16.gmra.mxu0 %v1924_v15 }
  0x46   : > { %1760 = vmatprep.mubr.msk.bf16.mxu0 %vm1967_vm0, %v1966_v1  ;;  %1817 = vmatmul.mubr.bf16.gmra.mxu1 %v1939_v16 }
  0x47   : > { %1820 = vmatprep.mubr.msk.bf16.mxu1 %vm1967_vm0, %v1966_v1 }
  0x4d   : > { %1761 = vmatmul.mubr.bf16.gmra.mxu0 %v1925_v17 }
  0x4e   : > { %1764 = vmatprep.mubr.msk.bf16.mxu0 %vm1967_vm0, %v1966_v1  ;;  %1821 = vmatmul.mubr.bf16.gmra.mxu1 %v1940_v18 }
  0x4f   : > { %1824 = vmatprep.mubr.msk.bf16.mxu1 %vm1967_vm0, %v1966_v1 }
  0x55   : > { %1765 = vmatmul.mubr.bf16.gmra.mxu0 %v1926_v19 }
  0x56   : > { %1768 = vmatprep.mubr.msk.bf16.mxu0 %vm1967_vm0, %v1966_v1  ;;  %1825 = vmatmul.mubr.bf16.gmra.mxu1 %v1941_v20 }
  0x57   : > { %973 = vmatprep.mubr.f32.mxu1 %v2161_v54 }
  0x5d   : > { %1769 = vmatmul.mubr.bf16.gmra.mxu0 %v1927_v21 }
  0x5e   : > { %1772 = vmatprep.mubr.msk.bf16.mxu0 %vm1967_vm0, %v1966_v1 }
  0x65   : > { %1773 = vmatmul.mubr.bf16.gmra.mxu0 %v1929_v22 }
  0x66   : > { %1776 = vmatprep.mubr.msk.bf16.mxu0 %vm1967_vm0, %v1966_v1 }
  0x6d   : > { %1777 = vmatmul.mubr.bf16.gmra.mxu0 %v1930_v23 }
  0x6e   : > { %1780 = vmatprep.mubr.msk.bf16.mxu0 %vm1967_vm0, %v1966_v1 }
  0x75   : > { %1781 = vmatmul.mubr.bf16.gmra.mxu0 %v1931_v24 }
  0x76   : > { %1784 = vmatprep.mubr.msk.bf16.mxu0 %vm1967_vm0, %v1966_v1 }
  0x7d   : > { %1785 = vmatmul.mubr.bf16.gmra.mxu0 %v1932_v25 }
  0x7e   : > { %1788 = vmatprep.mubr.msk.bf16.mxu0 %vm1967_vm0, %v1966_v1 }
  0x85   : > { %1789 = vmatmul.mubr.bf16.gmra.mxu0 %v1933_v26 }
  0x86   : > { %1792 = vmatprep.mubr.msk.bf16.mxu0 %vm1967_vm0, %v1966_v1 }
  0x8d   : > { %1793 = vmatmul.mubr.bf16.gmra.mxu0 %v1934_v27 }
  0x8e   : > { %1796 = vmatprep.mubr.msk.bf16.mxu0 %vm1967_vm0, %v1966_v1 }
  0x95   : > { %1797 = vmatmul.mubr.bf16.gmra.mxu0 %v1935_v28 }
  0x96   : > { %1800 = vmatprep.mubr.msk.bf16.mxu0 %vm1967_vm0, %v1966_v1 }
  0x9d   : > { %1801 = vmatmul.mubr.bf16.gmra.mxu0 %v1936_v29 }
  0xed   : > { %v2124_v30 = vpop.f32.mrf.mxu0 }
  0xee   : > { %v2126_v31 = vpop.f32.mrf.mxu1 }
  0xef   : > { %v1746_v32 = vpop.f32.mrf.mxu0 }
  0xf0   : > { %v1806_v33 = vpop.f32.mrf.mxu1 }
  0xf1   : > { %v2135_v34 = vpop.f32.mrf.mxu0 }
  0xf2   : > { %v1493_v35 = vpack.c.bf16 %v2135_v34, %v2124_v30  ;;  %v2139_v36 = vpop.f32.mrf.mxu1 }
  0xf3   : > { %v1747_v37 = vpop.f32.mrf.mxu0  ;;  %v1568_v38 = vpack.c.bf16 %v2139_v36, %v2126_v31  ;;  %1638 = vmatprep.subr.mxu1 %v2139_v36 }
  0xf4   : > { %1494 = vst [vmem:[%s2133_s19] sm:$0xff] %v1493_v35   ;;  %v1807_v39 = vpop.f32.mrf.mxu1 }
  0xf5   : > { %v2145_v40 = vpop.f32.mrf.mxu0  ;;  %1604 = vst [vmem:[%s2133_s19 + $0x78] sm:$0xff] %v1568_v38  }
  0xf6   : > { %v2148_v42 = vpop.f32.mrf.mxu1 }
  0xf7   : > { %v1750_v43 = vpop.f32.mrf.mxu0 }
  0xf8   : > { %v1810_v45 = vpop.f32.mrf.mxu1 }
  0xf9   : > { %v2150_v46 = vpop.f32.mrf.mxu0 }
  0xfa   : > { %v1498_v48 = vpack.c.bf16 %v2150_v46, %v2145_v40  ;;  %v2154_v49 = vpop.f32.mrf.mxu1 }
  0xfb   : > { %v1751_v52 = vpop.f32.mrf.mxu0  ;;  %v1573_v53 = vpack.c.bf16 %v2154_v49, %v2148_v42 }
  0xfc   : > { %1590 = vst [vmem:[%s2133_s19 + $0x8] sm:$0xff] %v1498_v48   ;;  %v1811_v55 = vpop.f32.mrf.mxu1 }
  0xfd   : > { %v2166_v57 = vpop.f32.mrf.mxu0  ;;  %1605 = vst [vmem:[%s2133_s19 + $0x80] sm:$0xff] %v1573_v53  }
  0xfe   : > { %v2170_v59 = vpop.f32.mrf.mxu1 }
  0xff   : > { %v1754_v60 = vpop.f32.mrf.mxu0 }
 0x100   : > { %v1814_v62 = vpop.f32.mrf.mxu1 }
 0x101   : > { %v2174_v63 = vpop.f32.mrf.mxu0 }
 0x102   : > { %v1503_v0 = vpack.c.bf16 %v2174_v63, %v2166_v57  ;;  %v2178_v2 = vpop.f32.mrf.mxu1 }
 0x103   : > { %v1755_v3 = vpop.f32.mrf.mxu0  ;;  %v1578_v4 = vpack.c.bf16 %v2178_v2, %v2170_v59 }
 0x104   : > { %1591 = vst [vmem:[%s2133_s19 + $0x10] sm:$0xff] %v1503_v0   ;;  %v1815_v5 = vpop.f32.mrf.mxu1 }
 0x105   : > { %v2183_v6 = vpop.f32.mrf.mxu0  ;;  %1606 = vst [vmem:[%s2133_s19 + $0x88] sm:$0xff] %v1578_v4  }
 0x106   : > { %v2186_v7 = vpop.f32.mrf.mxu1 }
 0x107   : > { %v1758_v8 = vpop.f32.mrf.mxu0 }
 0x108   : > { %v1818_v9 = vpop.f32.mrf.mxu1 }
 0x109   : > { %v2188_v10 = vpop.f32.mrf.mxu0 }
 0x10a   : > { %v1508_v11 = vpack.c.bf16 %v2188_v10, %v2183_v6  ;;  %v2192_v12 = vpop.f32.mrf.mxu1 }
 0x10b   : > { %v1759_v13 = vpop.f32.mrf.mxu0  ;;  %v1583_v14 = vpack.c.bf16 %v2192_v12, %v2186_v7 }
 0x10c   : > { %1592 = vst [vmem:[%s2133_s19 + $0x18] sm:$0xff] %v1508_v11   ;;  %v1819_v15 = vpop.f32.mrf.mxu1 }
 0x10d   : > { %v2197_v16 = vpop.f32.mrf.mxu0  ;;  %1607 = vst [vmem:[%s2133_s19 + $0x90] sm:$0xff] %v1583_v14  }
 0x10e   : > { %v2200_v17 = vpop.f32.mrf.mxu1 }
 0x10f   : > { %v1762_v18 = vpop.f32.mrf.mxu0 }
 0x110   : > { %v1822_v19 = vpop.f32.mrf.mxu1 }
 0x111   : > { %v2202_v20 = vpop.f32.mrf.mxu0 }
 0x112   : > { %v1513_v21 = vpack.c.bf16 %v2202_v20, %v2197_v16  ;;  %v2206_v22 = vpop.f32.mrf.mxu1 }
 0x113   : > { %v1763_v23 = vpop.f32.mrf.mxu0  ;;  %v1588_v24 = vpack.c.bf16 %v2206_v22, %v2200_v17 }
 0x114   : > { %1593 = vst [vmem:[%s2133_s19 + $0x20] sm:$0xff] %v1513_v21   ;;  %v1823_v25 = vpop.f32.mrf.mxu1 }
 0x115   : > { %v2211_v26 = vpop.f32.mrf.mxu0  ;;  %1608 = vst [vmem:[%s2133_s19 + $0x98] sm:$0xff] %v1588_v24  }
 0x116   : > { %v2214_v27 = vpop.f32.mrf.mxu1 }
 0x117   : > { %v1766_v28 = vpop.f32.mrf.mxu0  ;;  %v1489_v29 = vpack.c.bf16 %v2214_v27, %v2214_v27 }
 0x118   : > { %v1826_v32 = vpop.f32.mrf.mxu1 }
 0x119   : > { %v2218_v33 = vpop.f32.mrf.mxu0  ;;  %889 = vst [vmem:[%s2133_s19 + $0xa0] sm:$0xf] %v1489_v29 }
 0x11a   : > { %v1518_v35 = vpack.c.bf16 %v2218_v33, %v2211_v26  ;;  %v681_v37 = vpop.f32.mrf.mxu1 }
 0x11b   : > { %v1767_v38 = vpop.f32.mrf.mxu0 }
 0x11c   : > { %1594 = vst [vmem:[%s2133_s19 + $0x28] sm:$0xff] %v1518_v35   ;;  %v1827_v39 = vpop.f32.mrf.mxu1 }
 0x11d   : > { %v2224_v41 = vpop.f32.mrf.mxu0 }
 0x11f   : > { %v1770_v43 = vpop.f32.mrf.mxu0 }
 0x121   : > { %v2226_v44 = vpop.f32.mrf.mxu0 }
 0x122   : > { %v1523_v45 = vpack.c.bf16 %v2226_v44, %v2224_v41 }
 0x123   : > { %v1771_v47 = vpop.f32.mrf.mxu0 }
 0x124   : > { %1595 = vst [vmem:[%s2133_s19 + $0x30] sm:$0xff] %v1523_v45  }
 0x125   : > { %v2231_v48 = vpop.f32.mrf.mxu0 }
 0x127   : > { %v1774_v50 = vpop.f32.mrf.mxu0 }
 0x129   : > { %v2233_v51 = vpop.f32.mrf.mxu0 }
 0x12a   : > { %v1528_v52 = vpack.c.bf16 %v2233_v51, %v2231_v48  ;;  %1639 = vmatpush3.msra.mxu1 %v2233_v51 }
 0x12b   : > { %v1775_v53 = vpop.f32.mrf.mxu0  ;;  %1640 = vmatprep.subr.mxu1 %v2126_v31 }
 0x12c   : > { %1596 = vst [vmem:[%s2133_s19 + $0x38] sm:$0xff] %v1528_v52   ;;  %1641 = vmatpush3.msra.mxu1 %v2231_v48 }
 0x12d   : > { %v2241_v55 = vpop.f32.mrf.mxu0 }
 0x12f   : > { %v1778_v58 = vpop.f32.mrf.mxu0 }
 0x131   : > { %v2243_v60 = vpop.f32.mrf.mxu0 }
 0x132   : > { %v1533_v62 = vpack.c.bf16 %v2243_v60, %v2241_v55 }
 0x133   : > { %v1779_v0 = vpop.f32.mrf.mxu0 }
 0x134   : > { %1597 = vst [vmem:[%s2133_s19 + $0x40] sm:$0xff] %v1533_v62   ;;  %v1081_v0 = vmul.f32 %v2139_v36, %v2139_v36 }
 0x135   : > { %v2248_v3 = vpop.f32.mrf.mxu0 }
 0x137   : > { %v1782_v4 = vpop.f32.mrf.mxu0 }
 0x138   : > { %v1065_v4 = vmul.f32 %v2233_v51, %v2233_v51  ;;  %v1063_v51 = vmul.f32 %v2226_v44, %v2226_v44 }
 0x139   : > { %v2250_v5 = vpop.f32.mrf.mxu0 }
 0x13a   : > { %v1538_v8 = vpack.c.bf16 %v2250_v5, %v2248_v3 }
 0x13b   : > { %v1783_v9 = vpop.f32.mrf.mxu0 }
 0x13c   : > { %1598 = vst [vmem:[%s2133_s19 + $0x48] sm:$0xff] %v1538_v8   ;;  %v1080_v8 = vmul.f32 %v2126_v31, %v2126_v31  ;;  %v1064_v9 = vmul.f32 %v2231_v48, %v2231_v48  ;;  %v1062_v31 = vmul.f32 %v2224_v41, %v2224_v41 }
 0x13d   : > { %v2255_v11 = vpop.f32.mrf.mxu0 }
 0x13f   : > { %v1786_v13 = vpop.f32.mrf.mxu0 }
 0x141   : > { %v2257_v14 = vpop.f32.mrf.mxu0 }
 0x142   : > { %v1543_v15 = vpack.c.bf16 %v2257_v14, %v2255_v11 }
 0x143   : > { %v1787_v18 = vpop.f32.mrf.mxu0 }
 0x144   : > { %1599 = vst [vmem:[%s2133_s19 + $0x50] sm:$0xff] %v1543_v15   ;;  %v1060_v15 = vmul.f32 %v2211_v26, %v2211_v26  ;;  %v1059_v18 = vmul.f32 %v2202_v20, %v2202_v20 }
 0x145   : > { %v2262_v19 = vpop.f32.mrf.mxu0 }
 0x147   : > { %v1790_v21 = vpop.f32.mrf.mxu0 }
 0x148   : > { %v1058_v21 = vmul.f32 %v2197_v16, %v2197_v16 }
 0x149   : > { %v2264_v23 = vpop.f32.mrf.mxu0 }
 0x14a   : > { %v1548_v24 = vpack.c.bf16 %v2264_v23, %v2262_v19 }
 0x14b   : > { %v1791_v25 = vpop.f32.mrf.mxu0 }
 0x14c   : > { %1600 = vst [vmem:[%s2133_s19 + $0x58] sm:$0xff] %v1548_v24   ;;  %v1057_v24 = vmul.f32 %v2188_v10, %v2188_v10  ;;  %v1056_v25 = vmul.f32 %v2183_v6, %v2183_v6 }
 0x14d   : > { %v2269_v28 = vpop.f32.mrf.mxu0 }
 0x14f   : > { %v1794_v29 = vpop.f32.mrf.mxu0 }
 0x151   : > { %v2271_v32 = vpop.f32.mrf.mxu0 }
 0x152   : > { %v1553_v35 = vpack.c.bf16 %v2271_v32, %v2269_v28 }
 0x153   : > { %v1795_v37 = vpop.f32.mrf.mxu0 }
 0x154   : > { %1601 = vst [vmem:[%s2133_s19 + $0x60] sm:$0xff] %v1553_v35  }
 0x155   : > { %v2276_v38 = vpop.f32.mrf.mxu0 }
 0x157   : > { %v1798_v39 = vpop.f32.mrf.mxu0 }
 0x159   : > { %v2278_v43 = vpop.f32.mrf.mxu0 }
 0x15a   : > { %v1558_v45 = vpack.c.bf16 %v2278_v43, %v2276_v38  ;;  %v1077_v48 = vmul.f32 %v2278_v43, %v2278_v43 }
 0x15b   : > { %v1799_v47 = vpop.f32.mrf.mxu0 }
 0x15c   : > { %1602 = vst [vmem:[%s2133_s19 + $0x68] sm:$0xff] %v1558_v45  }
 0x15d   : > { %v2283_v50 = vpop.f32.mrf.mxu0 }
 0x15e   : > { %v1078_v13 = vmul.f32 %v2283_v50, %v2283_v50 }
 0x15f   : > { %v1802_v52 = vpop.f32.mrf.mxu0 }
 0x161   : > { %v633_v53 = vpop.f32.mrf.mxu0 }
 0x162   : > { %v1563_v58 = vpack.c.bf16 %v633_v53, %v2283_v50  ;;  %1642 = vmatprep.subr.mxu1 %v633_v53  ;;  %v1079_v36 = vmul.f32 %v633_v53, %v633_v53 }
 0x163   : > { %v1803_v62 = vpop.f32.mrf.mxu0  ;;  %1643 = vmatpush3.msra.mxu1 %v2226_v44  ;;  %v1076_v44 = vmul.f32 %v2276_v38, %v2276_v38 }
 0x164   : > { %1603 = vst [vmem:[%s2133_s19 + $0x70] sm:$0xff] %v1563_v58   ;;  %1644 = vmatprep.subr.mxu1 %v2283_v50 }
 0x165   : > { %1645 = vmatpush3.msra.mxu1 %v2224_v41  ;;  %v1075_v41 = vmul.f32 %v2271_v32, %v2271_v32 }
 0x166   : > { %1646 = vmatprep.subr.mxu1 %v2278_v43 }
 0x167   : > { %1647 = vmatpush3.msra.mxu1 %v2218_v33 }
 0x168   : > { %1648 = vmatprep.subr.mxu1 %v2276_v38 }
 0x169   : > { %1649 = vmatpush3.msra.mxu1 %v2211_v26  ;;  %v1073_v26 = vmul.f32 %v2264_v23, %v2264_v23 }
 0x16a   : > { %1650 = vmatprep.subr.mxu1 %v2271_v32 }
 0x16b   : > { %1651 = vmatpush3.msra.mxu1 %v2202_v20  ;;  %v1072_v20 = vmul.f32 %v2262_v19, %v2262_v19 }
 0x16c   : > { %1652 = vmatprep.subr.mxu1 %v2269_v28 }
 0x16d   : > { %1653 = vmatpush3.msra.mxu1 %v2197_v16  ;;  %v1071_v16 = vmul.f32 %v2257_v14, %v2257_v14 }
 0x16e   : > { %1654 = vmatprep.subr.mxu1 %v2264_v23  ;;  %v1055_v23 = vmul.f32 %v2174_v63, %v2174_v63 }
 0x16f   : > { %1655 = vmatpush3.msra.mxu1 %v2188_v10  ;;  %v1070_v10 = vmul.f32 %v2255_v11, %v2255_v11 }
 0x170   : > { %1656 = vmatprep.subr.mxu1 %v2262_v19  ;;  %v1054_v19 = vmul.f32 %v2166_v57, %v2166_v57 }
 0x171   : > { %1657 = vmatpush3.msra.mxu1 %v2183_v6  ;;  %v1069_v6 = vmul.f32 %v2250_v5, %v2250_v5 }
 0x172   : > { %1658 = vmatprep.subr.mxu1 %v2257_v14  ;;  %v1053_v14 = vmul.f32 %v2150_v46, %v2150_v46 }
 0x173   : > { %1659 = vmatpush3.msra.mxu1 %v2174_v63  ;;  %v1068_v63 = vmul.f32 %v2248_v3, %v2248_v3 }
 0x174   : > { %1660 = vmatprep.subr.mxu1 %v2255_v11  ;;  %v1052_v11 = vmul.f32 %v2145_v40, %v2145_v40 }
 0x175   : > { %1661 = vmatpush3.msra.mxu1 %v2166_v57  ;;  %v1067_v57 = vmul.f32 %v2243_v60, %v2243_v60 }
 0x176   : > { %1662 = vmatprep.subr.mxu1 %v2250_v5  ;;  %v1051_v5 = vmul.f32 %v2135_v34, %v2135_v34 }
 0x177   : > { %1663 = vmatpush3.msra.mxu1 %v2150_v46  ;;  %v1066_v46 = vmul.f32 %v2241_v55, %v2241_v55 }
 0x178   : > { %1664 = vmatprep.subr.mxu1 %v2248_v3  ;;  %v1050_v3 = vmul.f32 %v2124_v30, %v2124_v30 }
 0x179   : > { %1665 = vmatpush3.msra.mxu1 %v2145_v40  ;;  %v1090_v40 = vmul.f32 %v2214_v27, %v2214_v27 }
 0x17a   : > { %1666 = vmatprep.subr.mxu1 %v2243_v60 }
 0x17b   : > { %1667 = vmatpush3.msra.mxu1 %v2135_v34  ;;  %v1089_v34 = vmul.f32 %v2206_v22, %v2206_v22 }
 0x17c   : > { %1668 = vmatprep.subr.mxu1 %v2241_v55 }
 0x17d   : > { %1669 = vmatpush3.msra.mxu1 %v2124_v30  ;;  %v1088_v30 = vmul.f32 %v2200_v17, %v2200_v17 }
 0x17e   : > { %1828 = vmatprep.subr.mxu1 %v1966_v1  ;;  %974 = vmatmul.mubr.f32.vlgmr.msra.gmra.mxu1 %v2164_v56 }
 0x17f   : > { %1829 = vmatpush3.msra.mxu1 %v2214_v27  ;;  %1846 = vmatprep.mubr.msk.f32.mxu1 %vm1967_vm0, %v1966_v1  ;;  %v1087_v27 = vmul.f32 %v2192_v12, %v2192_v12 }
 0x180   : > { %1830 = vmatprep.subr.mxu1 %v1966_v1 }
 0x181   : > { %1831 = vmatpush3.msra.mxu1 %v2206_v22  ;;  %v1085_v22 = vmul.f32 %v2178_v2, %v2178_v2 }
 0x182   : > { %1832 = vmatprep.subr.mxu1 %v1966_v1 }
 0x183   : > { %1833 = vmatpush3.msra.mxu1 %v2200_v17  ;;  %v1084_v17 = vmul.f32 %v2170_v59, %v2170_v59 }
 0x184   : > { %1834 = vmatprep.subr.mxu1 %v1966_v1 }
 0x185   : > { %1835 = vmatpush3.msra.mxu1 %v2192_v12  ;;  %v1083_v12 = vmul.f32 %v2154_v49, %v2154_v49 }
 0x186   : > { %1836 = vmatprep.subr.mxu1 %v1966_v1 }
 0x187   : > { %1837 = vmatpush3.msra.mxu1 %v2186_v7 }
 0x188   : > { %1838 = vmatprep.subr.mxu1 %v1966_v1 }
 0x189   : > { %1839 = vmatpush3.msra.mxu1 %v2178_v2 }
 0x18a   : > { %1840 = vmatprep.subr.mxu1 %v1966_v1 }
 0x18b   : > { %1841 = vmatpush3.msra.mxu1 %v2170_v59 }
 0x18c   : > { %1842 = vmatprep.subr.mxu1 %v1966_v1 }
 0x18d   : > { %1843 = vmatpush3.msra.mxu1 %v2154_v49 }
 0x18e   : > { %1844 = vmatprep.subr.mxu1 %v1966_v1 }
 0x18f   : > { %1845 = vmatpush3.msra.mxu1 %v2148_v42 }
 0x190   : > { %1847 = vmatmul.mubr.msk.f32.vlgmr.msra.gmra.mxu1 %vm906_vm1, %v2172_v61  ;;  %1683 = vmatprep.subr.mxu1 %v1081_v0 }
 0x191   : > { %1684 = vmatpush3.msra.mxu1 %v1065_v4  ;;  %1155 = vmatprep.mubr.f32.mxu1 %v2161_v54  ;;  %v1061_v54 = vmul.f32 %v2218_v33, %v2218_v33  ;;  %v1074_v33 = vmul.f32 %v2269_v28, %v2269_v28 }
 0x192   : > { %1685 = vmatprep.subr.mxu1 %v1080_v8 }
 0x193   : > { %1686 = vmatpush3.msra.mxu1 %v1064_v9 }
 0x194   : > { %1687 = vmatprep.subr.mxu1 %v1079_v36 }
 0x195   : > { %1688 = vmatpush3.msra.mxu1 %v1063_v51 }
 0x196   : > { %1689 = vmatprep.subr.mxu1 %v1078_v13 }
 0x197   : > { %1690 = vmatpush3.msra.mxu1 %v1062_v31 }
 0x198   : > { %1691 = vmatprep.subr.mxu1 %v1077_v48 }
 0x199   : > { %1692 = vmatpush3.msra.mxu1 %v1061_v54 }
 0x19a   : > { %1693 = vmatprep.subr.mxu1 %v1076_v44 }
 0x19b   : > { %1694 = vmatpush3.msra.mxu1 %v1060_v15 }
 0x19c   : > { %1695 = vmatprep.subr.mxu1 %v1075_v41 }
 0x19d   : > { %1696 = vmatpush3.msra.mxu1 %v1059_v18 }
 0x19e   : > { %1697 = vmatprep.subr.mxu1 %v1074_v33 }
 0x19f   : > { %1698 = vmatpush3.msra.mxu1 %v1058_v21 }
 0x1a0   : > { %1699 = vmatprep.subr.mxu1 %v1073_v26 }
 0x1a1   : > { %1700 = vmatpush3.msra.mxu1 %v1057_v24 }
 0x1a2   : > { %1701 = vmatprep.subr.mxu1 %v1072_v20 }
 0x1a3   : > { %1702 = vmatpush3.msra.mxu1 %v1056_v25 }
 0x1a4   : > { %1703 = vmatprep.subr.mxu1 %v1071_v16 }
 0x1a5   : > { %1704 = vmatpush3.msra.mxu1 %v1055_v23 }
 0x1a6   : > { %1705 = vmatprep.subr.mxu1 %v1070_v10 }
 0x1a7   : > { %1706 = vmatpush3.msra.mxu1 %v1054_v19 }
 0x1a8   : > { %1707 = vmatprep.subr.mxu1 %v1069_v6 }
 0x1a9   : > { %1708 = vmatpush3.msra.mxu1 %v1053_v14 }
 0x1aa   : > { %1709 = vmatprep.subr.mxu1 %v1068_v63 }
 0x1ab   : > { %1710 = vmatpush3.msra.mxu1 %v1052_v11 }
 0x1ac   : > { %1711 = vmatprep.subr.mxu1 %v1067_v57 }
 0x1ad   : > { %1712 = vmatpush3.msra.mxu1 %v1051_v5 }
 0x1ae   : > { %1713 = vmatprep.subr.mxu1 %v1066_v46 }
 0x1af   : > { %1714 = vmatpush3.msra.mxu1 %v1050_v3 }
 0x1b0   : > { %1849 = vmatprep.subr.mxu1 %v1966_v1  ;;  %1156 = vmatmul.mubr.f32.vlgmr.msra.gmra.mxu1 %v2164_v56  ;;  %v1086_v56 = vmul.f32 %v2186_v7, %v2186_v7  ;;  %v1082_v7 = vmul.f32 %v2148_v42, %v2148_v42 }
 0x1b1   : > { %1850 = vmatpush3.msra.mxu1 %v1090_v40  ;;  %1867 = vmatprep.mubr.msk.f32.mxu1 %vm1967_vm0, %v1966_v1 }
 0x1b2   : > { %1851 = vmatprep.subr.mxu1 %v1966_v1 }
 0x1b3   : > { %1852 = vmatpush3.msra.mxu1 %v1089_v34 }
 0x1b4   : > { %1853 = vmatprep.subr.mxu1 %v1966_v1 }
 0x1b5   : > { %1854 = vmatpush3.msra.mxu1 %v1088_v30 }
 0x1b6   : > { %1855 = vmatprep.subr.mxu1 %v1966_v1 }
 0x1b7   : > { %1856 = vmatpush3.msra.mxu1 %v1087_v27 }
 0x1b8   : > { %1857 = vmatprep.subr.mxu1 %v1966_v1 }
 0x1b9   : > { %1858 = vmatpush3.msra.mxu1 %v1086_v56 }
 0x1ba   : > { %1859 = vmatprep.subr.mxu1 %v1966_v1 }
 0x1bb   : > { %1860 = vmatpush3.msra.mxu1 %v1085_v22 }
 0x1bc   : > { %1861 = vmatprep.subr.mxu1 %v1966_v1 }
 0x1bd   : > { %1862 = vmatpush3.msra.mxu1 %v1084_v17 }
 0x1be   : > { %1863 = vmatprep.subr.mxu1 %v1966_v1 }
 0x1bf   : > { %1864 = vmatpush3.msra.mxu1 %v1083_v12 }
 0x1c0   : > { %1865 = vmatprep.subr.mxu1 %v1966_v1 }
 0x1c1   : > { %1866 = vmatpush3.msra.mxu1 %v1082_v7 }
 0x1c2   : > { %1868 = vmatmul.mubr.msk.f32.vlgmr.msra.gmra.mxu1 %vm906_vm1, %v2172_v61 }
 0x23e   : > { %v1670_v59 = vpop.f32.mrf.mxu1 }
 0x240   : > { %v1671_v2 = vpop.f32.mrf.mxu1 }
 0x241   : > { %v1672_v55 = vadd.f32 %v1671_v2, %v1670_v59 }
 0x250   : > { %v1045_v49 = vpop.f32.mrf.mxu1 }
 0x251   : > { %v1046_v60 = vadd.f32 %v1672_v55, %v1045_v49 }
 0x252   : > { %v1848_v28 = vpop.f32.mrf.mxu1 }
 0x253   : > { %1049 = vst [vmem:[%s253_s25] sm:$0x1] %v1046_v60 }
 0x270   : > { %v1715_v42 = vpop.f32.mrf.mxu1 }
 0x272   : > { %v1716_v29 = vpop.f32.mrf.mxu1 }
 0x273   : > { %v1717_v32 = vadd.f32 %v1716_v29, %v1715_v42 }
 0x282   : > { %v1227_v1 = vpop.f32.mrf.mxu1 }
 0x283   : > { %v1228_v35 = vadd.f32 %v1717_v32, %v1227_v1 }
 0x284   : > { %v1869_v37 = vpop.f32.mrf.mxu1 }
 0x285   : > { %1231 = vst [vmem:[%s253_s25 + $0x1] sm:$0x1] %v1228_v35 }
 0x286 PF: > { %s15_s17 = sadd.s32 1, %s1964_s17   ;;  %s2450_s15 = smov %s1960_s16 }
 0x287   : > { %p12_p5 = scmp.ge.s32.totalorder %s15_s17, 4   ;;  %s2451_s16 = smov %s2453_s18 }
 0x289   :  { %14 = sbr.rel (!%p12_p5) target bundleno = 2 (0x2), region = 77 }

// kernel: bridge_forward.4
= control target key start
LH: loop header
LB: loop body
LE: loop exit
PB: predicated region body
PF: predicated region fallthrough
CT: control target
= control target key end

     0   :  { %s6891_s24 = smov 0   ;;  %s6893_s25 = smov 0   ;;  %s9155_s0 = inlined_call_operand.vmem [shape: bf16[2,328,128], index: 0, kind: input, shape index: {}]   ;;  %s9156_s1 = inlined_call_operand.vmem [shape: f32[1,128], index: 1, kind: input, shape index: {}]   ;;  %s9157_s2 = inlined_call_operand.vmem [shape: f32[1,128], index: 2, kind: input, shape index: {}]   ;;  %s9158_s3 = inlined_call_operand.vmem [shape: f32[328,1], index: 3, kind: input, shape index: {}]   ;;  %s9159_s4 = inlined_call_operand.vmem [shape: bf16[9,128,128], index: 4, kind: input, shape index: {}]   ;;  %s9160_s5 = inlined_call_operand.vmem [shape: f32[1,288], index: 5, kind: input, shape index: {}]   ;;  %s9161_s6 = inlined_call_operand.vmem [shape: f32[2,288,128], index: 6, kind: output, shape index: {0}]   ;;  %s9162_s7 = inlined_call_operand.vmem [shape: f32[2,2,128], index: 7, kind: output, shape index: {1}]  }
   0x1   :  { %s6895_s26 = smov 0  }
   0x2 LB: > { %s27_s27 = sadd.s32 1, %s6842_s25  ;;  %p5281_p0 = scmp.ge.s32.totalorder %s6846_s26, 1  ;;  %s6846_s26 = sphi %s6895_s26, %s18_s26   ;;  %s6842_s25 = sphi %s6893_s25, %s9230_s25   ;;  %s6838_s24 = sphi %s6891_s24, %s9229_s24  }
   0x3   : > { %p28_p1 = scmp.ge.s32.totalorder %s27_s27, 2  ;;  %p265_p2 = scmp.lt.s32.totalorder %s6846_s26, 3 }
   0x5   : > { %s9232_s27 = smov (%p28_p1, %s27_s27), 0  ;;  %p266_p3 = pnand %p5281_p0, %p265_p2 }
   0x7   : > { %269 = sbr.rel (%p266_p3) target bundleno = 984 (0x3d8), region = 44 }
   0xc   : > { %v557_v0 = vld [vmem:[%s9158_s3 + $0x10] sm:$0xff]  ;;  %v555_v1 = vld [vmem:[%s9158_s3] sm:$0xff]  ;;  %v558_v2 = vld [vmem:[%s9158_s3 + $0x18] sm:$0xff]  ;;  %v6848_v3 = vmov 0   ;;  %p311_p4 = scmp.lt.s32.totalorder %s6838_s24, 1 }
   0xd   : > { %6687 = vset.pattern.permute.xlu1 %v6848_v3  ;;  %6686 = vset.pattern.permute.xlu0 %v6848_v3  ;;  %vm598_vm0 = vcmp.gt.f32.partialorder %v557_v0, 0.0  ;;  %vm596_vm1 = vcmp.gt.f32.partialorder %v555_v1, 0.0  ;;  %vm599_vm2 = vcmp.gt.f32.partialorder %v558_v2, 0.0  ;;  %v556_v4 = vld [vmem:[%s9158_s3 + $0x8] sm:$0xff]  ;;  %v559_v8 = vld [vmem:[%s9158_s3 + $0x20] sm:$0xff]  ;;  %v562_v11 = vld [vmem:[%s9158_s3 + $0x38] sm:$0xff] }
   0xe   : > { %v639_v5 = vsel %vm598_vm0, 1, %v6848_v3  ;;  %v637_v6 = vsel %vm596_vm1, 1, %v6848_v3  ;;  %vm597_vm3 = vcmp.gt.f32.partialorder %v556_v4, 0.0  ;;  %v560_v7 = vld [vmem:[%s9158_s3 + $0x28] sm:$0xff]  ;;  %v640_v9 = vsel %vm599_vm2, 1, %v6848_v3  ;;  %v561_v12 = vld [vmem:[%s9158_s3 + $0x30] sm:$0xff] }
   0xf   : > { %685 = vperm.xlu1 %6687, %v639_v5   ;;  %679 = vperm.xlu0 %6686, %v637_v6   ;;  %v638_v10 = vsel %vm597_vm3, 1, %v6848_v3  ;;  %vm601_vm4 = vcmp.gt.f32.partialorder %v560_v7, 0.0  ;;  %vm600_vm5 = vcmp.gt.f32.partialorder %v559_v8, 0.0  ;;  %vm603_vm6 = vcmp.gt.f32.partialorder %v562_v11, 0.0  ;;  %v564_v15 = vld [vmem:[%s9158_s3 + $0x48] sm:$0xff]  ;;  %v563_v16 = vld [vmem:[%s9158_s3 + $0x40] sm:$0xff] }
  0x10   : > { %v642_v13 = vsel %vm601_vm4, 1, %v6848_v3  ;;  %v641_v14 = vsel %vm600_vm5, 1, %v6848_v3  ;;  %vm602_vm7 = vcmp.gt.f32.partialorder %v561_v12, 0.0  ;;  %v644_v17 = vsel %vm603_vm6, 1, %v6848_v3  ;;  %v566_v19 = vld [vmem:[%s9158_s3 + $0x58] sm:$0xff]  ;;  %v565_v20 = vld [vmem:[%s9158_s3 + $0x50] sm:$0xff] }
  0x11   : > { %v643_v18 = vsel %vm602_vm7, 1, %v6848_v3  ;;  %vm605_vm8 = vcmp.gt.f32.partialorder %v564_v15, 0.0  ;;  %vm604_vm9 = vcmp.gt.f32.partialorder %v563_v16, 0.0  ;;  %vm607_vm10 = vcmp.gt.f32.partialorder %v566_v19, 0.0  ;;  %v568_v23 = vld [vmem:[%s9158_s3 + $0x68] sm:$0xff]  ;;  %v567_v24 = vld [vmem:[%s9158_s3 + $0x60] sm:$0xff] }
  0x12   : > { %v646_v21 = vsel %vm605_vm8, 1, %v6848_v3  ;;  %v645_v22 = vsel %vm604_vm9, 1, %v6848_v3  ;;  %vm606_vm11 = vcmp.gt.f32.partialorder %v565_v20, 0.0  ;;  %v570_v25 = vld [vmem:[%s9158_s3 + $0x78] sm:$0xff]  ;;  %v648_v27 = vsel %vm607_vm10, 1, %v6848_v3  ;;  %v569_v29 = vld [vmem:[%s9158_s3 + $0x70] sm:$0xff] }
  0x13   : > { %688 = vperm.xlu1 %6687, %v640_v9   ;;  %682 = vperm.xlu0 %6686, %v638_v10   ;;  %v6688_v26 = vld [vmem:[%s9159_s4 + $0x38] sm:$0xff]   ;;  %v647_v28 = vsel %vm606_vm11, 1, %v6848_v3  ;;  %vm609_vm12 = vcmp.gt.f32.partialorder %v568_v23, 0.0  ;;  %vm608_vm13 = vcmp.gt.f32.partialorder %v567_v24, 0.0  ;;  %vm611_vm14 = vcmp.gt.f32.partialorder %v570_v25, 0.0  ;;  %v6689_v30 = vld [vmem:[%s9159_s4 + $0x30] sm:$0xff]  }
  0x14   : > { %6219 = vmatprep.subr.bf16.mxu1 %v6688_v26  ;;  %v650_v31 = vsel %vm609_vm12, 1, %v6848_v3  ;;  %v572_v32 = vld [vmem:[%s9158_s3 + $0x88] sm:$0xff]  ;;  %v6690_v33 = vld [vmem:[%s9159_s4 + $0x78] sm:$0xff]   ;;  %v649_v34 = vsel %vm608_vm13, 1, %v6848_v3  ;;  %vm610_vm15 = vcmp.gt.f32.partialorder %v569_v29, 0.0  ;;  %v6692_v36 = vld [vmem:[%s9159_s4 + $0x70] sm:$0xff]  }
  0x15   : > { %6220 = vmatpush3.bf16.msra.mxu1 %v6688_v26  ;;  %v6691_v35 = vld [vmem:[%s9159_s4 + $0x28] sm:$0xff]   ;;  %6167 = vmatprep.subr.bf16.mxu0 %v6690_v33  ;;  %v571_v37 = vld [vmem:[%s9158_s3 + $0x80] sm:$0xff]  ;;  %v574_v38 = vld [vmem:[%s9158_s3 + $0x98] sm:$0xff]  ;;  %v652_v39 = vsel %vm611_vm14, 1, %v6848_v3  ;;  %v651_v40 = vsel %vm610_vm15, 1, %v6848_v3  ;;  %vm613_vm0 = vcmp.gt.f32.partialorder %v572_v32, 0.0 }
  0x16   : > { %6221 = vmatprep.subr.bf16.mxu1 %v6689_v30  ;;  %6168 = vmatpush3.bf16.msra.mxu0 %v6690_v33  ;;  %v6693_v41 = vld [vmem:[%s9159_s4 + $0x20] sm:$0xff]   ;;  %v6694_v42 = vld [vmem:[%s9159_s4 + $0x68] sm:$0xff]   ;;  %vm612_vm1 = vcmp.gt.f32.partialorder %v571_v37, 0.0  ;;  %vm615_vm2 = vcmp.gt.f32.partialorder %v574_v38, 0.0  ;;  %v573_v43 = vld [vmem:[%s9158_s3 + $0x90] sm:$0xff]  ;;  %v654_v44 = vsel %vm613_vm0, 1, %v6848_v3 }
  0x17   : > { %694 = vperm.xlu1 %6687, %v642_v13   ;;  %691 = vperm.xlu0 %6686, %v641_v14   ;;  %v6695_v45 = vld [vmem:[%s9159_s4 + $0x18] sm:$0xff]   ;;  %v653_v46 = vsel %vm612_vm1, 1, %v6848_v3  ;;  %v6696_v47 = vld [vmem:[%s9159_s4 + $0x60] sm:$0xff]   ;;  %vm614_vm3 = vcmp.gt.f32.partialorder %v573_v43, 0.0  ;;  %v576_v48 = vld [vmem:[%s9158_s3 + $0xa8] sm:$0xff]  ;;  %v656_v50 = vsel %vm615_vm2, 1, %v6848_v3 }
  0x18   : > { %6169 = vmatprep.subr.bf16.mxu0 %v6692_v36  ;;  %v575_v49 = vld [vmem:[%s9158_s3 + $0xa0] sm:$0xff]  ;;  %v578_v51 = vld [vmem:[%s9158_s3 + $0xb8] sm:$0xff]  ;;  %v6697_v52 = vld [vmem:[%s9159_s4 + $0x10] sm:$0xff]   ;;  %v655_v53 = vsel %vm614_vm3, 1, %v6848_v3  ;;  %vm617_vm4 = vcmp.gt.f32.partialorder %v576_v48, 0.0  ;;  %s9234_s24 = smov (!%p311_p4, %s6838_s24), 1 }
  0x19   : > { %6222 = vmatpush3.bf16.msra.mxu1 %v6689_v30  ;;  %v6698_v54 = vld [vmem:[%s9159_s4 + $0x58] sm:$0xff]   ;;  %vm616_vm5 = vcmp.gt.f32.partialorder %v575_v49, 0.0  ;;  %v577_v55 = vld [vmem:[%s9158_s3 + $0xb0] sm:$0xff]  ;;  %vm619_vm6 = vcmp.gt.f32.partialorder %v578_v51, 0.0  ;;  %v580_v56 = vld [vmem:[%s9158_s3 + $0xc8] sm:$0xff]  ;;  %v658_v57 = vsel %vm617_vm4, 1, %v6848_v3 }
  0x1a   : > { %6223 = vmatprep.subr.bf16.mxu1 %v6691_v35  ;;  %6170 = vmatpush3.bf16.msra.mxu0 %v6692_v36  ;;  %v657_v58 = vsel %vm616_vm5, 1, %v6848_v3  ;;  %v6699_v59 = vld [vmem:[%s9159_s4 + $0x8] sm:$0xff]   ;;  %v6700_v60 = vld [vmem:[%s9159_s4 + $0x50] sm:$0xff]   ;;  %vm618_vm7 = vcmp.gt.f32.partialorder %v577_v55, 0.0  ;;  %v579_v61 = vld [vmem:[%s9158_s3 + $0xc0] sm:$0xff]  ;;  %v660_v62 = vsel %vm619_vm6, 1, %v6848_v3 }
  0x1b   : > { %700 = vperm.xlu1 %6687, %v644_v17   ;;  %697 = vperm.xlu0 %6686, %v643_v18   ;;  %vm621_vm8 = vcmp.gt.f32.partialorder %v580_v56, 0.0  ;;  %v582_v63 = vld [vmem:[%s9158_s3 + $0xd8] sm:$0xff]  ;;  %v6701_v0 = vld [vmem:[%s9159_s4] sm:$0xff]   ;;  %v659_v1 = vsel %vm618_vm7, 1, %v6848_v3  ;;  %v6704_v2 = vld [vmem:[%s9159_s4 + $0x48] sm:$0xff]   ;;  %vm620_vm9 = vcmp.gt.f32.partialorder %v579_v61, 0.0 }
  0x1c   : > { %6171 = vmatprep.subr.bf16.mxu0 %v6694_v42  ;;  %vm623_vm10 = vcmp.gt.f32.partialorder %v582_v63, 0.0  ;;  %v581_v4 = vld [vmem:[%s9158_s3 + $0xd0] sm:$0xff]  ;;  %v662_v5 = vsel %vm621_vm8, 1, %v6848_v3  ;;  %v584_v6 = vld [vmem:[%s9158_s3 + $0xe8] sm:$0xff]  ;;  %v661_v7 = vsel %vm620_vm9, 1, %v6848_v3  ;;  %v6707_v8 = vld [vmem:[%s9159_s4 + $0x40] sm:$0xff]  }
  0x1d   : > { %6224 = vmatpush3.bf16.msra.mxu1 %v6691_v35  ;;  %vm622_vm11 = vcmp.gt.f32.partialorder %v581_v4, 0.0  ;;  %v583_v9 = vld [vmem:[%s9158_s3 + $0xe0] sm:$0xff]  ;;  %vm625_vm12 = vcmp.gt.f32.partialorder %v584_v6, 0.0  ;;  %v586_v10 = vld [vmem:[%s9158_s3 + $0xf8] sm:$0xff]  ;;  %v664_v11 = vsel %vm623_vm10, 1, %v6848_v3  ;;  %v585_v13 = vld [vmem:[%s9158_s3 + $0xf0] sm:$0xff] }
  0x1e   : > { %6225 = vmatprep.subr.bf16.mxu1 %v6693_v41  ;;  %6172 = vmatpush3.bf16.msra.mxu0 %v6694_v42  ;;  %v663_v12 = vsel %vm622_vm11, 1, %v6848_v3  ;;  %vm624_vm13 = vcmp.gt.f32.partialorder %v583_v9, 0.0  ;;  %vm627_vm14 = vcmp.gt.f32.partialorder %v586_v10, 0.0  ;;  %v666_v14 = vsel %vm625_vm12, 1, %v6848_v3  ;;  %v588_v15 = vld [vmem:[%s9158_s3 + $0x108] sm:$0xff]  ;;  %v587_v16 = vld [vmem:[%s9158_s3 + $0x100] sm:$0xff] }
  0x1f   : > { %706 = vperm.xlu1 %6687, %v646_v21   ;;  %703 = vperm.xlu0 %6686, %v645_v22   ;;  %v665_v17 = vsel %vm624_vm13, 1, %v6848_v3  ;;  %vm626_vm15 = vcmp.gt.f32.partialorder %v585_v13, 0.0  ;;  %v590_v18 = vld [vmem:[%s9158_s3 + $0x118] sm:$0xff]  ;;  %s6657_s12 = smul.u32 164, %s9234_s24  ;;  %v668_v19 = vsel %vm627_vm14, 1, %v6848_v3  ;;  %v589_v20 = vld [vmem:[%s9158_s3 + $0x110] sm:$0xff] }
  0x20   : > { %6173 = vmatprep.subr.bf16.mxu0 %v6696_v47  ;;  %vm629_vm0 = vcmp.gt.f32.partialorder %v588_v15, 0.0  ;;  %v7113_v21 = vld [vmem:[%s9159_s4 + $0xf8] sm:$0xff]   ;;  %v667_v22 = vsel %vm626_vm15, 1, %v6848_v3  ;;  %vm628_vm1 = vcmp.gt.f32.partialorder %v587_v16, 0.0  ;;  %vm631_vm2 = vcmp.gt.f32.partialorder %v590_v18, 0.0  ;;  %v592_v23 = vld [vmem:[%s9158_s3 + $0x128] sm:$0xff] }
  0x21   : > { %6226 = vmatpush3.bf16.msra.mxu1 %v6693_v41  ;;  %s7122_s21 = scalar_lea.vmem %s9155_s0, %s6657_s12  ;;  %v670_v24 = vsel %vm629_vm0, 1, %v6848_v3  ;;  %v591_v25 = vld [vmem:[%s9158_s3 + $0x120] sm:$0xff]  ;;  %vm630_vm3 = vcmp.gt.f32.partialorder %v589_v20, 0.0  ;;  %vm633_vm4 = vcmp.gt.f32.partialorder %v592_v23, 0.0  ;;  %v7148_v35 = vld [vmem:[%s9159_s4 + $0xb8] sm:$0xff]   ;;  %v593_v42 = vld [vmem:[%s9158_s3 + $0x130] sm:$0xff] }
  0x22   : > { %6227 = vmatprep.subr.bf16.mxu1 %v6695_v45  ;;  %6174 = vmatpush3.bf16.msra.mxu0 %v6696_v47  ;;  %v5831_v26 = vld [vmem:[%s7122_s21 + $0x88] sm:$0xff]   ;;  %v7134_v30 = vld [vmem:[%s9156_s1] ss:$0 sm:$0xff]  ;;  %v5832_v36 = vld [vmem:[%s7122_s21 + $0x90] sm:$0xff]   ;;  %vm632_vm5 = vcmp.gt.f32.partialorder %v591_v25, 0.0  ;;  %v671_v41 = vsel %vm630_vm3, 1, %v6848_v3 }
  0x23   : > { %712 = vperm.xlu1 %6687, %v648_v27   ;;  %709 = vperm.xlu0 %6686, %v647_v28   ;;  %v669_v27 = vsel %vm628_vm1, 1, %v6848_v3  ;;  %v5706_v28 = vunpack.c.h.bf16 %v5831_v26  ;;  %v5705_v29 = vunpack.c.l.bf16 %v5831_v26  ;;  %v594_v37 = vld [vmem:[%s9158_s3 + $0x138] sm:$0xff]  ;;  %v5709_v43 = vunpack.c.l.bf16 %v5832_v36  ;;  %v595_v49 = vld [vmem:[%s9158_s3 + $0x140] sm:$0xff]  ;;  %s6658_s18 = smul.u32 288, %s9234_s24  ;;  %s5284_s23 = sshll.u32 %s9234_s24, 1 }
  0x24   : > { %6175 = vmatprep.subr.bf16.mxu0 %v6698_v54  ;;  %vm635_vm6 = vcmp.gt.f32.partialorder %v594_v37, 0.0  ;;  %v5833_v48 = vld [vmem:[%s7122_s21 + $0x98] sm:$0xff]   ;;  %vm634_vm7 = vcmp.gt.f32.partialorder %v593_v42, 0.0  ;;  %vm636_vm8 = vcmp.gt.f32.partialorder %v595_v49, 0.0  ;;  %vm1252_vm1 = vsmask.f32 7424 }
  0x25   : > { %6228 = vmatpush3.bf16.msra.mxu1 %v6695_v45  ;;  %v460_v32 = vmul.f32 %v5706_v28, %v7134_v30  ;;  %v459_v33 = vmul.f32 %v5705_v29, %v7134_v30  ;;  %v674_v45 = vsel %vm633_vm4, 1, %v6848_v3  ;;  %v461_v47 = vmul.f32 %v5709_v43, %v7134_v30  ;;  %v5817_v6 = vld [vmem:[%s7122_s21 + $0x18] sm:$0xff]   ;;  %s8805_s22 = scalar_lea.vmem %s9161_s6, %s6658_s18 }
  0x26   : > { %6229 = vmatprep.subr.bf16.mxu1 %v6697_v52  ;;  %6176 = vmatpush3.bf16.msra.mxu0 %v6698_v54  ;;  %v5714_v51 = vunpack.c.h.bf16 %v5833_v48  ;;  %v676_v56 = vsel %vm635_vm6, 1, %v6848_v3  ;;  %v677_v63 = vsel %vm636_vm8, 1, %v6848_v3  ;;  %v5649_v15 = vunpack.c.l.bf16 %v5817_v6 }
  0x27   : > { %718 = vperm.xlu1 %6687, %v650_v31   ;;  %715 = vperm.xlu0 %6686, %v649_v34   ;;  %v7139_v31 = vld [vmem:[%s9157_s2] ss:$0 sm:$0xff]  ;;  %v672_v34 = vsel %vm631_vm2, 1, %v6848_v3  ;;  %vm1908_vm6 = vcmask 1046528  }
  0x28   : > { %6177 = vmatprep.subr.bf16.mxu0 %v6700_v60  ;;  %v7155_v38 = vadd.f32 %v7139_v31, %v460_v32  ;;  %v464_v54 = vmul.f32 %v5714_v51, %v7134_v30  ;;  %v431_v28 = vmul.f32 %v5649_v15, %v7134_v30  ;;  %v5820_v32 = vld [vmem:[%s7122_s21 + $0x30] sm:$0xff]  }
  0x29   : > { %6230 = vmatpush3.bf16.msra.mxu1 %v6697_v52  ;;  %v5713_v52 = vunpack.c.l.bf16 %v5833_v48  ;;  %v5824_v15 = vld [vmem:[%s7122_s21 + $0x50] sm:$0xff]  }
  0x2a   : > { %6231 = vmatprep.subr.bf16.mxu1 %v6699_v59  ;;  %6178 = vmatpush3.bf16.msra.mxu0 %v6700_v60  ;;  %v7230_v48 = vadd.f32 %v7139_v31, %v431_v28 }
  0x2b   : > { %724 = vperm.xlu1 %6687, %v652_v39   ;;  %721 = vperm.xlu0 %6686, %v651_v40   ;;  %v7158_v39 = vadd.f32 %v7139_v31, %v459_v33  ;;  %v5710_v40 = vunpack.c.h.bf16 %v5832_v36  ;;  %v463_v55 = vmul.f32 %v5713_v52, %v7134_v30 }
  0x2c   : > { %6179 = vmatprep.subr.bf16.mxu0 %v6704_v2 }
  0x2d   : > { %6232 = vmatpush3.bf16.msra.mxu1 %v6699_v59  ;;  %v7186_v59 = vadd.f32 %v7139_v31, %v464_v54  ;;  %v7189_v60 = vadd.f32 %v7139_v31, %v463_v55  ;;  %v5661_v55 = vunpack.c.l.bf16 %v5820_v32 }
  0x2e   : > { %6233 = vmatprep.subr.bf16.mxu1 %v6701_v0  ;;  %6180 = vmatpush3.bf16.msra.mxu0 %v6704_v2  ;;  %v5636_v2 = vld [vmem:[%s7122_s21] sm:$0xff]  }
  0x2f   : > { %730 = vperm.xlu1 %6687, %v654_v44   ;;  %727 = vperm.xlu0 %6686, %v653_v46   ;;  %v462_v44 = vmul.f32 %v5710_v40, %v7134_v30  ;;  %v673_v46 = vsel %vm632_vm5, 1, %v6848_v3  ;;  %v5638_v10 = vunpack.c.h.bf16 %v5636_v2 }
  0x30   : > { %6181 = vmatprep.subr.bf16.mxu0 %v6707_v8 }
  0x31   : > { %6234 = vmatpush3.bf16.msra.mxu1 %v6701_v0  ;;  %v426_v23 = vmul.f32 %v5638_v10, %v7134_v30 }
  0x32   : > { %6182 = vmatpush3.bf16.msra.mxu0 %v6707_v8  ;;  %6323 = vmatprep.subr.bf16.mxu1 %v7113_v21  ;;  %v5637_v8 = vunpack.c.l.bf16 %v5636_v2 }
  0x33   : > { %736 = vperm.xlu1 %6687, %v656_v50   ;;  %733 = vperm.xlu0 %6686, %v655_v53   ;;  %v7175_v50 = vadd.f32 %v7139_v31, %v462_v44  ;;  %v7178_v53 = vadd.f32 %v7139_v31, %v461_v47  ;;  %v5662_v44 = vunpack.c.h.bf16 %v5820_v32 }
  0x34   : > { %6271 = vmatprep.subr.bf16.mxu0 %v7148_v35  ;;  %v425_v20 = vmul.f32 %v5637_v8, %v7134_v30  ;;  %v520_v8 = vmax.f32 %v7230_v48, 0.0 }
  0x36   : > { %v473_v37 = vadd.f32 %v7139_v31, %v425_v20 }
  0x37   : > { %742 = vperm.xlu1 %6687, %v658_v57   ;;  %739 = vperm.xlu0 %6686, %v657_v58   ;;  %v675_v57 = vsel %vm634_vm7, 1, %v6848_v3  ;;  %v376_v58 = vld [vmem:[%s7122_s21 + $0xa0] sm:$0xf]  ;;  %v5650_v3 = vunpack.c.h.bf16 %v5817_v6 }
  0x38   : > { %v417_v61 = vunpack.c.l.bf16 %v376_v58 }
  0x3b   : > { %748 = vperm.xlu1 %6687, %v660_v62   ;;  %745 = vperm.xlu0 %6686, %v659_v1   ;;  %v465_v62 = vmul.f32 %v7134_v30, %v417_v61  ;;  %v5815_v1 = vld [vmem:[%s7122_s21 + $0x8] sm:$0xff]  }
  0x3c   : > { %v5641_v4 = vunpack.c.l.bf16 %v5815_v1  ;;  %v5642_v9 = vunpack.c.h.bf16 %v5815_v1 }
  0x3d   : > { %v7194_v0 = vadd.f32 %v7139_v31, %v465_v62 }
  0x3f   : > { %754 = vperm.xlu1 %6687, %v662_v5   ;;  %751 = vperm.xlu0 %6686, %v661_v7   ;;  %v5816_v5 = vld [vmem:[%s7122_s21 + $0x10] sm:$0xff]   ;;  %v5818_v7 = vld [vmem:[%s7122_s21 + $0x20] sm:$0xff]  }
  0x40   : > { %v5645_v13 = vunpack.c.l.bf16 %v5816_v5  ;;  %v5654_v16 = vunpack.c.h.bf16 %v5818_v7 }
  0x42   : > { %v429_v25 = vmul.f32 %v5645_v13, %v7134_v30  ;;  %v434_v29 = vmul.f32 %v5654_v16, %v7134_v30 }
  0x43   : > { %760 = vperm.xlu1 %6687, %v664_v11   ;;  %757 = vperm.xlu0 %6686, %v663_v12   ;;  %v5819_v11 = vld [vmem:[%s7122_s21 + $0x28] sm:$0xff]   ;;  %v5646_v12 = vunpack.c.h.bf16 %v5816_v5  ;;  %v438_v5 = vmul.f32 %v5662_v44, %v7134_v30 }
  0x44   : > { %v5658_v18 = vunpack.c.h.bf16 %v5819_v11  ;;  %v7223_v43 = vadd.f32 %v7139_v31, %v429_v25  ;;  %v7233_v49 = vadd.f32 %v7139_v31, %v434_v29 }
  0x45   : > { %v7259_v20 = vadd.f32 %v7139_v31, %v438_v5 }
  0x47   : > { %766 = vperm.xlu1 %6687, %v666_v14   ;;  %763 = vperm.xlu0 %6686, %v665_v17   ;;  %v427_v14 = vmul.f32 %v5641_v4, %v7134_v30  ;;  %v5653_v17 = vunpack.c.l.bf16 %v5818_v7  ;;  %v518_v4 = vmax.f32 %v7223_v43, 0.0 }
  0x49   : > { %v475_v26 = vadd.f32 %v7139_v31, %v427_v14  ;;  %v433_v33 = vmul.f32 %v5653_v17, %v7134_v30 }
  0x4b   : > { %772 = vperm.xlu1 %6687, %v668_v19   ;;  %769 = vperm.xlu0 %6686, %v667_v22   ;;  %v5657_v19 = vunpack.c.l.bf16 %v5819_v11  ;;  %v428_v22 = vmul.f32 %v5642_v9, %v7134_v30  ;;  %v7236_v51 = vadd.f32 %v7139_v31, %v433_v33  ;;  %v523_v9 = vmax.f32 %v7233_v49, 0.0  ;;  %v5823_v11 = vld [vmem:[%s7122_s21 + $0x48] sm:$0xff]   ;;  %v5825_v33 = vld [vmem:[%s7122_s21 + $0x58] sm:$0xff]  }
  0x4d   : > { %v435_v36 = vmul.f32 %v5657_v19, %v7134_v30  ;;  %v476_v40 = vadd.f32 %v7139_v31, %v428_v22 }
  0x4f   : > { %778 = vperm.xlu1 %6687, %v670_v24   ;;  %775 = vperm.xlu0 %6686, %v669_v27   ;;  %v430_v24 = vmul.f32 %v5646_v12, %v7134_v30  ;;  %v432_v27 = vmul.f32 %v5650_v3, %v7134_v30  ;;  %v7242_v54 = vadd.f32 %v7139_v31, %v435_v36  ;;  %v517_v58 = vmax.f32 %v476_v40, 0.0 }
  0x50   : > { %v522_v12 = vmax.f32 %v7236_v51, 0.0  ;;  %v437_v3 = vmul.f32 %v5661_v55, %v7134_v30  ;;  %v5677_v40 = vunpack.c.l.bf16 %v5824_v15  ;;  %v527_v55 = vmax.f32 %v7259_v20, 0.0 }
  0x51   : > { %v7220_v42 = vadd.f32 %v7139_v31, %v430_v24  ;;  %v7227_v47 = vadd.f32 %v7139_v31, %v432_v27  ;;  %v524_v14 = vmax.f32 %v7242_v54, 0.0  ;;  %v5673_v24 = vunpack.c.l.bf16 %v5823_v11 }
  0x52   : > { %v7266_v43 = vadd.f32 %v7139_v31, %v437_v3 }
  0x53   : > { %784 = vperm.xlu1 %6687, %v672_v34   ;;  %781 = vperm.xlu0 %6686, %v671_v41   ;;  %v436_v34 = vmul.f32 %v5658_v18, %v7134_v30  ;;  %v474_v41 = vadd.f32 %v7139_v31, %v426_v23  ;;  %v519_v2 = vmax.f32 %v7220_v42, 0.0  ;;  %v521_v7 = vmax.f32 %v7227_v47, 0.0 }
  0x54   : > { %v5674_v23 = vunpack.c.h.bf16 %v5823_v11 }
  0x55   : > { %v7239_v52 = vadd.f32 %v7139_v31, %v436_v34  ;;  %v515_v61 = vmax.f32 %v474_v41, 0.0 }
  0x57   : > { %790 = vperm.xlu1 %6687, %v674_v45   ;;  %787 = vperm.xlu0 %6686, %v673_v46   ;;  %v5821_v45 = vld [vmem:[%s7122_s21 + $0x38] sm:$0xff]   ;;  %v516_v46 = vmax.f32 %v475_v26, 0.0  ;;  %v525_v13 = vmax.f32 %v7239_v52, 0.0  ;;  %v5678_v26 = vunpack.c.h.bf16 %v5824_v15  ;;  %v5681_v15 = vunpack.c.l.bf16 %v5825_v33 }
  0x58   : > { %v5666_v62 = vunpack.c.h.bf16 %v5821_v45  ;;  %v5665_v6 = vunpack.c.l.bf16 %v5821_v45  ;;  %v444_v45 = vmul.f32 %v5674_v23, %v7134_v30 }
  0x5a   : > { %v440_v16 = vmul.f32 %v5666_v62, %v7134_v30  ;;  %v439_v22 = vmul.f32 %v5665_v6, %v7134_v30  ;;  %v446_v62 = vmul.f32 %v5678_v26, %v7134_v30  ;;  %v445_v6 = vmul.f32 %v5677_v40, %v7134_v30 }
  0x5b   : > { %796 = vperm.xlu1 %6687, %v676_v56   ;;  %793 = vperm.xlu0 %6686, %v675_v57   ;;  %v5822_v56 = vld [vmem:[%s7122_s21 + $0x40] sm:$0xff]   ;;  %v514_v57 = vmax.f32 %v473_v37, 0.0 }
  0x5c   : > { %v5670_v10 = vunpack.c.h.bf16 %v5822_v56  ;;  %v5669_v17 = vunpack.c.l.bf16 %v5822_v56  ;;  %v7269_v44 = vadd.f32 %v7139_v31, %v440_v16  ;;  %v5682_v56 = vunpack.c.h.bf16 %v5825_v33 }
  0x5e   : > { %v442_v25 = vmul.f32 %v5670_v10, %v7134_v30  ;;  %v441_v37 = vmul.f32 %v5669_v17, %v7134_v30  ;;  %v529_v16 = vmax.f32 %v7269_v44, 0.0  ;;  %v448_v17 = vmul.f32 %v5682_v56, %v7134_v30  ;;  %v7414_v44 = vld [vmem:[%s7122_s21 + $0x78] sm:$0xff]  }
  0x5f   : > { %799 = vperm.xlu0 %6686, %v677_v63  }
  0x60   : > { %v7282_v5 = vadd.f32 %v7139_v31, %v441_v37  ;;  %v7321_v40 = vadd.f32 %v7139_v31, %v448_v17 }
  0x8a   : > { %v686_v63 = vpop.permute.xlu1 %685  ;;  %v680_v1 = vpop.permute.xlu0 %679 }
  0x8b   : > { %vm803_vm9 = vcmp.eq.s32.totalorder %v686_v63, 1  ;;  %vm801_vm10 = vcmp.eq.s32.totalorder %v680_v1, 1  ;;  %v7279_v1 = vadd.f32 %v7139_v31, %v442_v25 }
  0x8c   : > { %v844_v27 = vsel %vm803_vm9, %v516_v46, 0.0  ;;  %v842_v28 = vsel %vm801_vm10, %v514_v57, 0.0  ;;  %v443_v46 = vmul.f32 %v5673_v24, %v7134_v30  ;;  %v7303_v24 = vadd.f32 %v7139_v31, %v446_v62 }
  0x8d   : > { %v531_v26 = vmax.f32 %v7279_v1, 0.0  ;;  %v5698_v1 = vunpack.c.h.bf16 %v7414_v44 }
  0x8e   : > { %v689_v18 = vpop.permute.xlu1 %688  ;;  %v683_v19 = vpop.permute.xlu0 %682  ;;  %v7290_v3 = vadd.f32 %v7139_v31, %v443_v46  ;;  %v535_v46 = vmax.f32 %v7303_v24, 0.0 }
  0x8f   : > { %vm804_vm11 = vcmp.eq.s32.totalorder %v689_v18, 1  ;;  %vm802_vm12 = vcmp.eq.s32.totalorder %v683_v19, 1  ;;  %v7295_v18 = vld [vmem:[%s7122_s21 + $0x60] sm:$0xff]  }
  0x90   : > { %v845_v29 = vsel %vm804_vm11, %v517_v58, 0.0  ;;  %v843_v32 = vsel %vm802_vm12, %v515_v61, 0.0  ;;  %v7275_v61 = vadd.f32 %v7139_v31, %v439_v22  ;;  %v532_v33 = vmax.f32 %v7290_v3, 0.0 }
  0x91   : > { %v5723_v34 = vpack.c.bf16 %v845_v29, %v844_v27  ;;  %v5718_v36 = vpack.c.bf16 %v843_v32, %v842_v28  ;;  %v530_v27 = vmax.f32 %v7282_v5, 0.0  ;;  %v7308_v28 = vadd.f32 %v7139_v31, %v445_v6  ;;  %v7311_v29 = vld [vmem:[%s7122_s21 + $0x68] sm:$0xff]   ;;  %v7447_v5 = vld [vmem:[%s9159_s4 + $0x98] sm:$0xff]  }
  0x92   : > { %v695_v41 = vpop.permute.xlu1 %694  ;;  %v692_v42 = vpop.permute.xlu0 %691  ;;  %v528_v23 = vmax.f32 %v7275_v61, 0.0  ;;  %v5685_v56 = vunpack.c.l.bf16 %v7295_v18  ;;  %v5689_v17 = vunpack.c.l.bf16 %v7311_v29 }
  0x93   : > { %5834 = vst [vmem:[#allocation2 + $0x8] sm:$0xff] %v5723_v34   ;;  %5719 = vst [vmem:[#allocation2] sm:$0xff] %v5718_v36   ;;  %vm806_vm13 = vcmp.eq.s32.totalorder %v695_v41, 1  ;;  %vm805_vm14 = vcmp.eq.s32.totalorder %v692_v42, 1  ;;  %v447_v34 = vmul.f32 %v5681_v15, %v7134_v30  ;;  %v5686_v36 = vunpack.c.h.bf16 %v7295_v18  ;;  %v6722_v18 = vld [vmem:[%s9159_s4 + $0xe8] sm:$0xff]  }
  0x94   : > { %v847_v57 = vsel %vm806_vm13, %v519_v2, 0.0  ;;  %v846_v58 = vsel %vm805_vm14, %v518_v4, 0.0  ;;  %v526_v2 = vmax.f32 %v7266_v43, 0.0  ;;  %v7287_v4 = vadd.f32 %v7139_v31, %v444_v45  ;;  %v7387_v43 = vld [vmem:[%s9159_s4 + $0xa8] sm:$0xff]  }
  0x95   : > { %v5728_v63 = vpack.c.bf16 %v847_v57, %v846_v58  ;;  %v6719_v57 = vld [vmem:[%s9159_s4 + $0xf0] sm:$0xff]   ;;  %v5690_v15 = vunpack.c.h.bf16 %v7311_v29 }
  0x96   : > { %v701_v10 = vpop.permute.xlu1 %700  ;;  %v698_v11 = vpop.permute.xlu0 %697  ;;  %v533_v32 = vmax.f32 %v7287_v4, 0.0 }
  0x97   : > { %5835 = vst [vmem:[#allocation2 + $0x10] sm:$0xff] %v5728_v63   ;;  %vm808_vm15 = vcmp.eq.s32.totalorder %v701_v10, 1  ;;  %vm807_vm0 = vcmp.eq.s32.totalorder %v698_v11, 1  ;;  %v7342_v11 = vadd.f32 %v7139_v31, %v447_v34 }
  0x98   : > { %v849_v19 = vsel %vm808_vm15, %v521_v7, 0.0  ;;  %v848_v22 = vsel %vm807_vm0, %v520_v8, 0.0 }
  0x99   : > { %v5733_v25 = vpack.c.bf16 %v849_v19, %v848_v22  ;;  %v536_v20 = vmax.f32 %v7342_v11, 0.0 }
  0x9a   : > { %v707_v47 = vpop.permute.xlu1 %706  ;;  %v704_v7 = vpop.permute.xlu0 %703  ;;  %v1089_v48 = vld [vmem:[#allocation2] sm:$0xf]  ;;  %v7313_v8 = vld [vmem:[#allocation2 + $0x4] sm:$0xf]  ;;  %v7327_v45 = vld [vmem:[#allocation2 + $0x8] sm:$0xff]  }
  0x9b   : > { %5836 = vst [vmem:[#allocation2 + $0x18] sm:$0xff] %v5733_v25   ;;  %vm810_vm2 = vcmp.eq.s32.totalorder %v707_v47, 1  ;;  %vm809_vm3 = vcmp.eq.s32.totalorder %v704_v7, 1  ;;  %v5344_v37 = vcombine.low %v1089_v48, %v7313_v8  ;;  %v7334_v62 = vld [vmem:[#allocation2] sm:$0xe]  ;;  %v1261_v10 = vshll.u32 %v7327_v45, 16 }
  0x9c   : > { %v851_v41 = vsel %vm810_vm2, %v523_v9, 0.0  ;;  %v850_v42 = vsel %vm809_vm3, %v522_v12, 0.0  ;;  %v534_v9 = vmax.f32 %v7308_v28, 0.0  ;;  %v1265_v22 = vshrl.u32 %v7327_v45, 16 }
  0x9d   : > { %v5738_v58 = vpack.c.bf16 %v851_v41, %v850_v42  ;;  %6235 = vmatprep.mubr.bf16.mxu1 %v5344_v37  ;;  %v1254_v63 = vshrl.u32 %v5344_v37, 16  ;;  %v1256_v49 = vshll.u32 %v5344_v37, 16  ;;  %v1263_v29 = vrot.slane %v1261_v10, 1 }
  0x9e   : > { %v713_v51 = vpop.permute.xlu1 %712  ;;  %v710_v12 = vpop.permute.xlu0 %709  ;;  %6236 = vmatmul.mubr.bf16.vlgmr.msra.gmra.mxu1 %v7327_v45  ;;  %v7338_v6 = vld [vmem:[#allocation2 + $0x10] sm:$0xff]   ;;  %v537_v37 = vmax.f32 %v7321_v40, 0.0  ;;  %v5395_v52 = vcombine.low %v7334_v62, %v7313_v8 }
  0x9f   : > { %5837 = vst [vmem:[#allocation2 + $0x20] sm:$0xff] %v5738_v58   ;;  %vm812_vm4 = vcmp.eq.s32.totalorder %v713_v51, 1  ;;  %vm811_vm5 = vcmp.eq.s32.totalorder %v710_v12, 1  ;;  %v1258_v19 = vrot.slane %v1256_v49, 1  ;;  %6324 = vmatpush3.bf16.msra.mxu1 %v7113_v21  ;;  %6239 = vmatprep.mubr.bf16.mxu1 %v7338_v6  ;;  %v1269_v7 = vshll.u32 %v7338_v6, 16  ;;  %v7367_v51 = vld [vmem:[%s7122_s21 + $0x70] sm:$0xff]  }
  0xa0   : > { %v853_v25 = vsel %vm812_vm4, %v525_v13, 0.0  ;;  %v852_v47 = vsel %vm811_vm5, %v524_v14, 0.0  ;;  %6325 = vmatprep.subr.bf16.mxu1 %v6719_v57  ;;  %v450_v21 = vmul.f32 %v5686_v36, %v7134_v30  ;;  %v1267_v54 = vor.u32 %v1265_v22, %v1263_v29  ;;  %v6724_v8 = vld [vmem:[%s9159_s4 + $0xb0] sm:$0xff]  }
  0xa1   : > { %v5743_v48 = vpack.c.bf16 %v853_v25, %v852_v47  ;;  %v1259_v34 = vor.u32 %v1258_v19, %v1254_v63  ;;  %v1271_v14 = vrot.slane %v1269_v7, 1  ;;  %v449_v58 = vmul.f32 %v5685_v56, %v7134_v30 }
  0xa2   : > { %v719_v13 = vpop.permute.xlu1 %718  ;;  %v716_v41 = vpop.permute.xlu0 %715  ;;  %v7361_v42 = vld [vmem:[#allocation2 + $0x18] sm:$0xff]   ;;  %v452_v49 = vmul.f32 %v5690_v15, %v7134_v30  ;;  %v1273_v12 = vshrl.u32 %v7338_v6, 16  ;;  %v7393_v47 = vadd.f32 %v7139_v31, %v450_v21  ;;  %v1909_v7 = vrot.slane %v5395_v52, 1 }
  0xa3   : > { %5838 = vst [vmem:[#allocation2 + $0x28] sm:$0xff] %v5743_v48   ;;  %vm814_vm7 = vcmp.eq.s32.totalorder %v719_v13, 1  ;;  %vm813_vm8 = vcmp.eq.s32.totalorder %v716_v41, 1  ;;  %v1264_v63 = vsel %vm1252_vm1, %v1259_v34, %v1263_v29  ;;  %6326 = vmatpush3.bf16.msra.mxu1 %v6719_v57  ;;  %v1272_v62 = vsel %vm1252_vm1, %v1267_v54, %v1271_v14  ;;  %v6725_v57 = vld [vmem:[%s9159_s4 + $0xe0] sm:$0xff]  }
  0xa4   : > { %v855_v36 = vsel %vm814_vm7, %v527_v55, 0.0  ;;  %v854_v56 = vsel %vm813_vm8, %v526_v2, 0.0  ;;  %6183 = vmatprep.mubr.bf16.mxu0 %v1264_v63  ;;  %6327 = vmatprep.subr.bf16.mxu1 %v6722_v18  ;;  %v1277_v15 = vshll.u32 %v7361_v42, 16  ;;  %v451_v55 = vmul.f32 %v5689_v17, %v7134_v30  ;;  %v6728_v17 = vld [vmem:[%s9159_s4 + $0xd8] sm:$0xff]  }
  0xa5   : > { %v5748_v10 = vpack.c.bf16 %v855_v36, %v854_v56  ;;  %6184 = vmatmul.mubr.bf16.vlgmr.msra.gmra.mxu0 %v1272_v62  ;;  %v1275_v25 = vor.u32 %v1273_v12, %v1271_v14  ;;  %v5694_v29 = vunpack.c.h.bf16 %v7367_v51  ;;  %v1910_v34 = vrot.slane %v7327_v45, 1 }
  0xa6   : > { %v725_v2 = vpop.permute.xlu1 %724  ;;  %v722_v19 = vpop.permute.xlu0 %721  ;;  %6240 = vmatmul.mubr.bf16.gmra.mxu1 %v7361_v42  ;;  %v7390_v22 = vld [vmem:[#allocation2 + $0x20] sm:$0xff]   ;;  %6272 = vmatpush3.bf16.msra.mxu0 %v7148_v35  ;;  %v1279_v48 = vrot.slane %v1277_v15, 1  ;;  %v1281_v13 = vshrl.u32 %v7361_v42, 16  ;;  %v5693_v45 = vunpack.c.l.bf16 %v7367_v51  ;;  %v7419_v36 = vadd.f32 %v7139_v31, %v452_v49 }
  0xa7   : > { %5839 = vst [vmem:[#allocation2 + $0x30] sm:$0xff] %v5748_v10   ;;  %vm816_vm9 = vcmp.eq.s32.totalorder %v725_v2, 1  ;;  %vm815_vm10 = vcmp.eq.s32.totalorder %v722_v19, 1  ;;  %6328 = vmatpush3.bf16.msra.mxu1 %v6722_v18  ;;  %6273 = vmatprep.subr.bf16.mxu0 %v6724_v8  ;;  %v1285_v52 = vshll.u32 %v7390_v22, 16  ;;  %v7410_v18 = vadd.f32 %v7139_v31, %v449_v58  ;;  %v6730_v51 = vld [vmem:[%s9159_s4 + $0xa0] sm:$0xff]  }
  0xa8   : > { %v857_v21 = vsel %vm816_vm9, %v529_v16, 0.0  ;;  %v856_v35 = vsel %vm815_vm10, %v528_v23, 0.0  ;;  %6243 = vmatprep.mubr.bf16.mxu1 %v7390_v22  ;;  %6329 = vmatprep.subr.bf16.mxu1 %v6725_v57  ;;  %v1280_v54 = vsel %vm1252_vm1, %v1275_v25, %v1279_v48  ;;  %v1283_v23 = vor.u32 %v1281_v13, %v1279_v48 }
  0xa9   : > { %v5753_v41 = vpack.c.bf16 %v857_v21, %v856_v35  ;;  %6187 = vmatprep.mubr.bf16.mxu0 %v1280_v54  ;;  %v1287_v14 = vrot.slane %v1285_v52, 1  ;;  %v7422_v56 = vsel %vm1908_vm6, %v1909_v7, %v1910_v34  ;;  %v7425_v58 = vadd.f32 %v7139_v31, %v451_v55 }
  0xaa   : > { %v731_v16 = vpop.permute.xlu1 %730  ;;  %v728_v61 = vpop.permute.xlu0 %727  ;;  %v7416_v63 = vld [vmem:[#allocation2 + $0x28] sm:$0xff]   ;;  %6274 = vmatpush3.bf16.msra.mxu0 %v6724_v8  ;;  %v1912_v49 = vrot.slane %v7338_v6, 1  ;;  %v1289_v10 = vshrl.u32 %v7390_v22, 16  ;;  %v454_v6 = vmul.f32 %v5694_v29, %v7134_v30  ;;  %v539_v25 = vmax.f32 %v7393_v47, 0.0  ;;  %v6823_v47 = vld [vmem:[%s9156_s1] ss:$0 sm:$0xff] }
  0xab   : > { %5840 = vst [vmem:[#allocation2 + $0x38] sm:$0xff] %v5753_v41   ;;  %vm818_vm11 = vcmp.eq.s32.totalorder %v731_v16, 1  ;;  %vm817_vm12 = vcmp.eq.s32.totalorder %v728_v61, 1  ;;  %6330 = vmatpush3.bf16.msra.mxu1 %v6725_v57  ;;  %6275 = vmatprep.subr.bf16.mxu0 %v7387_v43  ;;  %v1288_v12 = vsel %vm1252_vm1, %v1283_v23, %v1287_v14  ;;  %v6731_v57 = vld [vmem:[%s9159_s4 + $0xd0] sm:$0xff]   ;;  %v1293_v55 = vshll.u32 %v7416_v63, 16  ;;  %v6734_v29 = vld [vmem:[%s9159_s4 + $0xc8] sm:$0xff]  }
  0xac   : > { %v859_v8 = vsel %vm818_vm11, %v531_v26, 0.0  ;;  %v858_v62 = vsel %vm817_vm12, %v530_v27, 0.0  ;;  %6331 = vmatprep.subr.bf16.mxu1 %v6728_v17  ;;  %v1291_v19 = vor.u32 %v1289_v10, %v1287_v14  ;;  %v453_v7 = vmul.f32 %v5693_v45, %v7134_v30  ;;  %v6737_v14 = vld [vmem:[%s9159_s4 + $0x90] sm:$0xff]   ;;  %v6738_v10 = vld [vmem:[%s9159_s4 + $0xc0] sm:$0xff]  }
  0xad   : > { %v5758_v15 = vpack.c.bf16 %v859_v8, %v858_v62  ;;  %6188 = vmatmul.mubr.bf16.gmra.mxu0 %v1288_v12  ;;  %v7459_v48 = vsel %vm1908_vm6, %v1910_v34, %v1912_v49  ;;  %v1295_v21 = vrot.slane %v1293_v55, 1  ;;  %v1914_v35 = vrot.slane %v7361_v42, 1  ;;  %v7491_v12 = vld [vmem:[%s7122_s21 + $0x80] sm:$0xff]   ;;  %s334_s21 = scalar_lea.vmem %s9162_s7, %s5284_s23 }
  0xae   : > { %v737_v26 = vpop.permute.xlu1 %736  ;;  %v734_v27 = vpop.permute.xlu0 %733  ;;  %6244 = vmatmul.mubr.bf16.gmra.mxu1 %v7416_v63  ;;  %v7450_v2 = vld [vmem:[#allocation2 + $0x30] sm:$0xff]   ;;  %6276 = vmatpush3.bf16.msra.mxu0 %v7387_v43  ;;  %v1297_v52 = vshrl.u32 %v7416_v63, 16  ;;  %v541_v42 = vmax.f32 %v7419_v36, 0.0  ;;  %v5697_v16 = vunpack.c.l.bf16 %v7414_v44  ;;  %v456_v23 = vmul.f32 %v5698_v1, %v7134_v30 }
  0xaf   : > { %5841 = vst [vmem:[#allocation2 + $0x40] sm:$0xff] %v5758_v15   ;;  %vm820_vm13 = vcmp.eq.s32.totalorder %v737_v26, 1  ;;  %vm819_vm14 = vcmp.eq.s32.totalorder %v734_v27, 1  ;;  %6332 = vmatpush3.bf16.msra.mxu1 %v6728_v17  ;;  %6277 = vmatprep.subr.bf16.mxu0 %v6730_v51  ;;  %v1301_v34 = vshll.u32 %v7450_v2, 16  ;;  %v1296_v54 = vsel %vm1252_vm1, %v1291_v19, %v1295_v21  ;;  %v7520_v27 = vld [vmem:[%s9159_s4 + $0x178] sm:$0xff]  }
  0xb0   : > { %v861_v13 = vsel %vm820_vm13, %v533_v32, 0.0  ;;  %v860_v43 = vsel %vm819_vm14, %v532_v33, 0.0  ;;  %6247 = vmatprep.mubr.bf16.mxu1 %v7450_v2  ;;  %6333 = vmatprep.subr.bf16.mxu1 %v6731_v57  ;;  %v538_v17 = vmax.f32 %v7410_v18, 0.0  ;;  %v1299_v32 = vor.u32 %v1297_v52, %v1295_v21  ;;  %v7565_v18 = vld [vmem:[%s9159_s4 + $0x138] sm:$0xff]  }
  0xb1   : > { %v5763_v41 = vpack.c.bf16 %v861_v13, %v860_v43  ;;  %6191 = vmatprep.mubr.bf16.mxu0 %v1296_v54  ;;  %v1303_v3 = vrot.slane %v1301_v34, 1  ;;  %v7476_v61 = vsel %vm1908_vm6, %v1912_v49, %v1914_v35  ;;  %v1916_v8 = vrot.slane %v7390_v22, 1  ;;  %v6822_v54 = vld [vmem:[%s9157_s2] ss:$0 sm:$0xff] }
  0xb2   : > { %v743_v45 = vpop.permute.xlu1 %742  ;;  %v740_v4 = vpop.permute.xlu0 %739  ;;  %v7472_v33 = vld [vmem:[#allocation2 + $0x38] sm:$0xff]   ;;  %6278 = vmatpush3.bf16.msra.mxu0 %v6730_v51  ;;  %v1305_v62 = vshrl.u32 %v7450_v2, 16  ;;  %v7498_v24 = vadd.f32 %v7139_v31, %v454_v6  ;;  %v7501_v28 = vadd.f32 %v7139_v31, %v453_v7  ;;  %v540_v26 = vmax.f32 %v7425_v58, 0.0 }
  0xb3   : > { %5842 = vst [vmem:[#allocation2 + $0x48] sm:$0xff] %v5763_v41   ;;  %vm822_vm15 = vcmp.eq.s32.totalorder %v743_v45, 1  ;;  %vm821_vm0 = vcmp.eq.s32.totalorder %v740_v4, 1  ;;  %6334 = vmatpush3.bf16.msra.mxu1 %v6731_v57  ;;  %6279 = vmatprep.subr.bf16.mxu0 %v7447_v5  ;;  %v1304_v49 = vsel %vm1252_vm1, %v1299_v32, %v1303_v3  ;;  %v1309_v22 = vshll.u32 %v7472_v33, 16  ;;  %v6743_v4 = vld [vmem:[%s9159_s4 + $0x80] sm:$0xff]  }
  0xb4   : > { %v863_v44 = vsel %vm822_vm15, %v535_v46, 0.0  ;;  %v862_v51 = vsel %vm821_vm0, %v534_v9, 0.0  ;;  %6335 = vmatprep.subr.bf16.mxu1 %v6734_v29  ;;  %v7506_v46 = vld [vmem:[%s9159_s4 + $0x88] sm:$0xff]   ;;  %v1307_v1 = vor.u32 %v1305_v62, %v1303_v3  ;;  %v455_v6 = vmul.f32 %v5697_v16, %v7134_v30 }
  0xb5   : > { %v5768_v57 = vpack.c.bf16 %v863_v44, %v862_v51  ;;  %6192 = vmatmul.mubr.bf16.gmra.mxu0 %v1304_v49  ;;  %v7515_v31 = vsel %vm1908_vm6, %v1914_v35, %v1916_v8  ;;  %v1311_v19 = vrot.slane %v1309_v22, 1  ;;  %v1918_v7 = vrot.slane %v7416_v63, 1 }
  0xb6   : > { %v749_v9 = vpop.permute.xlu1 %748  ;;  %v746_v15 = vpop.permute.xlu0 %745  ;;  %6248 = vmatmul.mubr.bf16.gmra.mxu1 %v7472_v33  ;;  %v7509_v55 = vld [vmem:[#allocation2 + $0x40] sm:$0xff]   ;;  %6280 = vmatpush3.bf16.msra.mxu0 %v7447_v5  ;;  %v1313_v21 = vshrl.u32 %v7472_v33, 16  ;;  %v5702_v63 = vunpack.c.h.bf16 %v7491_v12  ;;  %v5701_v34 = vunpack.c.l.bf16 %v7491_v12  ;;  %v7542_v45 = vadd.f32 %v6822_v54, %v456_v23 }
  0xb7   : > { %5843 = vst [vmem:[#allocation2 + $0x50] sm:$0xff] %v5768_v57   ;;  %vm824_vm2 = vcmp.eq.s32.totalorder %v749_v9, 1  ;;  %vm823_vm3 = vcmp.eq.s32.totalorder %v746_v15, 1  ;;  %6336 = vmatpush3.bf16.msra.mxu1 %v6734_v29  ;;  %6281 = vmatprep.subr.bf16.mxu0 %v6737_v14  ;;  %v1317_v35 = vshll.u32 %v7509_v55, 16  ;;  %v1312_v43 = vsel %vm1252_vm1, %v1307_v1, %v1311_v19 }
  0xb8   : > { %v865_v30 = vsel %vm824_vm2, %v537_v37, 0.0  ;;  %v864_v5 = vsel %vm823_vm3, %v536_v20, 0.0  ;;  %6251 = vmatprep.mubr.bf16.mxu1 %v7509_v55  ;;  %6337 = vmatprep.subr.bf16.mxu1 %v6738_v10  ;;  %v543_v29 = vmax.f32 %v7498_v24, 0.0  ;;  %v1315_v37 = vor.u32 %v1313_v21, %v1311_v19 }
  0xb9   : > { %v5773_v13 = vpack.c.bf16 %v865_v30, %v864_v5  ;;  %6195 = vmatprep.mubr.bf16.mxu0 %v1312_v43  ;;  %v1319_v11 = vrot.slane %v1317_v35, 1  ;;  %v7537_v41 = vsel %vm1908_vm6, %v1916_v8, %v1918_v7  ;;  %v1920_v32 = vrot.slane %v7450_v2, 1 }
  0xba   : > { %v755_v52 = vpop.permute.xlu1 %754  ;;  %v752_v40 = vpop.permute.xlu0 %751  ;;  %v7533_v20 = vld [vmem:[#allocation2 + $0x48] sm:$0xff]   ;;  %6282 = vmatpush3.bf16.msra.mxu0 %v6737_v14  ;;  %v1321_v23 = vshrl.u32 %v7509_v55, 16  ;;  %v7557_v51 = vadd.f32 %v6822_v54, %v455_v6  ;;  %v458_v2 = vmul.f32 %v6823_v47, %v5702_v63  ;;  %v542_v62 = vmax.f32 %v7501_v28, 0.0 }
  0xbb   : > { %5844 = vst [vmem:[#allocation2 + $0x58] sm:$0xff] %v5773_v13   ;;  %vm826_vm4 = vcmp.eq.s32.totalorder %v755_v52, 1  ;;  %vm825_vm5 = vcmp.eq.s32.totalorder %v752_v40, 1  ;;  %6338 = vmatpush3.bf16.msra.mxu1 %v6738_v10  ;;  %6283 = vmatprep.subr.bf16.mxu0 %v7506_v46  ;;  %v1320_v14 = vsel %vm1252_vm1, %v1315_v37, %v1319_v11  ;;  %v1325_v44 = vshll.u32 %v7533_v20, 16 }
  0xbc   : > { %v867_v3 = vsel %vm826_vm4, %v539_v25, 0.0  ;;  %v866_v16 = vsel %vm825_vm5, %v538_v17, 0.0  ;;  %6427 = vmatprep.subr.bf16.mxu1 %v7520_v27  ;;  %v1323_v12 = vor.u32 %v1321_v23, %v1319_v11  ;;  %v457_v10 = vmul.f32 %v6823_v47, %v5701_v34 }
  0xbd   : > { %v5778_v8 = vpack.c.bf16 %v867_v3, %v866_v16  ;;  %6196 = vmatmul.mubr.bf16.gmra.mxu0 %v1320_v14  ;;  %v7573_v57 = vsel %vm1908_vm6, %v1918_v7, %v1920_v32  ;;  %v1327_v22 = vrot.slane %v1325_v44, 1  ;;  %v1922_v9 = vrot.slane %v7472_v33, 1 }
  0xbe   : > { %v761_v25 = vpop.permute.xlu1 %760  ;;  %v758_v17 = vpop.permute.xlu0 %757  ;;  %6252 = vmatmul.mubr.bf16.gmra.mxu1 %v7533_v20  ;;  %v7568_v49 = vld [vmem:[#allocation2 + $0x50] sm:$0xff]   ;;  %6284 = vmatpush3.bf16.msra.mxu0 %v7506_v46  ;;  %v1329_v46 = vshrl.u32 %v7533_v20, 16  ;;  %v545_v7 = vmax.f32 %v7542_v45, 0.0  ;;  %v506_v30 = vadd.f32 %v6822_v54, %v458_v2  ;;  %v505_v58 = vadd.f32 %v6822_v54, %v457_v10 }
  0xbf   : > { %5845 = vst [vmem:[#allocation2 + $0x60] sm:$0xff] %v5778_v8   ;;  %vm828_vm7 = vcmp.eq.s32.totalorder %v761_v25, 1  ;;  %vm827_vm8 = vcmp.eq.s32.totalorder %v758_v17, 1  ;;  %6285 = vmatprep.subr.bf16.mxu0 %v6743_v4  ;;  %6255 = vmatprep.mubr.bf16.mxu1 %v7568_v49  ;;  %v1333_v1 = vshll.u32 %v7568_v49, 16  ;;  %v1328_v19 = vsel %vm1252_vm1, %v1323_v12, %v1327_v22 }
  0xc0   : > { %v869_v15 = vsel %vm828_vm7, %v541_v42, 0.0  ;;  %v868_v28 = vsel %vm827_vm8, %v540_v26, 0.0  ;;  %6199 = vmatprep.mubr.bf16.mxu0 %v1328_v19  ;;  %v1331_v36 = vor.u32 %v1329_v46, %v1327_v22  ;;  %v7588_v26 = vsel %vm1908_vm6, %v1920_v32, %v1922_v9 }
  0xc1   : > { %v5783_v6 = vpack.c.bf16 %v869_v15, %v868_v28  ;;  %v1335_v42 = vrot.slane %v1333_v1, 1  ;;  %v544_v35 = vmax.f32 %v7557_v51, 0.0  ;;  %v1924_v13 = vrot.slane %v7509_v55, 1 }
  0xc2   : > { %v767_v5 = vpop.permute.xlu1 %766  ;;  %v764_v33 = vpop.permute.xlu0 %763  ;;  %v7585_v21 = vld [vmem:[#allocation2 + $0x58] sm:$0xff]   ;;  %6286 = vmatpush3.bf16.msra.mxu0 %v6743_v4  ;;  %v1337_v40 = vshrl.u32 %v7568_v49, 16  ;;  %v547_v11 = vmax.f32 %v506_v30, 0.0  ;;  %v546_v4 = vmax.f32 %v505_v58, 0.0  ;;  %v1926_v3 = vrot.slane %v7533_v20, 1 }
  0xc3   : > { %5846 = vst [vmem:[#allocation2 + $0x68] sm:$0xff] %v5783_v6   ;;  %vm830_vm9 = vcmp.eq.s32.totalorder %v767_v5, 1  ;;  %vm829_vm10 = vcmp.eq.s32.totalorder %v764_v33, 1  ;;  %6375 = vmatprep.subr.bf16.mxu0 %v7565_v18  ;;  %v1336_v52 = vsel %vm1252_vm1, %v1331_v36, %v1335_v42  ;;  %v1341_v34 = vshll.u32 %v7585_v21, 16 }
  0xc4   : > { %v871_v43 = vsel %vm830_vm9, %v543_v29, 0.0  ;;  %v870_v63 = vsel %vm829_vm10, %v542_v62, 0.0  ;;  %v1339_v32 = vor.u32 %v1337_v40, %v1335_v42  ;;  %v7602_v24 = vsel %vm1908_vm6, %v1922_v9, %v1924_v13 }
  0xc5   : > { %v5788_v37 = vpack.c.bf16 %v871_v43, %v870_v63  ;;  %6200 = vmatmul.mubr.bf16.gmra.mxu0 %v1336_v52  ;;  %v1343_v29 = vrot.slane %v1341_v34, 1  ;;  %v1345_v23 = vshrl.u32 %v7585_v21, 16  ;;  %v549_v47 = vmax.f32 %v7155_v38, 0.0  ;;  %v2225_v43 = vld [vmem:[#allocation2 + $0x8] sm:$0xe] }
  0xc6   : > { %v773_v54 = vpop.permute.xlu1 %772  ;;  %v770_v45 = vpop.permute.xlu0 %769  ;;  %6256 = vmatmul.mubr.bf16.gmra.mxu1 %v7585_v21  ;;  %v7599_v55 = vld [vmem:[#allocation2 + $0x60] sm:$0xff]   ;;  %v548_v2 = vmax.f32 %v7158_v39, 0.0  ;;  %v7614_v10 = vsel %vm1908_vm6, %v1924_v13, %v1926_v3  ;;  %v551_v22 = vmax.f32 %v7175_v50, 0.0  ;;  %v1928_v9 = vrot.slane %v7568_v49, 1  ;;  %v7634_v63 = vld [vmem:[#allocation2 + $0xc] sm:$0xf] }
  0xc7   : > { %5847 = vst [vmem:[#allocation2 + $0x70] sm:$0xff] %v5788_v37   ;;  %vm832_vm11 = vcmp.eq.s32.totalorder %v773_v54, 1  ;;  %vm831_vm12 = vcmp.eq.s32.totalorder %v770_v45, 1  ;;  %6259 = vmatprep.mubr.bf16.mxu1 %v7599_v55  ;;  %v1349_v8 = vshll.u32 %v7599_v55, 16  ;;  %v1344_v51 = vsel %vm1252_vm1, %v1339_v32, %v1343_v29 }
  0xc8   : > { %v873_v16 = vsel %vm832_vm11, %v545_v7, 0.0  ;;  %v872_v14 = vsel %vm831_vm12, %v544_v35, 0.0  ;;  %6203 = vmatprep.mubr.bf16.mxu0 %v1344_v51  ;;  %v1347_v62 = vor.u32 %v1345_v23, %v1343_v29  ;;  %v1353_v28 = vshrl.u32 %v7599_v55, 16  ;;  %v7646_v23 = vld [vmem:[#allocation2 + $0x10] sm:$0xff]  }
  0xc9   : > { %v5793_v44 = vpack.c.bf16 %v873_v16, %v872_v14  ;;  %v1351_v20 = vrot.slane %v1349_v8, 1  ;;  %v550_v1 = vmax.f32 %v7178_v53, 0.0  ;;  %v553_v49 = vmax.f32 %v7186_v59, 0.0 }
  0xca   : > { %v779_v25 = vpop.permute.xlu1 %778  ;;  %v776_v17 = vpop.permute.xlu0 %775  ;;  %v7611_v12 = vld [vmem:[#allocation2 + $0x68] sm:$0xff]   ;;  %v7627_v5 = vsel %vm1908_vm6, %v1926_v3, %v1928_v9  ;;  %v1930_v53 = vrot.slane %v7585_v21, 1  ;;  %v552_v54 = vmax.f32 %v7189_v60, 0.0  ;;  %v1932_v45 = vrot.slane %v7599_v55, 1 }
  0xcb   : > { %5848 = vst [vmem:[#allocation2 + $0x78] sm:$0xff] %v5793_v44   ;;  %vm834_vm13 = vcmp.eq.s32.totalorder %v779_v25, 1  ;;  %vm833_vm14 = vcmp.eq.s32.totalorder %v776_v17, 1  ;;  %v1352_v39 = vsel %vm1252_vm1, %v1347_v62, %v1351_v20  ;;  %v1357_v6 = vshll.u32 %v7611_v12, 16 }
  0xcc   : > { %v875_v38 = vsel %vm834_vm13, %v547_v11, 0.0  ;;  %v874_v15 = vsel %vm833_vm14, %v546_v4, 0.0  ;;  %v1355_v50 = vor.u32 %v1353_v28, %v1351_v20  ;;  %v1361_v58 = vshrl.u32 %v7611_v12, 16 }
  0xcd   : > { %v5798_v46 = vpack.c.bf16 %v875_v38, %v874_v15  ;;  %6204 = vmatmul.mubr.bf16.gmra.mxu0 %v1352_v39  ;;  %v1359_v33 = vrot.slane %v1357_v6, 1  ;;  %v7639_v34 = vsel %vm1908_vm6, %v1928_v9, %v1930_v53  ;;  %v554_v60 = vmax.f32 %v7194_v0, 0.0 }
  0xce   : > { %v785_v19 = vpop.permute.xlu1 %784  ;;  %v782_v7 = vpop.permute.xlu0 %781  ;;  %6260 = vmatmul.mubr.bf16.gmra.mxu1 %v7611_v12  ;;  %v7623_v30 = vld [vmem:[#allocation2 + $0x70] sm:$0xff]   ;;  %v1934_v17 = vrot.slane %v7611_v12, 1  ;;  %v2373_v15 = vrot.slane %v7646_v23, 1  ;;  %vm2709_vm8 = vsmask.f32 6400  ;;  %vm6850_vm10 = vmmov 0  }
  0xcf   : > { %5849 = vst [vmem:[#allocation2 + $0x80] sm:$0xff] %v5798_v46   ;;  %vm836_vm15 = vcmp.eq.s32.totalorder %v785_v19, 1  ;;  %vm835_vm0 = vcmp.eq.s32.totalorder %v782_v7, 1  ;;  %6263 = vmatprep.mubr.bf16.mxu1 %v7623_v30  ;;  %v1365_v35 = vshll.u32 %v7623_v30, 16  ;;  %v1360_v59 = vsel %vm1252_vm1, %v1355_v50, %v1359_v33  ;;  %v7668_v19 = vld [vmem:[#allocation2 + $0x18] sm:$0xff]  }
  0xd0   : > { %v877_v36 = vsel %vm836_vm15, %v549_v47, 0.0  ;;  %v876_v42 = vsel %vm835_vm0, %v548_v2, 0.0  ;;  %6207 = vmatprep.mubr.bf16.mxu0 %v1360_v59  ;;  %v1363_v37 = vor.u32 %v1361_v58, %v1359_v33  ;;  %v1369_v3 = vshrl.u32 %v7623_v30, 16  ;;  %v7675_v58 = vld [vmem:[#allocation2 + $0x28] sm:$0xff]  }
  0xd1   : > { %v5803_v13 = vpack.c.bf16 %v877_v36, %v876_v42  ;;  %v1367_v11 = vrot.slane %v1365_v35, 1  ;;  %v7653_v47 = vcombine.low %v2225_v43, %v7634_v63  ;;  %v7656_v2 = vsel %vm1908_vm6, %v1930_v53, %v1932_v45  ;;  %v7673_v36 = vld [vmem:[#allocation2 + $0x20] sm:$0xff]  }
  0xd2   : > { %v791_v52 = vpop.permute.xlu1 %790  ;;  %v788_v40 = vpop.permute.xlu0 %787  ;;  %v7636_v21 = vld [vmem:[#allocation2 + $0x78] sm:$0xff]   ;;  %v7665_v12 = vsel %vm1908_vm6, %v1932_v45, %v1934_v17  ;;  %v1936_v7 = vrot.slane %v7623_v30, 1  ;;  %vm3981_vm9 = vsmask.f32 5376  ;;  %vm4821_vm11 = vcmask 261120  }
  0xd3   : > { %5850 = vst [vmem:[#allocation2 + $0x88] sm:$0xff] %v5803_v13   ;;  %vm838_vm2 = vcmp.eq.s32.totalorder %v791_v52, 1  ;;  %vm837_vm3 = vcmp.eq.s32.totalorder %v788_v40, 1  ;;  %v1368_v29 = vsel %vm1252_vm1, %v1363_v37, %v1367_v11  ;;  %v1373_v14 = vshll.u32 %v7636_v21, 16  ;;  %v7681_v52 = vld [vmem:[#allocation2 + $0x30] sm:$0xff]   ;;  %v7685_v45 = vld [vmem:[#allocation2 + $0x38] sm:$0xff]  }
  0xd4   : > { %v879_v4 = vsel %vm838_vm2, %v551_v22, 0.0  ;;  %v878_v32 = vsel %vm837_vm3, %v550_v1, 0.0  ;;  %v1371_v55 = vor.u32 %v1369_v3, %v1367_v11  ;;  %v1377_v22 = vshrl.u32 %v7636_v21, 16 }
  0xd5   : > { %v5808_v16 = vpack.c.bf16 %v879_v4, %v878_v32  ;;  %6208 = vmatmul.mubr.bf16.gmra.mxu0 %v1368_v29  ;;  %v1375_v25 = vrot.slane %v1373_v14, 1  ;;  %v2372_v6 = vrot.slane %v7653_v47, 1  ;;  %v7678_v35 = vsel %vm1908_vm6, %v1934_v17, %v1936_v7 }
  0xd6   : > { %v797_v8 = vpop.permute.xlu1 %796  ;;  %v794_v44 = vpop.permute.xlu0 %793  ;;  %6264 = vmatmul.mubr.bf16.gmra.mxu1 %v7636_v21  ;;  %v7649_v51 = vld [vmem:[#allocation2 + $0x80] sm:$0xff]   ;;  %v1938_v40 = vrot.slane %v7636_v21, 1  ;;  %v2375_v32 = vrot.slane %v7668_v19, 1 }
  0xd7   : > { %5851 = vst [vmem:[#allocation2 + $0x90] sm:$0xff] %v5808_v16   ;;  %vm840_vm4 = vcmp.eq.s32.totalorder %v797_v8, 1  ;;  %vm839_vm5 = vcmp.eq.s32.totalorder %v794_v44, 1  ;;  %6267 = vmatprep.mubr.bf16.mxu1 %v7649_v51  ;;  %v1381_v0 = vshll.u32 %v7649_v51, 16  ;;  %v1376_v38 = vsel %vm1252_vm1, %v1371_v55, %v1375_v25 }
  0xd8   : > { %v881_v62 = vsel %vm840_vm4, %v553_v49, 0.0  ;;  %v880_v20 = vsel %vm839_vm5, %v552_v54, 0.0  ;;  %6211 = vmatprep.mubr.bf16.mxu0 %v1376_v38  ;;  %v1379_v28 = vor.u32 %v1377_v22, %v1375_v25  ;;  %v1385_v33 = vshrl.u32 %v7649_v51, 16 }
  0xd9   : > { %v5813_v9 = vpack.c.bf16 %v881_v62, %v880_v20  ;;  %v1383_v46 = vrot.slane %v1381_v0, 1  ;;  %v2374_v13 = vsel %vm1908_vm6, %v2372_v6, %v2373_v15  ;;  %v1940_v4 = vrot.slane %v7649_v51, 1  ;;  %v6755_v51 = vld [vmem:[%s9159_s4 + $0x170] sm:$0xff]   ;;  %v7706_v20 = vld [vmem:[#allocation2 + $0x40] sm:$0xff]   ;;  %v7709_v0 = vld [vmem:[#allocation2 + $0x48] sm:$0xff]  }
  0xda   : > { %v800_v39 = vpop.permute.xlu0 %799  ;;  %v6732_v1 = vld [vmem:[#allocation2 + $0x88] sm:$0xff]   ;;  %v7690_v29 = vsel %vm1908_vm6, %v1936_v7, %v1938_v40  ;;  %v2377_v8 = vrot.slane %v7673_v36, 1  ;;  %v2379_v44 = vrot.slane %v7675_v58, 1  ;;  %v2383_v62 = vrot.slane %v7685_v45, 1 }
  0xdb   : > { %5852 = vst [vmem:[#allocation2 + $0x98] sm:$0xff] %v5813_v9   ;;  %vm841_vm7 = vcmp.eq.s32.totalorder %v800_v39, 1  ;;  %v1384_v49 = vsel %vm1252_vm1, %v1379_v28, %v1383_v46  ;;  %v1389_v53 = vshll.u32 %v6732_v1, 16  ;;  %v1387_v59 = vor.u32 %v1385_v33, %v1383_v46  ;;  %v7711_v9 = vld [vmem:[#allocation2 + $0x50] sm:$0xff]   ;;  %v7718_v28 = vld [vmem:[#allocation2 + $0x58] sm:$0xff]   ;;  %v7720_v46 = vld [vmem:[#allocation2 + $0x60] sm:$0xff]  }
  0xdc   : > { %v882_v50 = vsel %vm841_vm7, %v554_v60, 0.0  ;;  %v1393_v11 = vshrl.u32 %v6732_v1, 16  ;;  %v1942_v3 = vrot.slane %v6732_v1, 1  ;;  %v7694_v21 = vsel %vm1908_vm6, %v1938_v40, %v1940_v4 }
  0xdd   : > { %v5634_v42 = vpack.c.bf16 %v882_v50, %v882_v50  ;;  %6212 = vmatmul.mubr.bf16.gmra.mxu0 %v1384_v49  ;;  %v1391_v30 = vrot.slane %v1389_v53, 1  ;;  %v2381_v60 = vrot.slane %v7681_v52, 1  ;;  %v2376_v22 = vsel %vm1908_vm6, %v2373_v15, %v2375_v32  ;;  %v6758_v49 = vld [vmem:[%s9159_s4 + $0x168] sm:$0xff]  }
  0xde   : > { %6268 = vmatmul.mubr.bf16.gmra.mxu1 %v6732_v1  ;;  %v6739_v43 = vld [vmem:[#allocation2 + $0x90] ss:$0 sps:$4 sm:$0x11]   ;;  %v7702_v55 = vsel %vm1908_vm6, %v1940_v4, %v1942_v3  ;;  %v2378_v39 = vsel %vm1908_vm6, %v2375_v32, %v2377_v8  ;;  %v9163_v15 = vrot.slane %v7673_v36, 2  ;;  %v3188_v1 = vrot.slane %v7675_v58, 2 }
  0xdf   : > { %1088 = vst [vmem:[#allocation2 + $0xa0] sm:$0xf] %v5634_v42  ;;  %6339 = vmatprep.mubr.bf16.mxu1 %v2374_v13  ;;  %v1392_v37 = vsel %vm1252_vm1, %v1387_v59, %v1391_v30  ;;  %v1397_v54 = vshll.u32 %v6739_v43, 16  ;;  %v1395_v16 = vor.u32 %v1393_v11, %v1391_v30  ;;  %v1944_v25 = vrot.slane %v6739_v43, 1  ;;  %v6760_v59 = vld [vmem:[%s9159_s4 + $0x130] sm:$0xff]   ;;  %v6761_v11 = vld [vmem:[%s9159_s4 + $0x160] sm:$0xff]  }
  0xe0   : > { %6215 = vmatprep.mubr.bf16.mxu0 %v1392_v37  ;;  %v2380_v6 = vsel %vm1908_vm6, %v2377_v8, %v2379_v44  ;;  %v2382_v7 = vsel %vm1908_vm6, %v2379_v44, %v2381_v60  ;;  %v2385_v50 = vrot.slane %v7706_v20, 1  ;;  %v9164_v33 = vrot.slane %v7711_v9, 1 }
  0xe1   : > { %v1399_v14 = vrot.slane %v1397_v54, 1  ;;  %v7714_v38 = vsel %vm1908_vm6, %v1942_v3, %v1944_v25  ;;  %v2737_v42 = vshrl.u32 %v7673_v36, 16  ;;  %v2740_v30 = vshll.u32 %v7673_v36, 16  ;;  %v6763_v25 = vld [vmem:[%s9159_s4 + $0x128] sm:$0xff]  }
  0xe2   : > { %v3190_v43 = vrot.slane %v7681_v52, 2  ;;  %v2746_v40 = vshrl.u32 %v7675_v58, 16  ;;  %v2749_v4 = vshll.u32 %v7675_v58, 16  ;;  %v3192_v32 = vrot.slane %v7685_v45, 2 }
  0xe3   : > { %v1400_v17 = vsel %vm1252_vm1, %v1395_v16, %v1399_v14  ;;  %vm3180_vm1 = vcmask 1045504   ;;  %v2739_v54 = vrot.slane %v2737_v42, 1  ;;  %v7756_v3 = vsel %vm1908_vm6, %v2383_v62, %v2385_v50 }
  0xe4   : > { %v7739_v53 = vsel %vm3180_vm1, %v9163_v15, %v3188_v1  ;;  %v2742_v16 = vrot.slane %v2740_v30, 2  ;;  %v7759_v14 = vsel %vm3180_vm1, %v3188_v1, %v3190_v43  ;;  %v2748_v8 = vrot.slane %v2746_v40, 1  ;;  %v7863_v15 = vld [vmem:[#allocation2 + $0x88] sm:$0xff]  }
  0xe5   : > { %6216 = vmatmul.mubr.bf16.gmra.mxu0 %v1400_v17  ;;  %v2755_v58 = vshrl.u32 %v7681_v52, 16  ;;  %v2773_v40 = vshrl.u32 %v7706_v20, 16 }
  0xe6   : > { %6340 = vmatmul.mubr.bf16.vlgmr.msra.gmra.mxu1 %v2376_v22  ;;  %6287 = vmatprep.mubr.bf16.mxu0 %v7422_v56  ;;  %v7728_v56 = vsel %vm1908_vm6, %v2381_v60, %v2383_v62  ;;  %v2751_v60 = vrot.slane %v2749_v4, 2  ;;  %v7773_v17 = vor.u32 %v2742_v16, %v2739_v54  ;;  %v3194_v62 = vrot.slane %v7706_v20, 2 }
  0xe7   : > { %6343 = vmatprep.mubr.bf16.mxu1 %v2378_v39  ;;  %6428 = vmatpush3.bf16.msra.mxu1 %v7520_v27  ;;  %v2387_v27 = vrot.slane %v7709_v0, 1  ;;  %v2764_v22 = vshrl.u32 %v7685_v45, 16  ;;  %v6764_v39 = vld [vmem:[%s9159_s4 + $0x158] sm:$0xff]   ;;  %v2757_v1 = vrot.slane %v2755_v58, 1  ;;  %v3198_v54 = vrot.slane %v7711_v9, 2 }
  0xe8   : > { %6429 = vmatprep.subr.bf16.mxu1 %v6755_v51  ;;  %v2782_v4 = vshrl.u32 %v7709_v0, 16  ;;  %v3200_v58 = vrot.slane %v7718_v28, 2 }
  0xe9   : > { %v7763_v44 = vsel %vm1908_vm6, %v2385_v50, %v2387_v27  ;;  %v3196_v50 = vrot.slane %v7709_v0, 2  ;;  %v2766_v42 = vrot.slane %v2764_v22, 1 }
  0xeb   : > { %6430 = vmatpush3.bf16.msra.mxu1 %v6755_v51  ;;  %v7766_v51 = vsel %vm3180_vm1, %v3190_v43, %v3192_v32  ;;  %v7797_v43 = vsel %vm3180_vm1, %v3194_v62, %v3196_v50  ;;  %v7814_v22 = vsel %vm3180_vm1, %v3196_v50, %v3198_v54  ;;  %v7829_v50 = vld [vmem:[#allocation2 + $0x70] sm:$0xff]  }
  0xec   : > { %6431 = vmatprep.subr.bf16.mxu1 %v6758_v49 }
  0xed   : > { %6288 = vmatmul.mubr.bf16.vlgmr.msra.gmra.mxu0 %v7459_v48  ;;  %v2758_v48 = vshll.u32 %v7681_v52, 16  ;;  %v7787_v52 = vsel %vm1908_vm6, %v2387_v27, %v9164_v33 }
  0xee   : > { %6344 = vmatmul.mubr.bf16.gmra.mxu1 %v2380_v6  ;;  %6291 = vmatprep.mubr.bf16.mxu0 %v7476_v61  ;;  %v2752_v61 = vor.u32 %v2751_v60, %v2748_v8  ;;  %v2767_v6 = vshll.u32 %v7685_v45, 16  ;;  %v2775_v8 = vrot.slane %v2773_v40, 1  ;;  %v2785_v60 = vshll.u32 %v7709_v0, 16  ;;  %v6767_v0 = vld [vmem:[%s9159_s4 + $0x150] sm:$0xff]   ;;  %v7835_v40 = vld [vmem:[#allocation2 + $0x78] sm:$0xff]  }
  0xef   : > { %6347 = vmatprep.mubr.bf16.mxu1 %v2382_v7  ;;  %6376 = vmatpush3.bf16.msra.mxu0 %v7565_v18  ;;  %v2760_v7 = vrot.slane %v2758_v48, 2  ;;  %v7790_v18 = vsel %vm3180_vm1, %v3192_v32, %v3194_v62  ;;  %v7803_v32 = vld [vmem:[#allocation2 + $0x68] sm:$0xff]   ;;  %v6766_v48 = vld [vmem:[%s9159_s4 + $0x120] sm:$0xff]  }
  0xf0   : > { %6432 = vmatpush3.bf16.msra.mxu1 %v6758_v49  ;;  %6377 = vmatprep.subr.bf16.mxu0 %v6760_v59  ;;  %v7794_v30 = vsel %vm2709_vm8, %v7773_v17, %v2752_v61  ;;  %v2769_v45 = vrot.slane %v2767_v6, 2  ;;  %v2776_v49 = vshll.u32 %v7706_v20, 16  ;;  %v7824_v6 = vsel %vm3180_vm1, %v3198_v54, %v3200_v58  ;;  %v6769_v54 = vld [vmem:[%s9159_s4 + $0x118] sm:$0xff]  }
  0xf1   : > { %6433 = vmatprep.subr.bf16.mxu1 %v6761_v11  ;;  %v2761_v27 = vor.u32 %v2760_v7, %v2757_v1  ;;  %v2787_v1 = vrot.slane %v2785_v60, 2  ;;  %v2794_v7 = vshll.u32 %v7711_v9, 16  ;;  %v6770_v60 = vld [vmem:[%s9159_s4 + $0x148] sm:$0xff]  }
  0xf2   : > { %v2770_v16 = vor.u32 %v2769_v45, %v2766_v42  ;;  %v2778_v62 = vrot.slane %v2776_v49, 2  ;;  %v3202_v42 = vrot.slane %v7720_v46, 2  ;;  %v2800_v45 = vshrl.u32 %v7718_v28, 16 }
  0xf3   : > { %6378 = vmatpush3.bf16.msra.mxu0 %v6760_v59  ;;  %v7811_v20 = vsel %vm2709_vm8, %v2752_v61, %v2761_v27  ;;  %v2784_v59 = vrot.slane %v2782_v4, 1  ;;  %v2791_v61 = vshrl.u32 %v7711_v9, 16 }
  0xf4   : > { %6434 = vmatpush3.bf16.msra.mxu1 %v6761_v11  ;;  %6379 = vmatprep.subr.bf16.mxu0 %v6763_v25  ;;  %v7821_v11 = vsel %vm2709_vm8, %v2761_v27, %v2770_v16 }
  0xf5   : > { %6292 = vmatmul.mubr.bf16.gmra.mxu0 %v7515_v31  ;;  %6435 = vmatprep.subr.bf16.mxu1 %v6764_v39  ;;  %v2779_v31 = vor.u32 %v2778_v62, %v2775_v8  ;;  %v2788_v27 = vor.u32 %v2787_v1, %v2784_v59  ;;  %v2793_v49 = vrot.slane %v2791_v61, 1  ;;  %v2796_v8 = vrot.slane %v2794_v7, 2  ;;  %v7858_v1 = vld [vmem:[#allocation2 + $0x80] sm:$0xff]  }
  0xf6   : > { %6348 = vmatmul.mubr.bf16.gmra.mxu1 %v7728_v56  ;;  %6295 = vmatprep.mubr.bf16.mxu0 %v7537_v41  ;;  %v2803_v56 = vshll.u32 %v7718_v28, 16  ;;  %v3204_v41 = vrot.slane %v7803_v32, 2  ;;  %v3206_v7 = vrot.slane %v7829_v50, 2 }
  0xf7   : > { %6351 = vmatprep.mubr.bf16.mxu1 %v7756_v3  ;;  %6380 = vmatpush3.bf16.msra.mxu0 %v6763_v25  ;;  %v7843_v4 = vsel %vm2709_vm8, %v2770_v16, %v2779_v31  ;;  %v7846_v3 = vsel %vm3180_vm1, %v3200_v58, %v3202_v42  ;;  %v2802_v25 = vrot.slane %v2800_v45, 1  ;;  %v2809_v16 = vshrl.u32 %v7720_v46, 16 }
  0xf8   : > { %6436 = vmatpush3.bf16.msra.mxu1 %v6764_v39  ;;  %6381 = vmatprep.subr.bf16.mxu0 %v6766_v48  ;;  %v7852_v39 = vsel %vm2709_vm8, %v2779_v31, %v2788_v27  ;;  %v2805_v62 = vrot.slane %v2803_v56, 2  ;;  %v7855_v59 = vsel %vm3180_vm1, %v3202_v42, %v3204_v41  ;;  %v2797_v61 = vor.u32 %v2796_v8, %v2793_v49  ;;  %v6772_v49 = vld [vmem:[%s9159_s4 + $0x110] sm:$0xff]  }
  0xf9   : > { %6437 = vmatprep.subr.bf16.mxu1 %v6767_v0  ;;  %9169 = vst [vmem:[#allocation3_spill] sm:$0xff] %v7855_v59  ;;  %v2812_v58 = vshll.u32 %v7720_v46, 16  ;;  %v2818_v45 = vshrl.u32 %v7803_v32, 16  ;;  %v2811_v37 = vrot.slane %v2809_v16, 1  ;;  %v2821_v56 = vshll.u32 %v7803_v32, 16 }
  0xfa   : > { %v2806_v31 = vor.u32 %v2805_v62, %v2802_v25  ;;  %v3208_v42 = vrot.slane %v7835_v40, 2  ;;  %v7871_v8 = vsel %vm2709_vm8, %v2788_v27, %v2797_v61  ;;  %v7874_v13 = vsel %vm3180_vm1, %v3204_v41, %v3206_v7  ;;  %v7889_v41 = vld [vmem:[#allocation2 + $0x90] sm:$0xff]  }
  0xfb   : > { %6382 = vmatpush3.bf16.msra.mxu0 %v6766_v48  ;;  %v2814_v33 = vrot.slane %v2812_v58, 2  ;;  %9170 = vst [vmem:[#allocation4_spill] sm:$0xff] %v7874_v13  ;;  %v2820_v48 = vrot.slane %v2818_v45, 1  ;;  %v2823_v62 = vrot.slane %v2821_v56, 2  ;;  %v2827_v27 = vshrl.u32 %v7829_v50, 16 }
  0xfc   : > { %6438 = vmatpush3.bf16.msra.mxu1 %v6767_v0  ;;  %6383 = vmatprep.subr.bf16.mxu0 %v6769_v54  ;;  %v6773_v0 = vld [vmem:[%s9159_s4 + $0x140] sm:$0xff]   ;;  %v7881_v25 = vsel %vm2709_vm8, %v2797_v61, %v2806_v31  ;;  %v7884_v16 = vsel %vm3180_vm1, %v3206_v7, %v3208_v42  ;;  %v2830_v58 = vshll.u32 %v7829_v50, 16  ;;  %v3210_v45 = vrot.slane %v7858_v1, 2 }
  0xfd   : > { %6296 = vmatmul.mubr.bf16.gmra.mxu0 %v7573_v57  ;;  %6439 = vmatprep.subr.bf16.mxu1 %v6770_v60  ;;  %9171 = vst [vmem:[#allocation5_spill] sm:$0xff] %v7884_v16  ;;  %v2815_v57 = vor.u32 %v2814_v33, %v2811_v37  ;;  %v2836_v61 = vshrl.u32 %v7835_v40, 16  ;;  %v2824_v7 = vor.u32 %v2823_v62, %v2820_v48  ;;  %v2829_v56 = vrot.slane %v2827_v27, 1 }
  0xfe   : > { %6352 = vmatmul.mubr.bf16.gmra.mxu1 %v7763_v44  ;;  %6299 = vmatprep.mubr.bf16.mxu0 %v7588_v26  ;;  %v2839_v16 = vshll.u32 %v7835_v40, 16  ;;  %v3212_v44 = vrot.slane %v7863_v15, 2  ;;  %v6774_v26 = vld [vmem:[%s9159_s4 + $0x108] sm:$0xff]   ;;  %v2832_v37 = vrot.slane %v2830_v58, 2  ;;  %v7904_v13 = vsel %vm3180_vm1, %v3208_v42, %v3210_v45 }
  0xff   : > { %6355 = vmatprep.mubr.bf16.mxu1 %v7787_v52  ;;  %6384 = vmatpush3.bf16.msra.mxu0 %v6769_v54  ;;  %v7901_v33 = vsel %vm2709_vm8, %v2806_v31, %v2815_v57  ;;  %9173 = vst [vmem:[#allocation7_spill] sm:$0xff] %v7904_v13  ;;  %v2838_v52 = vrot.slane %v2836_v61, 1  ;;  %v7909_v54 = vld [vmem:[%s9159_s4 + $0x1f8] sm:$0xff]   ;;  %v2845_v31 = vshrl.u32 %v7858_v1, 16  ;;  %v2848_v42 = vshll.u32 %v7858_v1, 16 }
 0x100   : > { %6440 = vmatpush3.bf16.msra.mxu1 %v6770_v60  ;;  %6385 = vmatprep.subr.bf16.mxu0 %v6772_v49  ;;  %9172 = vst [vmem:[#allocation6_spill] sm:$0xff] %v7901_v33  ;;  %v7912_v60 = vsel %vm2709_vm8, %v2815_v57, %v2824_v7  ;;  %v2841_v48 = vrot.slane %v2839_v16, 2  ;;  %v7915_v62 = vsel %vm3180_vm1, %v3210_v45, %v3212_v44  ;;  %v9166_v58 = vrot.slane %v7889_v41, 2  ;;  %v6775_v16 = vld [vmem:[%s9159_s4 + $0x100] sm:$0xff]  }
 0x101   : > { %6441 = vmatprep.subr.bf16.mxu1 %v6773_v0  ;;  %v2833_v27 = vor.u32 %v2832_v37, %v2829_v56  ;;  %v2854_v61 = vshrl.u32 %v7863_v15, 16  ;;  %v2847_v33 = vrot.slane %v2845_v31, 1  ;;  %v2857_v59 = vshll.u32 %v7863_v15, 16  ;;  %v7943_v31 = vld [vmem:[#allocation2 + $0x98] ss:$0 sps:$4 sm:$0x33]  }
 0x102   : > { %v2842_v13 = vor.u32 %v2841_v48, %v2838_v52  ;;  %v2850_v45 = vrot.slane %v2848_v42, 2  ;;  %v7931_v56 = vsel %vm3180_vm1, %v3212_v44, %v9166_v58  ;;  %v9174_v37 = vrot.slane %v7718_v28, 1  ;;  %v6781_v58 = vld [vmem:[%s9159_s4 + $0x1e0] sm:$0xff]  }
 0x103   : > { %6386 = vmatpush3.bf16.msra.mxu0 %v6772_v49  ;;  %v7926_v57 = vsel %vm2709_vm8, %v2824_v7, %v2833_v27  ;;  %v2856_v49 = vrot.slane %v2854_v61, 1  ;;  %v2859_v48 = vrot.slane %v2857_v59, 2  ;;  %v2863_v44 = vshrl.u32 %v7889_v41, 16 }
 0x104   : > { %6442 = vmatpush3.bf16.msra.mxu1 %v6773_v0  ;;  %6387 = vmatprep.subr.bf16.mxu0 %v6774_v26  ;;  %v9175_v0 = vrot.slane %v7711_v9, 1  ;;  %v7941_v7 = vsel %vm2709_vm8, %v2833_v27, %v2842_v13  ;;  %v9177_v42 = vmov %v9174_v37  ;;  %v2851_v61 = vor.u32 %v2850_v45, %v2847_v33 }
 0x105   : > { %6300 = vmatmul.mubr.bf16.gmra.mxu0 %v7602_v24  ;;  %6531 = vmatprep.subr.bf16.mxu1 %v7909_v54  ;;  %v9176_v24 = vrot.slane %v7720_v46, 1  ;;  %v2860_v27 = vor.u32 %v2859_v48, %v2856_v49  ;;  %v2865_v59 = vrot.slane %v2863_v44, 1  ;;  %v2395_v28 = vrot.slane %v7803_v32, 1 }
 0x106   : > { %v2392_v52 = vsel %vm1908_vm6, %v9175_v0, %v9174_v37  ;;  %6303 = vmatprep.mubr.bf16.mxu0 %v7614_v10  ;;  %v2866_v37 = vshll.u32 %v7889_v41, 16  ;;  %v7956_v0 = vld [vmem:[%s9159_s4 + $0x1b8] sm:$0xff]   ;;  %v7959_v10 = vsel %vm2709_vm8, %v2842_v13, %v2851_v61  ;;  %v2872_v45 = vshrl.u32 %v7943_v31, 16 }
 0x107   : > { %6356 = vmatmul.mubr.bf16.gmra.mxu1 %v2392_v52  ;;  %v2394_v9 = vsel %vm1908_vm6, %v9177_v42, %v9176_v24  ;;  %6388 = vmatpush3.bf16.msra.mxu0 %v6774_v26  ;;  %v7963_v33 = vsel %vm2709_vm8, %v2851_v61, %v2860_v27  ;;  %v2397_v26 = vrot.slane %v7829_v50, 1  ;;  %v2875_v48 = vshll.u32 %v7943_v31, 16 }
 0x108   : > { %6359 = vmatprep.mubr.bf16.mxu1 %v2394_v9  ;;  %6389 = vmatprep.subr.bf16.mxu0 %v6775_v16  ;;  %v2868_v52 = vrot.slane %v2866_v37, 2  ;;  %v2874_v44 = vrot.slane %v2872_v45, 1  ;;  %v9178_v32 = vrot.slane %v7720_v46, 1  ;;  %v2399_v61 = vrot.slane %v7835_v40, 1 }
 0x109   : > { %v2877_v24 = vrot.slane %v2875_v48, 2  ;;  %v2398_v50 = vsel %vm1908_vm6, %v2395_v28, %v2397_v26  ;;  %v2401_v37 = vrot.slane %v7858_v1, 1  ;;  %v2403_v46 = vrot.slane %v7863_v15, 1  ;;  %v3159_v1 = vld [vmem:[#allocation2 + $0x8] sm:$0xc] }
 0x10a   : > { %v2869_v49 = vor.u32 %v2868_v52, %v2865_v59  ;;  %v2396_v42 = vsel %vm1908_vm6, %v9178_v32, %v2395_v28  ;;  %v6768_v59 = vld [vmem:[#allocation2 + $0x98] ss:$0 sps:$4 sm:$0x11]   ;;  %v5488_v52 = vcombine.low %v3159_v1, %v7634_v63  ;;  %v2719_v28 = vshrl.u32 %v7646_v23, 16  ;;  %v8022_v1 = vld [vmem:[#allocation2 + $0x40] sm:$0xff]  }
 0x10b   : > { %6390 = vmatpush3.bf16.msra.mxu0 %v6775_v16  ;;  %v2878_v9 = vor.u32 %v2877_v24, %v2874_v44  ;;  %v2404_v40 = vsel %vm1908_vm6, %v2401_v37, %v2403_v46  ;;  %v2722_v15 = vshll.u32 %v7646_v23, 16  ;;  %v3182_v45 = vrot.slane %v7646_v23, 2 }
 0x10c   : > { %6479 = vmatprep.subr.bf16.mxu0 %v7956_v0  ;;  %v7970_v13 = vsel %vm2709_vm8, %v2860_v27, %v2869_v49  ;;  %v2405_v27 = vrot.slane %v7889_v41, 1  ;;  %v3181_v48 = vrot.slane %v5488_v52, 2  ;;  %v2728_v24 = vshrl.u32 %v7668_v19, 16  ;;  %v8027_v52 = vld [vmem:[#allocation2 + $0x48] sm:$0xff]  }
 0x10d   : > { %6304 = vmatmul.mubr.bf16.gmra.mxu0 %v7627_v5  ;;  %v7979_v16 = vsel %vm2709_vm8, %v2869_v49, %v2878_v9  ;;  %v2400_v5 = vsel %vm1908_vm6, %v2397_v26, %v2399_v61  ;;  %v2714_v26 = vshll.u32 %v7653_v47, 16  ;;  %v2724_v44 = vrot.slane %v2722_v15, 2  ;;  %v8031_v15 = vld [vmem:[#allocation2 + $0x58] sm:$0xff]  }
 0x10e   : > { %6307 = vmatprep.mubr.bf16.mxu0 %v7639_v34  ;;  %v2402_v34 = vsel %vm1908_vm6, %v2399_v61, %v2401_v37  ;;  %v2731_v63 = vshll.u32 %v7668_v19, 16  ;;  %v3183_v23 = vsel %vm3180_vm1, %v3181_v48, %v3182_v45  ;;  %v2730_v9 = vrot.slane %v2728_v24, 1  ;;  %v8006_v37 = vld [vmem:[#allocation2 + $0x18] sm:$0xff]  }
 0x10f   : > { %6360 = vmatmul.mubr.bf16.gmra.mxu1 %v2396_v42  ;;  %v2716_v42 = vrot.slane %v2714_v26, 2  ;;  %v8045_v48 = vld [vmem:[#allocation2 + $0x78] sm:$0xff]  }
 0x110   : > { %6363 = vmatprep.mubr.bf16.mxu1 %v2398_v50  ;;  %v2733_v61 = vrot.slane %v2731_v63, 2 }
 0x115   : > { %6308 = vmatmul.mubr.bf16.gmra.mxu0 %v7656_v2  ;;  %v2406_v2 = vsel %vm1908_vm6, %v2403_v46, %v2405_v27  ;;  %v8015_v46 = vld [vmem:[#allocation2 + $0x30] sm:$0xff]  }
 0x116   : > { %6311 = vmatprep.mubr.bf16.mxu0 %v7665_v12  ;;  %v2407_v12 = vrot.slane %v6768_v59, 1 }
 0x117   : > { %6364 = vmatmul.mubr.bf16.gmra.mxu1 %v2400_v5  ;;  %v8008_v5 = vld [vmem:[#allocation2 + $0x20] sm:$0xff]  }
 0x118   : > { %6367 = vmatprep.mubr.bf16.mxu1 %v2402_v34  ;;  %v2408_v49 = vsel %vm1908_vm6, %v2405_v27, %v2407_v12  ;;  %v8010_v34 = vld [vmem:[#allocation2 + $0x28] sm:$0xff]   ;;  %v8017_v27 = vld [vmem:[#allocation2 + $0x38] sm:$0xff]   ;;  %v4456_v26 = vrot.slane %v8008_v5, 3  ;;  %vm4452_vm6 = vcmask 1044480  }
 0x11d   : > { %6312 = vmatmul.mubr.bf16.gmra.mxu0 %v7678_v35  ;;  %v2711_v35 = vshrl.u32 %v7653_v47, 16  ;;  %v3184_v47 = vrot.slane %v7668_v19, 2 }
 0x11e   : > { %6315 = vmatprep.mubr.bf16.mxu0 %v7690_v29  ;;  %v2721_v29 = vrot.slane %v2719_v28, 1  ;;  %v8029_v28 = vld [vmem:[#allocation2 + $0x50] sm:$0xff]  }
 0x11f   : > { %6368 = vmatmul.mubr.bf16.gmra.mxu1 %v2404_v40  ;;  %v2713_v32 = vrot.slane %v2711_v35, 1  ;;  %v3185_v19 = vsel %vm3180_vm1, %v3182_v45, %v3184_v47  ;;  %v2734_v40 = vor.u32 %v2733_v61, %v2730_v9  ;;  %v8037_v45 = vld [vmem:[#allocation2 + $0x60] sm:$0xff]   ;;  %v8039_v35 = vld [vmem:[#allocation2 + $0x68] sm:$0xff]   ;;  %v8063_v9 = vld [vmem:[#allocation2 + $0x90] sm:$0xff]  }
 0x120   : > { %6371 = vmatprep.mubr.bf16.mxu1 %v2406_v2  ;;  %v2725_v50 = vor.u32 %v2724_v44, %v2721_v29  ;;  %v9179_v2 = vrot.slane %v7673_v36, 2  ;;  %v9165_v36 = vrot.slane %v8006_v37, 3  ;;  %v4460_v29 = vrot.slane %v8015_v46, 3  ;;  %v8065_v61 = vld [vmem:[#allocation2 + $0x98] sm:$0xff]  }
 0x121   : > { %v4462_v44 = vrot.slane %v8017_v27, 3  ;;  %v2744_v63 = vsel %vm2709_vm8, %v2734_v40, %v7773_v17 }
 0x122   : > { %v3187_v12 = vsel %vm3180_vm1, %v3184_v47, %v9179_v2  ;;  %v2735_v24 = vsel %vm2709_vm8, %v2725_v50, %v2734_v40  ;;  %v8061_v47 = vld [vmem:[#allocation2 + $0x88] sm:$0xff]   ;;  %v4468_v2 = vrot.slane %v8029_v28, 3 }
 0x125   : > { %6316 = vmatmul.mubr.bf16.gmra.mxu0 %v7694_v21  ;;  %v2717_v21 = vor.u32 %v2716_v42, %v2713_v32  ;;  %v8058_v32 = vsel %vm4452_vm6, %v9165_v36, %v4456_v26  ;;  %v4464_v42 = vrot.slane %v8022_v1, 3 }
 0x126   : > { %6319 = vmatprep.mubr.bf16.mxu0 %v7702_v55  ;;  %v6777_v55 = vld [vmem:[%s9159_s4 + $0x1f0] sm:$0xff]  }
 0x127   : > { %6372 = vmatmul.mubr.bf16.gmra.mxu1 %v2408_v49  ;;  %v2726_v59 = vsel %vm2709_vm8, %v2717_v21, %v2725_v50  ;;  %v8043_v49 = vld [vmem:[#allocation2 + $0x70] sm:$0xff]   ;;  %v8074_v21 = vsel %vm4452_vm6, %v4460_v29, %v4462_v44  ;;  %v8080_v40 = vsel %vm4452_vm6, %v4462_v44, %v4464_v42  ;;  %v4478_v44 = vrot.slane %v8045_v48, 3 }
 0x128   : > { %6443 = vmatprep.mubr.bf16.mxu1 %v3183_v23  ;;  %v8053_v23 = vld [vmem:[#allocation2 + $0x80] sm:$0xff]   ;;  %9181 = vst [vmem:[#allocation9_spill] sm:$0xff] %v8074_v21  ;;  %9182 = vst [vmem:[#allocation10_spill] sm:$0xff] %v8080_v40  ;;  %v4476_v36 = vrot.slane %v8043_v49, 3 }
 0x12d   : > { %6320 = vmatmul.mubr.bf16.gmra.mxu0 %v7714_v38  ;;  %v6779_v38 = vld [vmem:[%s9159_s4 + $0x1e8] sm:$0xff]  }
 0x12e   : > { %6391 = vmatprep.mubr.bf16.mxu0 %v2726_v59  ;;  %v8077_v59 = vld [vmem:[#allocation2 + $0xa0] ss:$0 sps:$4 sm:$0x77]  }
 0x12f   : > { %6444 = vmatmul.mubr.bf16.vlgmr.msra.gmra.mxu1 %v3185_v19  ;;  %v4466_v19 = vrot.slane %v8027_v52, 3 }
 0x130   : > { %6447 = vmatprep.mubr.bf16.mxu1 %v3187_v12  ;;  %6532 = vmatpush3.bf16.msra.mxu1 %v7909_v54  ;;  %v4458_v54 = vrot.slane %v8010_v34, 3  ;;  %v4470_v12 = vrot.slane %v8031_v15, 3 }
 0x131   : > { %6533 = vmatprep.subr.bf16.mxu1 %v6777_v55  ;;  %v8098_v40 = vsel %vm4452_vm6, %v4466_v19, %v4468_v2 }
 0x132   : > { %v8068_v50 = vsel %vm4452_vm6, %v4456_v26, %v4458_v54  ;;  %v8071_v17 = vsel %vm4452_vm6, %v4458_v54, %v4460_v29  ;;  %v4472_v26 = vrot.slane %v8037_v45, 3  ;;  %v6780_v54 = vld [vmem:[%s9159_s4 + $0x1b0] sm:$0xff]   ;;  %v8089_v29 = vsel %vm4452_vm6, %v4464_v42, %v4466_v19  ;;  %9184 = vst [vmem:[#allocation12_spill] sm:$0xff] %v8098_v40 }
 0x133   : > { %9180 = vst [vmem:[#allocation8_spill] sm:$0xff] %v8071_v17  ;;  %9183 = vst [vmem:[#allocation11_spill] sm:$0xff] %v8089_v29  ;;  %v8101_v21 = vsel %vm4452_vm6, %v4468_v2, %v4470_v12  ;;  %v4480_v29 = vrot.slane %v8053_v23, 3  ;;  %v8115_v19 = vsel %vm4452_vm6, %v4476_v36, %v4478_v44  ;;  %v4482_v2 = vrot.slane %v8061_v47, 3 }
 0x134   : > { %6534 = vmatpush3.bf16.msra.mxu1 %v6777_v55  ;;  %v4474_v55 = vrot.slane %v8039_v35, 3  ;;  %9185 = vst [vmem:[#allocation13_spill] sm:$0xff] %v8101_v21  ;;  %v8104_v42 = vsel %vm4452_vm6, %v4470_v12, %v4472_v26  ;;  %9189 = vst [vmem:[#allocation17_spill] sm:$0xff] %v8115_v19 }
 0x135   : > { %6535 = vmatprep.subr.bf16.mxu1 %v6779_v38  ;;  %6392 = vmatmul.mubr.bf16.vlgmr.msra.gmra.mxu0 %v2735_v24  ;;  %9186 = vst [vmem:[#allocation14_spill] sm:$0xff] %v8104_v42  ;;  %v8121_v12 = vsel %vm4452_vm6, %v4478_v44, %v4480_v29 }
 0x136   : > { %6395 = vmatprep.mubr.bf16.mxu0 %v2744_v63  ;;  %v8109_v24 = vsel %vm4452_vm6, %v4472_v26, %v4474_v55  ;;  %v8112_v17 = vsel %vm4452_vm6, %v4474_v55, %v4476_v36  ;;  %6480 = vmatpush3.bf16.msra.mxu0 %v7956_v0  ;;  %9190 = vst [vmem:[#allocation18_spill] sm:$0xff] %v8121_v12  ;;  %v4486_v63 = vrot.slane %v8065_v61, 3  ;;  %v4488_v26 = vrot.slane %v8077_v59, 3  ;;  %v6782_v36 = vld [vmem:[%s9159_s4 + $0x1a8] sm:$0xff]  }
 0x137   : > { %6448 = vmatmul.mubr.bf16.gmra.mxu1 %v7739_v53  ;;  %9187 = vst [vmem:[#allocation15_spill] sm:$0xff] %v8109_v24  ;;  %9188 = vst [vmem:[#allocation16_spill] sm:$0xff] %v8112_v17  ;;  %v4484_v53 = vrot.slane %v8063_v9, 3  ;;  %6481 = vmatprep.subr.bf16.mxu0 %v6780_v54  ;;  %v8130_v55 = vsel %vm4452_vm6, %v4480_v29, %v4482_v2  ;;  %v6784_v29 = vld [vmem:[%s9159_s4 + $0x1a0] sm:$0xff]  }
 0x138   : > { %6451 = vmatprep.mubr.bf16.mxu1 %v7759_v14  ;;  %6536 = vmatpush3.bf16.msra.mxu1 %v6779_v38  ;;  %9191 = vst [vmem:[#allocation19_spill] sm:$0xff] %v8130_v55  ;;  %v6783_v14 = vld [vmem:[%s9159_s4 + $0x1d8] sm:$0xff]   ;;  %v8142_v38 = vsel %vm4452_vm6, %v4486_v63, %v4488_v26 }
 0x139   : > { %6537 = vmatprep.subr.bf16.mxu1 %v6781_v58  ;;  %v8136_v0 = vsel %vm4452_vm6, %v4482_v2, %v4484_v53  ;;  %v8139_v44 = vsel %vm4452_vm6, %v4484_v53, %v4486_v63  ;;  %9194 = vst [vmem:[#allocation22_spill] sm:$0xff] %v8142_v38  ;;  %v6785_v2 = vld [vmem:[%s9159_s4 + $0x1d0] sm:$0xff]   ;;  %v9199_v53 = vld [vmem:[#allocation7_spill] sm:$0xff] }
 0x13a   : > { %9192 = vst [vmem:[#allocation20_spill] sm:$0xff] %v8136_v0  ;;  %9193 = vst [vmem:[#allocation21_spill] sm:$0xff] %v8139_v44  ;;  %6482 = vmatpush3.bf16.msra.mxu0 %v6780_v54  ;;  %v9198_v54 = vld [vmem:[#allocation5_spill] sm:$0xff] }
 0x13b   : > { %6483 = vmatprep.subr.bf16.mxu0 %v6782_v36 }
 0x13c   : > { %6538 = vmatpush3.bf16.msra.mxu1 %v6781_v58  ;;  %v6787_v58 = vld [vmem:[%s9159_s4 + $0x198] sm:$0xff]  }
 0x13d   : > { %6396 = vmatmul.mubr.bf16.gmra.mxu0 %v7794_v30  ;;  %6539 = vmatprep.subr.bf16.mxu1 %v6783_v14  ;;  %v6788_v30 = vld [vmem:[%s9159_s4 + $0x1c8] sm:$0xff]  }
 0x13e   : > { %6399 = vmatprep.mubr.bf16.mxu0 %v7811_v20  ;;  %6484 = vmatpush3.bf16.msra.mxu0 %v6782_v36  ;;  %v6793_v20 = vld [vmem:[%s9159_s4 + $0x188] sm:$0xff]   ;;  %v3991_v36 = vshrl.u32 %v8006_v37, 16 }
 0x13f   : > { %6452 = vmatmul.mubr.bf16.gmra.mxu1 %v7766_v51  ;;  %6485 = vmatprep.subr.bf16.mxu0 %v6784_v29  ;;  %v6791_v51 = vld [vmem:[%s9159_s4 + $0x190] sm:$0xff]  }
 0x140   : > { %6455 = vmatprep.mubr.bf16.mxu1 %v7790_v18  ;;  %6540 = vmatpush3.bf16.msra.mxu1 %v6783_v14  ;;  %v6792_v18 = vld [vmem:[%s9159_s4 + $0x1c0] sm:$0xff]   ;;  %v3994_v14 = vshll.u32 %v8006_v37, 16 }
 0x141   : > { %6541 = vmatprep.subr.bf16.mxu1 %v6785_v2 }
 0x142   : > { %6486 = vmatpush3.bf16.msra.mxu0 %v6784_v29 }
 0x143   : > { %6487 = vmatprep.subr.bf16.mxu0 %v6787_v58 }
 0x144   : > { %6542 = vmatpush3.bf16.msra.mxu1 %v6785_v2 }
 0x145   : > { %6400 = vmatmul.mubr.bf16.gmra.mxu0 %v7821_v11  ;;  %6543 = vmatprep.subr.bf16.mxu1 %v6788_v30  ;;  %v6796_v11 = vld [vmem:[%s9159_s4 + $0x180] sm:$0xff]  }
 0x146   : > { %6403 = vmatprep.mubr.bf16.mxu0 %v7843_v4  ;;  %6488 = vmatpush3.bf16.msra.mxu0 %v6787_v58  ;;  %v9196_v4 = vld [vmem:[#allocation6_spill] sm:$0xff] }
 0x147   : > { %6456 = vmatmul.mubr.bf16.gmra.mxu1 %v7797_v43  ;;  %6489 = vmatprep.subr.bf16.mxu0 %v6791_v51  ;;  %v8183_v43 = vld [vmem:[%s9159_s4 + $0x238] sm:$0xff]  }
 0x148   : > { %6459 = vmatprep.mubr.bf16.mxu1 %v7814_v22  ;;  %6544 = vmatpush3.bf16.msra.mxu1 %v6788_v30  ;;  %v9195_v22 = vld [vmem:[#allocation3_spill] sm:$0xff] }
 0x149   : > { %6545 = vmatprep.subr.bf16.mxu1 %v6792_v18 }
 0x14a   : > { %6490 = vmatpush3.bf16.msra.mxu0 %v6791_v51  ;;  %v3993_v51 = vrot.slane %v3991_v36, 2  ;;  %v4009_v36 = vshrl.u32 %v8010_v34, 16 }
 0x14b   : > { %6491 = vmatprep.subr.bf16.mxu0 %v6793_v20 }
 0x14c   : > { %6546 = vmatpush3.bf16.msra.mxu1 %v6792_v18  ;;  %v3996_v18 = vrot.slane %v3994_v14, 3 }
 0x14d   : > { %6404 = vmatmul.mubr.bf16.gmra.mxu0 %v7852_v39  ;;  %v8191_v39 = vld [vmem:[#allocation2 + $0x14] sm:$0xf] }
 0x14e   : > { %6407 = vmatprep.mubr.bf16.mxu0 %v7871_v8  ;;  %6492 = vmatpush3.bf16.msra.mxu0 %v6793_v20 }
 0x14f   : > { %6460 = vmatmul.mubr.bf16.gmra.mxu1 %v7824_v6  ;;  %6493 = vmatprep.subr.bf16.mxu0 %v6796_v11  ;;  %v9197_v6 = vld [vmem:[#allocation4_spill] sm:$0xff] }
 0x150   : > { %6463 = vmatprep.mubr.bf16.mxu1 %v7846_v3  ;;  %v3497_v3 = vld [vmem:[#allocation2 + $0x10] sm:$0xc] }
 0x152   : > { %6494 = vmatpush3.bf16.msra.mxu0 %v6796_v11 }
 0x153   : > { %6583 = vmatprep.subr.bf16.mxu0 %v8183_v43 }
 0x155   : > { %6408 = vmatmul.mubr.bf16.gmra.mxu0 %v7881_v25  ;;  %v8197_v25 = vcombine.low %v3497_v3, %v8191_v39 }
 0x156   : > { %6411 = vmatprep.mubr.bf16.mxu0 %v9196_v4 }
 0x157   : > { %6464 = vmatmul.mubr.bf16.gmra.mxu1 %v9195_v22  ;;  %v3983_v29 = vshrl.u32 %v8197_v25, 16  ;;  %v3986_v2 = vshll.u32 %v8197_v25, 16 }
 0x158   : > { %6467 = vmatprep.mubr.bf16.mxu1 %v9197_v6 }
 0x159   : > { %v3985_v4 = vrot.slane %v3983_v29, 2  ;;  %v3988_v6 = vrot.slane %v3986_v2, 3 }
 0x15b   : > { %v3989_v2 = vor.u32 %v3988_v6, %v3985_v4 }
 0x15d   : > { %6412 = vmatmul.mubr.bf16.gmra.mxu0 %v7912_v60 }
 0x15e   : > { %v6237_v8 = vpop.f32.mrf.mxu1  ;;  %6415 = vmatprep.mubr.bf16.mxu0 %v7926_v57 }
 0x15f   : > { %6468 = vmatmul.mubr.bf16.gmra.mxu1 %v9198_v54  ;;  %v4003_v54 = vshll.u32 %v8008_v5, 16 }
 0x160   : > { %6471 = vmatprep.mubr.bf16.mxu1 %v9199_v53  ;;  %v1744_v63 = vpop.f32.mrf.mxu1  ;;  %v3997_v53 = vor.u32 %v3996_v18, %v3993_v51 }
 0x162   : > { %v6238_v26 = vpop.f32.mrf.mxu1 }
 0x164   : > { %v1747_v60 = vpop.f32.mrf.mxu1 }
 0x165   : > { %v6185_v58 = vpop.f32.mrf.mxu0  ;;  %6416 = vmatmul.mubr.bf16.gmra.mxu0 %v7941_v7  ;;  %v3216_v7 = vrot.slane %v7943_v31, 2  ;;  %v9200_v31 = vrot.slane %v7889_v41, 2 }
 0x166   : > { %v8204_v57 = vadd.f32 %v6237_v8, %v6185_v58  ;;  %v6241_v30 = vpop.f32.mrf.mxu1  ;;  %6419 = vmatprep.mubr.bf16.mxu0 %v7959_v10  ;;  %v4000_v8 = vshrl.u32 %v8008_v5, 16 }
 0x167   : > { %6472 = vmatmul.mubr.bf16.gmra.mxu1 %v7915_v62  ;;  %v1501_v20 = vpop.f32.mrf.mxu0 }
 0x168   : > { %6475 = vmatprep.mubr.bf16.mxu1 %v7931_v56  ;;  %v8209_v11 = vadd.f32 %v1744_v63, %v1501_v20  ;;  %v1760_v22 = vpop.f32.mrf.mxu1  ;;  %v4012_v56 = vshll.u32 %v8010_v34, 16  ;;  %v4002_v20 = vrot.slane %v4000_v8, 2  ;;  %v4021_v8 = vshll.u32 %v8015_v46, 16 }
 0x169   : > { %v6186_v3 = vpop.f32.mrf.mxu0 }
 0x16a   : > { %v8214_v62 = vadd.f32 %v6238_v26, %v6186_v3  ;;  %v6242_v10 = vpop.f32.mrf.mxu1  ;;  %v3217_v26 = vsel %vm3180_vm1, %v9200_v31, %v3216_v7  ;;  %v4005_v3 = vrot.slane %v4003_v54, 3  ;;  %v4014_v38 = vrot.slane %v4012_v56, 3 }
 0x16b   : > { %v1504_v63 = vpop.f32.mrf.mxu0  ;;  %v3645_v7 = vrot.slane %v8006_v37, 2  ;;  %v4030_v56 = vshll.u32 %v8017_v27, 16 }
 0x16c   : > { %v8218_v14 = vadd.f32 %v1747_v60, %v1504_v63  ;;  %v1763_v29 = vpop.f32.mrf.mxu1  ;;  %v3998_v60 = vsel %vm3981_vm9, %v3989_v2, %v3997_v53  ;;  %v4011_v63 = vrot.slane %v4009_v36, 2  ;;  %v4006_v44 = vor.u32 %v4005_v3, %v4002_v20 }
 0x16d   : > { %v6189_v58 = vpop.f32.mrf.mxu0  ;;  %6420 = vmatmul.mubr.bf16.gmra.mxu0 %v7963_v33  ;;  %v4027_v36 = vshrl.u32 %v8017_v27, 16 }
 0x16e   : > { %v8224_v51 = vadd.f32 %v6241_v30, %v6189_v58  ;;  %v6245_v18 = vpop.f32.mrf.mxu1  ;;  %6423 = vmatprep.mubr.bf16.mxu0 %v7970_v13  ;;  %v4018_v30 = vshrl.u32 %v8015_v46, 16  ;;  %v4015_v58 = vor.u32 %v4014_v38, %v4011_v63  ;;  %v4007_v3 = vsel %vm3981_vm9, %v3997_v53, %v4006_v44 }
 0x16f   : > { %6476 = vmatmul.mubr.bf16.gmra.mxu1 %v3217_v26  ;;  %v1517_v4 = vpop.f32.mrf.mxu0  ;;  %v3647_v53 = vrot.slane %v8008_v5, 2 }
 0x170   : > { %6547 = vmatprep.mubr.bf16.mxu1 %v3998_v60  ;;  %v8228_v6 = vadd.f32 %v1760_v22, %v1517_v4  ;;  %v1776_v33 = vpop.f32.mrf.mxu1  ;;  %v3644_v22 = vrot.slane %v8197_v25, 2  ;;  %v4020_v60 = vrot.slane %v4018_v30, 2  ;;  %v4023_v4 = vrot.slane %v4021_v8, 3 }
 0x171   : > { %v6190_v41 = vpop.f32.mrf.mxu0  ;;  %v4029_v25 = vrot.slane %v4027_v36, 2  ;;  %v3649_v30 = vrot.slane %v8010_v34, 2  ;;  %v4039_v8 = vshll.u32 %v8022_v1, 16  ;;  %v6810_v34 = vld [vmem:[%s9159_s4 + $0x230] sm:$0xff]  }
 0x172   : > { %v8233_v54 = vadd.f32 %v6242_v10, %v6190_v41  ;;  %v6246_v13 = vpop.f32.mrf.mxu1  ;;  %v3646_v10 = vsel %vm3180_vm1, %v3644_v22, %v3645_v7  ;;  %v4016_v41 = vsel %vm3981_vm9, %v4006_v44, %v4015_v58  ;;  %v4024_v22 = vor.u32 %v4023_v4, %v4020_v60 }
 0x173   : > { %v1520_v2 = vpop.f32.mrf.mxu0  ;;  %v3648_v60 = vsel %vm3180_vm1, %v3645_v7, %v3647_v53 }
 0x174   : > { %v8238_v31 = vadd.f32 %v1763_v29, %v1520_v2  ;;  %v1779_v26 = vpop.f32.mrf.mxu1  ;;  %v4032_v29 = vrot.slane %v4030_v56, 3  ;;  %v4045_v56 = vshrl.u32 %v8027_v52, 16 }
 0x175   : > { %v6193_v20 = vpop.f32.mrf.mxu0  ;;  %6424 = vmatmul.mubr.bf16.gmra.mxu0 %v7979_v16 }
 0x176   : > { %v8243_v38 = vadd.f32 %v6245_v18, %v6193_v20  ;;  %v6249_v63 = vpop.f32.mrf.mxu1  ;;  %6495 = vmatprep.mubr.bf16.mxu0 %v3646_v10  ;;  %v4036_v18 = vshrl.u32 %v8022_v1, 16  ;;  %v4033_v36 = vor.u32 %v4032_v29, %v4029_v25  ;;  %v4041_v25 = vrot.slane %v4039_v8, 3 }
 0x177   : > { %6548 = vmatmul.mubr.bf16.vlgmr.msra.gmra.mxu1 %v4007_v3  ;;  %v1533_v2 = vpop.f32.mrf.mxu0  ;;  %v4047_v7 = vrot.slane %v4045_v56, 2  ;;  %v4054_v56 = vshrl.u32 %v8029_v28, 16 }
 0x178   : > { %6551 = vmatprep.mubr.bf16.mxu1 %v4016_v41  ;;  %v8246_v0 = vadd.f32 %v1776_v33, %v1533_v2  ;;  %v1792_v16 = vpop.f32.mrf.mxu1  ;;  %v4048_v33 = vshll.u32 %v8027_v52, 16  ;;  %v4038_v41 = vrot.slane %v4036_v18, 2 }
 0x179   : > { %v6194_v55 = vpop.f32.mrf.mxu0 }
 0x17a   : > { %v8252_v20 = vadd.f32 %v6246_v13, %v6194_v55  ;;  %v6250_v44 = vpop.f32.mrf.mxu1  ;;  %v4025_v55 = vsel %vm3981_vm9, %v4015_v58, %v4024_v22  ;;  %v3650_v13 = vsel %vm3180_vm1, %v3647_v53, %v3649_v30  ;;  %v3651_v53 = vrot.slane %v8015_v46, 2 }
 0x17b   : > { %v1536_v3 = vpop.f32.mrf.mxu0  ;;  %v4042_v8 = vor.u32 %v4041_v25, %v4038_v41  ;;  %v4066_v46 = vshll.u32 %v8031_v15, 16 }
 0x17c   : > { %v8256_v10 = vadd.f32 %v1779_v26, %v1536_v3  ;;  %v1795_v5 = vpop.f32.mrf.mxu1  ;;  %v4034_v26 = vsel %vm3981_vm9, %v4024_v22, %v4033_v36  ;;  %v4050_v3 = vrot.slane %v4048_v33, 3  ;;  %v3653_v22 = vrot.slane %v8017_v27, 2  ;;  %v6814_v27 = vld [vmem:[%s9159_s4 + $0x220] sm:$0xff]  }
 0x17d   : > { %v6197_v4 = vpop.f32.mrf.mxu0  ;;  %6496 = vmatmul.mubr.bf16.vlgmr.msra.gmra.mxu0 %v3648_v60  ;;  %v4057_v33 = vshll.u32 %v8029_v28, 16  ;;  %v3652_v41 = vsel %vm3180_vm1, %v3649_v30, %v3651_v53  ;;  %v4043_v25 = vsel %vm3981_vm9, %v4033_v36, %v4042_v8  ;;  %v3655_v36 = vrot.slane %v8022_v1, 2 }
 0x17e   : > { %v8264_v29 = vadd.f32 %v6249_v63, %v6197_v4  ;;  %v6253_v2 = vpop.f32.mrf.mxu1  ;;  %6499 = vmatprep.mubr.bf16.mxu0 %v3650_v13  ;;  %6584 = vmatpush3.bf16.msra.mxu0 %v8183_v43  ;;  %v6812_v63 = vld [vmem:[%s9159_s4 + $0x228] sm:$0xff]   ;;  %v4051_v43 = vor.u32 %v4050_v3, %v4047_v7  ;;  %v3654_v7 = vsel %vm3180_vm1, %v3651_v53, %v3653_v22  ;;  %v4056_v3 = vrot.slane %v4054_v56, 2 }
 0x17f   : > { %6552 = vmatmul.mubr.bf16.gmra.mxu1 %v4025_v55  ;;  %v1549_v12 = vpop.f32.mrf.mxu0  ;;  %6585 = vmatprep.subr.bf16.mxu0 %v6810_v34  ;;  %v4084_v1 = vshll.u32 %v8039_v35, 16 }
 0x180   : > { %6555 = vmatprep.mubr.bf16.mxu1 %v4034_v26  ;;  %v8268_v60 = vadd.f32 %v1792_v16, %v1549_v12  ;;  %v1808_v58 = vpop.f32.mrf.mxu1  ;;  %v4063_v16 = vshrl.u32 %v8031_v15, 16  ;;  %v4052_v30 = vsel %vm3981_vm9, %v4042_v8, %v4051_v43  ;;  %v4072_v8 = vshrl.u32 %v8037_v45, 16 }
 0x181   : > { %v6198_v18 = vpop.f32.mrf.mxu0 }
 0x182   : > { %v8277_v4 = vadd.f32 %v6250_v44, %v6198_v18  ;;  %v6254_v12 = vpop.f32.mrf.mxu1  ;;  %6586 = vmatpush3.bf16.msra.mxu0 %v6810_v34  ;;  %v4059_v18 = vrot.slane %v4057_v33, 3  ;;  %v4065_v34 = vrot.slane %v4063_v16, 2  ;;  %v3657_v33 = vrot.slane %v8027_v52, 2  ;;  %v6817_v52 = vld [vmem:[%s9159_s4 + $0x210] sm:$0xff]  }
 0x183   : > { %v1552_v55 = vpop.f32.mrf.mxu0  ;;  %6587 = vmatprep.subr.bf16.mxu0 %v6812_v63  ;;  %v4075_v16 = vshll.u32 %v8037_v45, 16 }
 0x184   : > { %v8281_v13 = vadd.f32 %v1795_v5, %v1552_v55  ;;  %v1811_v26 = vpop.f32.mrf.mxu1  ;;  %v4068_v55 = vrot.slane %v4066_v46, 3  ;;  %v4060_v56 = vor.u32 %v4059_v18, %v4056_v3  ;;  %v3656_v3 = vsel %vm3180_vm1, %v3653_v22, %v3655_v36 }
 0x185   : > { %v6201_v44 = vpop.f32.mrf.mxu0  ;;  %6500 = vmatmul.mubr.bf16.gmra.mxu0 %v3652_v41 }
 0x186   : > { %v8289_v19 = vadd.f32 %v6253_v2, %v6201_v44  ;;  %v6257_v5 = vpop.f32.mrf.mxu1  ;;  %6503 = vmatprep.mubr.bf16.mxu0 %v3654_v7  ;;  %6588 = vmatpush3.bf16.msra.mxu0 %v6812_v63  ;;  %v6816_v2 = vld [vmem:[%s9159_s4 + $0x218] sm:$0xff]   ;;  %v4081_v63 = vshrl.u32 %v8039_v35, 16  ;;  %v4061_v18 = vsel %vm3981_vm9, %v4051_v43, %v4060_v56  ;;  %v3659_v43 = vrot.slane %v8029_v28, 2 }
 0x187   : > { %6556 = vmatmul.mubr.bf16.gmra.mxu1 %v4043_v25  ;;  %v1565_v17 = vpop.f32.mrf.mxu0  ;;  %6589 = vmatprep.subr.bf16.mxu0 %v6814_v27  ;;  %v4102_v28 = vshll.u32 %v8045_v48, 16 }
 0x188   : > { %6559 = vmatprep.mubr.bf16.mxu1 %v4052_v30  ;;  %v8292_v24 = vadd.f32 %v1808_v58, %v1565_v17  ;;  %v1824_v41 = vpop.f32.mrf.mxu1  ;;  %v4069_v58 = vor.u32 %v4068_v55, %v4065_v34  ;;  %v3658_v30 = vsel %vm3180_vm1, %v3655_v36, %v3657_v33  ;;  %v4074_v34 = vrot.slane %v4072_v8, 2 }
 0x189   : > { %v6202_v53 = vpop.f32.mrf.mxu0  ;;  %v4077_v55 = vrot.slane %v4075_v16, 3  ;;  %v3661_v16 = vrot.slane %v8031_v15, 2  ;;  %v6821_v15 = vld [vmem:[%s9159_s4 + $0x200] sm:$0xff]  }
 0x18a   : > { %v8301_v46 = vadd.f32 %v6254_v12, %v6202_v53  ;;  %v6258_v17 = vpop.f32.mrf.mxu1  ;;  %6590 = vmatpush3.bf16.msra.mxu0 %v6814_v27  ;;  %v4070_v22 = vsel %vm3981_vm9, %v4060_v56, %v4069_v58  ;;  %v4083_v27 = vrot.slane %v4081_v63, 2  ;;  %v4090_v56 = vshrl.u32 %v8043_v49, 16 }
 0x18b   : > { %v1568_v44 = vpop.f32.mrf.mxu0  ;;  %6591 = vmatprep.subr.bf16.mxu0 %v6816_v2  ;;  %v4078_v8 = vor.u32 %v4077_v55, %v4074_v34  ;;  %v4093_v63 = vshll.u32 %v8043_v49, 16  ;;  %v3660_v34 = vsel %vm3180_vm1, %v3657_v33, %v3659_v43 }
 0x18c   : > { %v8305_v25 = vadd.f32 %v1811_v26, %v1568_v44  ;;  %v1827_v7 = vpop.f32.mrf.mxu1  ;;  %v4086_v44 = vrot.slane %v4084_v1, 3 }
 0x18d   : > { %v6205_v12 = vpop.f32.mrf.mxu0  ;;  %6504 = vmatmul.mubr.bf16.gmra.mxu0 %v3656_v3  ;;  %v4079_v55 = vsel %vm3981_vm9, %v4069_v58, %v4078_v8  ;;  %v3663_v58 = vrot.slane %v8037_v45, 2 }
 0x18e   : > { %v8313_v53 = vadd.f32 %v6257_v5, %v6205_v12  ;;  %v6261_v26 = vpop.f32.mrf.mxu1  ;;  %6507 = vmatprep.mubr.bf16.mxu0 %v3658_v30  ;;  %6592 = vmatpush3.bf16.msra.mxu0 %v6816_v2  ;;  %v6819_v5 = vld [vmem:[%s9159_s4 + $0x208] sm:$0xff]   ;;  %v4099_v2 = vshrl.u32 %v8045_v48, 16 }
 0x18f   : > { %6560 = vmatmul.mubr.bf16.gmra.mxu1 %v4061_v18  ;;  %v1581_v42 = vpop.f32.mrf.mxu0  ;;  %6593 = vmatprep.subr.bf16.mxu0 %v6817_v52 }
 0x190   : > { %6563 = vmatprep.mubr.bf16.mxu1 %v4070_v22  ;;  %v8316_v21 = vadd.f32 %v1824_v41, %v1581_v42  ;;  %v1840_v3 = vpop.f32.mrf.mxu1  ;;  %v4087_v41 = vor.u32 %v4086_v44, %v4083_v27  ;;  %v3662_v22 = vsel %vm3180_vm1, %v3659_v43, %v3661_v16  ;;  %v4092_v27 = vrot.slane %v4090_v56, 2 }
 0x191   : > { %v6206_v36 = vpop.f32.mrf.mxu0  ;;  %v4095_v44 = vrot.slane %v4093_v63, 3  ;;  %v4108_v63 = vshrl.u32 %v8053_v23, 16 }
 0x192   : > { %v8325_v1 = vadd.f32 %v6258_v17, %v6206_v36  ;;  %v6262_v42 = vpop.f32.mrf.mxu1  ;;  %6594 = vmatpush3.bf16.msra.mxu0 %v6817_v52  ;;  %v4088_v33 = vsel %vm3981_vm9, %v4078_v8, %v4087_v41  ;;  %v4101_v52 = vrot.slane %v4099_v2, 2 }
 0x193   : > { %v1584_v12 = vpop.f32.mrf.mxu0  ;;  %6595 = vmatprep.subr.bf16.mxu0 %v6819_v5  ;;  %v4096_v56 = vor.u32 %v4095_v44, %v4092_v27  ;;  %v4110_v44 = vrot.slane %v4108_v63, 2 }
 0x194   : > { %v8329_v18 = vadd.f32 %v1827_v7, %v1584_v12  ;;  %v1843_v30 = vpop.f32.mrf.mxu1  ;;  %v4104_v12 = vrot.slane %v4102_v28, 3 }
 0x195   : > { %v6209_v17 = vpop.f32.mrf.mxu0  ;;  %6508 = vmatmul.mubr.bf16.gmra.mxu0 %v3660_v34  ;;  %v4097_v27 = vsel %vm3981_vm9, %v4087_v41, %v4096_v56  ;;  %v3667_v41 = vrot.slane %v8043_v49, 2 }
 0x196   : > { %9201 = vst [vmem:[#allocation3_spill] sm:$0xff] %v8329_v18  ;;  %v8337_v36 = vadd.f32 %v6261_v26, %v6209_v17  ;;  %v6265_v7 = vpop.f32.mrf.mxu1  ;;  %6511 = vmatprep.mubr.bf16.mxu0 %v3662_v22  ;;  %6596 = vmatpush3.bf16.msra.mxu0 %v6819_v5  ;;  %v3665_v26 = vrot.slane %v8039_v35, 2  ;;  %v4111_v17 = vshll.u32 %v8053_v23, 16  ;;  %v4105_v28 = vor.u32 %v4104_v12, %v4101_v52 }
 0x197   : > { %6564 = vmatmul.mubr.bf16.gmra.mxu1 %v4079_v55  ;;  %v1597_v40 = vpop.f32.mrf.mxu0  ;;  %6597 = vmatprep.subr.bf16.mxu0 %v6821_v15  ;;  %v4117_v5 = vshrl.u32 %v8061_v47, 16  ;;  %v3664_v22 = vsel %vm3180_vm1, %v3661_v16, %v3663_v58 }
 0x198   : > { %6567 = vmatprep.mubr.bf16.mxu1 %v4088_v33  ;;  %v8340_v18 = vadd.f32 %v1840_v3, %v1597_v40  ;;  %v1856_v34 = vpop.f32.mrf.mxu1  ;;  %v4120_v40 = vshll.u32 %v8061_v47, 16  ;;  %v4113_v33 = vrot.slane %v4111_v17, 3  ;;  %v4126_v17 = vshrl.u32 %v8063_v9, 16 }
 0x199   : > { %v6210_v43 = vpop.f32.mrf.mxu0 }
 0x19a   : > { %v8346_v8 = vadd.f32 %v6262_v42, %v6210_v43  ;;  %v6266_v2 = vpop.f32.mrf.mxu1  ;;  %6598 = vmatpush3.bf16.msra.mxu0 %v6821_v15  ;;  %v3666_v42 = vsel %vm3180_vm1, %v3663_v58, %v3665_v26  ;;  %v4106_v15 = vsel %vm3981_vm9, %v4096_v56, %v4105_v28  ;;  %v4122_v43 = vrot.slane %v4120_v40, 3 }
 0x19b   : > { %v1600_v3 = vpop.f32.mrf.mxu0  ;;  %v4114_v63 = vor.u32 %v4113_v33, %v4110_v44  ;;  %v4135_v40 = vshrl.u32 %v8065_v61, 16  ;;  %v3668_v44 = vsel %vm3180_vm1, %v3665_v26, %v3667_v41 }
 0x19c   : > { %v8350_v45 = vadd.f32 %v1843_v30, %v1600_v3  ;;  %v1859_v55 = vpop.f32.mrf.mxu1  ;;  %v4119_v30 = vrot.slane %v4117_v5, 2 }
 0x19d   : > { %v6213_v35 = vpop.f32.mrf.mxu0  ;;  %6512 = vmatmul.mubr.bf16.gmra.mxu0 %v3664_v22  ;;  %v4115_v33 = vsel %vm3981_vm9, %v4105_v28, %v4114_v63  ;;  %v3671_v28 = vrot.slane %v8053_v23, 2 }
 0x19e   : > { %v8355_v52 = vadd.f32 %v6265_v7, %v6213_v35  ;;  %v6269_v12 = vpop.f32.mrf.mxu1  ;;  %6515 = vmatprep.mubr.bf16.mxu0 %v3666_v42  ;;  %v3669_v7 = vrot.slane %v8045_v48, 2  ;;  %v4129_v35 = vshll.u32 %v8063_v9, 16  ;;  %v4123_v5 = vor.u32 %v4122_v43, %v4119_v30 }
 0x19f   : > { %6568 = vmatmul.mubr.bf16.gmra.mxu1 %v4097_v27  ;;  %v1613_v3 = vpop.f32.mrf.mxu0 }
 0x1a0   : > { %6571 = vmatprep.mubr.bf16.mxu1 %v4106_v15  ;;  %v8358_v16 = vadd.f32 %v1856_v34, %v1613_v3  ;;  %v8360_v22 = vpop.f32.mrf.mxu1  ;;  %v4138_v34 = vshll.u32 %v8065_v61, 16  ;;  %v4128_v3 = vrot.slane %v4126_v17, 2  ;;  %v3673_v17 = vrot.slane %v8061_v47, 2 }
 0x1a1   : > { %9202 = vst [vmem:[#allocation6_spill] sm:$0xff] %v8360_v22  ;;  %v6214_v58 = vpop.f32.mrf.mxu0 }
 0x1a2   : > { %v8366_v27 = vadd.f32 %v6266_v2, %v6214_v58  ;;  %v6270_v56 = vpop.f32.mrf.mxu1  ;;  %v3670_v2 = vsel %vm3180_vm1, %v3667_v41, %v3669_v7  ;;  %v4131_v58 = vrot.slane %v4129_v35, 3  ;;  %v4140_v22 = vrot.slane %v4138_v34, 3 }
 0x1a3   : > { %v1616_v42 = vpop.f32.mrf.mxu0  ;;  %v4147_v35 = vshll.u32 %v8077_v59, 16  ;;  %v3674_v47 = vsel %vm3180_vm1, %v3671_v28, %v3673_v17 }
 0x1a4   : > { %v8370_v15 = vadd.f32 %v1859_v55, %v1616_v42  ;;  %v8372_v49 = vpop.f32.mrf.mxu1  ;;  %v4124_v55 = vsel %vm3981_vm9, %v4114_v63, %v4123_v5  ;;  %v4137_v42 = vrot.slane %v4135_v40, 2  ;;  %v4132_v41 = vor.u32 %v4131_v58, %v4128_v3 }
 0x1a5   : > { %9203 = vst [vmem:[#allocation4_spill] sm:$0xff] %v8372_v49  ;;  %v6217_v48 = vpop.f32.mrf.mxu0  ;;  %6516 = vmatmul.mubr.bf16.gmra.mxu0 %v3668_v44  ;;  %v4149_v58 = vrot.slane %v4147_v35, 3  ;;  %v3677_v35 = vrot.slane %v8065_v61, 2 }
 0x1a6   : > { %v8377_v30 = vadd.f32 %v6269_v12, %v6217_v48  ;;  %v6341_v43 = vpop.f32.mrf.mxu1  ;;  %6519 = vmatprep.mubr.bf16.mxu0 %v3670_v2  ;;  %v4144_v12 = vshrl.u32 %v8077_v59, 16  ;;  %v4141_v40 = vor.u32 %v4140_v22, %v4137_v42  ;;  %v3672_v2 = vsel %vm3180_vm1, %v3669_v7, %v3671_v28 }
 0x1a7   : > { %6572 = vmatmul.mubr.bf16.gmra.mxu1 %v4115_v33  ;;  %v8380_v49 = vpop.f32.mrf.mxu0  ;;  %v4133_v23 = vsel %vm3981_vm9, %v4123_v5, %v4132_v41 }
 0x1a8   : > { %6575 = vmatprep.mubr.bf16.mxu1 %v4124_v55  ;;  %v8382_v26 = vpop.f32.mrf.mxu1  ;;  %v4146_v3 = vrot.slane %v4144_v12, 2  ;;  %v4142_v22 = vsel %vm3981_vm9, %v4132_v41, %v4141_v40 }
 0x1a9   : > { %v6218_v44 = vpop.f32.mrf.mxu0 }
 0x1aa   : > { %v8388_v48 = vadd.f32 %v6270_v56, %v6218_v44  ;;  %v6342_v63 = vpop.f32.mrf.mxu1  ;;  %v4150_v12 = vor.u32 %v4149_v58, %v4146_v3 }
 0x1ab   : > { %v8390_v34 = vpop.f32.mrf.mxu0 }
 0x1ac   : > { %v8392_v33 = vpop.f32.mrf.mxu1 }
 0x1ad   : > { %9204 = vst [vmem:[#allocation5_spill] sm:$0xff] %v8392_v33  ;;  %v6289_v55 = vpop.f32.mrf.mxu0  ;;  %6520 = vmatmul.mubr.bf16.gmra.mxu0 %v3672_v2  ;;  %v3675_v2 = vrot.slane %v8063_v9, 2 }
 0x1ae   : > { %v2191_v59 = vadd.f32 %v6289_v55, %v8204_v57  ;;  %v6345_v56 = vpop.f32.mrf.mxu1  ;;  %6523 = vmatprep.mubr.bf16.mxu0 %v3674_v47 }
 0x1af   : > { %6576 = vmatmul.mubr.bf16.gmra.mxu1 %v4133_v23  ;;  %v2046_v42 = vpop.f32.mrf.mxu0  ;;  %v3678_v61 = vsel %vm3180_vm1, %v3675_v2, %v3677_v35 }
 0x1b0   : > { %6579 = vmatprep.mubr.bf16.mxu1 %v4142_v22  ;;  %v8400_v44 = vadd.f32 %v2046_v42, %v8209_v11  ;;  %v2525_v7 = vpop.f32.mrf.mxu1  ;;  %v8403_v5 = vadd.f32 %v6341_v43, %v2191_v59  ;;  %v3676_v11 = vsel %vm3180_vm1, %v3673_v17, %v3675_v2  ;;  %v6818_v22 = vld [vmem:[#allocation2 + $0xa0] ss:$0 sps:$4 sm:$0x33]   ;;  %v4431_v42 = vld [vmem:[#allocation2 + $0x10] sm:$0x8]  ;;  %v4151_v43 = vsel %vm3981_vm9, %v4141_v40, %v4150_v12 }
 0x1b1   : > { %v6290_v28 = vpop.f32.mrf.mxu0  ;;  %v5581_v58 = vcombine.low %v4431_v42, %v8191_v39 }
 0x1b2   : > { %v2192_v57 = vadd.f32 %v6290_v28, %v8214_v62  ;;  %v6346_v55 = vpop.f32.mrf.mxu1  ;;  %v3679_v28 = vrot.slane %v6818_v22, 2 }
 0x1b3   : > { %v2049_v23 = vpop.f32.mrf.mxu0 }
 0x1b4   : > { %v8408_v41 = vadd.f32 %v2049_v23, %v8218_v14  ;;  %v2528_v47 = vpop.f32.mrf.mxu1  ;;  %v8411_v33 = vadd.f32 %v6342_v63, %v2192_v57 }
 0x1b5   : > { %v6293_v9 = vpop.f32.mrf.mxu0  ;;  %6524 = vmatmul.mubr.bf16.gmra.mxu0 %v3676_v11 }
 0x1b6   : > { %v2195_v62 = vadd.f32 %v6293_v9, %v8224_v51  ;;  %v6349_v3 = vpop.f32.mrf.mxu1  ;;  %6527 = vmatprep.mubr.bf16.mxu0 %v3678_v61  ;;  %v4453_v51 = vrot.slane %v5581_v58, 3 }
 0x1b7   : > { %6580 = vmatmul.mubr.bf16.gmra.mxu1 %v4151_v43  ;;  %v2062_v14 = vpop.f32.mrf.mxu0  ;;  %v3680_v43 = vsel %vm3180_vm1, %v3677_v35, %v3679_v28 }
 0x1b8   : > { %v2193_v17 = vadd.f32 %v2062_v14, %v8228_v6  ;;  %v2541_v59 = vpop.f32.mrf.mxu1  ;;  %v8418_v63 = vadd.f32 %v6345_v56, %v2195_v62  ;;  %v9205_v56 = vrot.slane %v8006_v37, 3 }
 0x1b9   : > { %v6294_v57 = vpop.f32.mrf.mxu0 }
 0x1ba   : > { %v2196_v23 = vadd.f32 %v6294_v57, %v8233_v54  ;;  %v6350_v40 = vpop.f32.mrf.mxu1  ;;  %v8421_v12 = vadd.f32 %v2525_v7, %v2193_v17  ;;  %v4455_v22 = vsel %vm4452_vm6, %v4453_v51, %v9205_v56 }
 0x1bb   : > { %v2065_v2 = vpop.f32.mrf.mxu0 }
 0x1bc   : > { %v2194_v11 = vadd.f32 %v2065_v2, %v8238_v31  ;;  %v2544_v9 = vpop.f32.mrf.mxu1  ;;  %v8425_v39 = vadd.f32 %v6346_v55, %v2196_v23 }
 0x1bd   : > { %v6297_v6 = vpop.f32.mrf.mxu0  ;;  %6528 = vmatmul.mubr.bf16.gmra.mxu0 %v3680_v43 }
 0x1be   : > { %v2199_v54 = vadd.f32 %v6297_v6, %v8243_v38  ;;  %v6353_v42 = vpop.f32.mrf.mxu1  ;;  %6599 = vmatprep.mubr.bf16.mxu0 %v4455_v22  ;;  %v8431_v7 = vadd.f32 %v2528_v47, %v2194_v11 }
 0x1bf   : > { %v2078_v61 = vpop.f32.mrf.mxu0 }
 0x1c0   : > { %v2197_v31 = vadd.f32 %v2078_v61, %v8246_v0  ;;  %v2557_v62 = vpop.f32.mrf.mxu1  ;;  %v8434_v14 = vadd.f32 %v6349_v3, %v2199_v54  ;;  %v9207_v54 = vld [vmem:[#allocation9_spill] sm:$0xff] }
 0x1c1   : > { %v6298_v35 = vpop.f32.mrf.mxu0 }
 0x1c2   : > { %v2200_v55 = vadd.f32 %v6298_v35, %v8252_v20  ;;  %v6354_v58 = vpop.f32.mrf.mxu1  ;;  %v8437_v17 = vadd.f32 %v2541_v59, %v2197_v31 }
 0x1c3   : > { %v2081_v37 = vpop.f32.mrf.mxu0 }
 0x1c4   : > { %v2198_v28 = vadd.f32 %v2081_v37, %v8256_v10  ;;  %v2560_v38 = vpop.f32.mrf.mxu1  ;;  %v8440_v57 = vadd.f32 %v6350_v40, %v2200_v55 }
 0x1c5   : > { %v6301_v47 = vpop.f32.mrf.mxu0  ;;  %6600 = vmatmul.mubr.bf16.vlgmr.msra.gmra.mxu0 %v8058_v32 }
 0x1c6   : > { %v2203_v0 = vadd.f32 %v6301_v47, %v8264_v29  ;;  %6603 = vmatprep.mubr.bf16.mxu0 %v8068_v50  ;;  %v8445_v3 = vadd.f32 %v2544_v9, %v2198_v28  ;;  %v9206_v9 = vld [vmem:[#allocation8_spill] sm:$0xff] }
 0x1c7   : > { %v6357_v23 = vpop.f32.mrf.mxu1  ;;  %v2094_v20 = vpop.f32.mrf.mxu0 }
 0x1c8   : > { %v2201_v59 = vadd.f32 %v2094_v20, %v8268_v60  ;;  %v8448_v51 = vadd.f32 %v6353_v42, %v2203_v0  ;;  %v9208_v0 = vld [vmem:[#allocation10_spill] sm:$0xff] }
 0x1c9   : > { %v2573_v2 = vpop.f32.mrf.mxu1  ;;  %v6302_v10 = vpop.f32.mrf.mxu0 }
 0x1ca   : > { %v2204_v40 = vadd.f32 %v6302_v10, %v8277_v4  ;;  %v8451_v43 = vadd.f32 %v2557_v62, %v2201_v59 }
 0x1cb   : > { %v6358_v11 = vpop.f32.mrf.mxu1  ;;  %v2097_v32 = vpop.f32.mrf.mxu0 }
 0x1cc   : > { %v2202_v29 = vadd.f32 %v2097_v32, %v8281_v13  ;;  %v8454_v56 = vadd.f32 %v6354_v58, %v2204_v40 }
 0x1cd   : > { %v2576_v6 = vpop.f32.mrf.mxu1  ;;  %v6305_v50 = vpop.f32.mrf.mxu0  ;;  %6604 = vmatmul.mubr.bf16.gmra.mxu0 %v9206_v9  ;;  %v9210_v9 = vld [vmem:[#allocation3_spill] sm:$0xff] }
 0x1ce   : > { %v2207_v60 = vadd.f32 %v6305_v50, %v8289_v19  ;;  %6607 = vmatprep.mubr.bf16.mxu0 %v9207_v54  ;;  %v8459_v42 = vadd.f32 %v2560_v38, %v2202_v29 }
 0x1cf   : > { %v6361_v22 = vpop.f32.mrf.mxu1  ;;  %v2110_v4 = vpop.f32.mrf.mxu0 }
 0x1d0   : > { %v2205_v61 = vadd.f32 %v2110_v4, %v8292_v24  ;;  %v8462_v62 = vadd.f32 %v6357_v23, %v2207_v60  ;;  %v9209_v23 = vld [vmem:[#allocation11_spill] sm:$0xff]  ;;  %v9211_v4 = vld [vmem:[#allocation12_spill] sm:$0xff] }
 0x1d1   : > { %v2589_v31 = vpop.f32.mrf.mxu1  ;;  %v6306_v13 = vpop.f32.mrf.mxu0 }
 0x1d2   : > { %v2208_v35 = vadd.f32 %v6306_v13, %v8301_v46  ;;  %v8465_v58 = vadd.f32 %v2573_v2, %v2205_v61 }
 0x1d3   : > { %v6362_v55 = vpop.f32.mrf.mxu1  ;;  %v2113_v37 = vpop.f32.mrf.mxu0 }
 0x1d4   : > { %v2206_v19 = vadd.f32 %v2113_v37, %v8305_v25  ;;  %v8468_v47 = vadd.f32 %v6358_v11, %v2208_v35 }
 0x1d5   : > { %v2592_v28 = vpop.f32.mrf.mxu1  ;;  %v6309_v38 = vpop.f32.mrf.mxu0  ;;  %6608 = vmatmul.mubr.bf16.gmra.mxu0 %v9208_v0 }
 0x1d6   : > { %v2211_v24 = vadd.f32 %v6309_v38, %v8313_v53  ;;  %6611 = vmatprep.mubr.bf16.mxu0 %v9209_v23  ;;  %v8473_v59 = vadd.f32 %v2576_v6, %v2206_v19 }
 0x1d7   : > { %v6365_v20 = vpop.f32.mrf.mxu1  ;;  %v2126_v46 = vpop.f32.mrf.mxu0 }
 0x1d8   : > { %v2209_v2 = vadd.f32 %v2126_v46, %v8316_v21  ;;  %v8476_v40 = vadd.f32 %v6361_v22, %v2211_v24  ;;  %v9212_v22 = vld [vmem:[#allocation13_spill] sm:$0xff] }
 0x1d9   : > { %v2605_v10 = vpop.f32.mrf.mxu1  ;;  %v6310_v25 = vpop.f32.mrf.mxu0 }
 0x1da   : > { %v2212_v11 = vadd.f32 %v6310_v25, %v8325_v1  ;;  %v8479_v29 = vadd.f32 %v2589_v31, %v2209_v2  ;;  %v9213_v2 = vld [vmem:[#allocation14_spill] sm:$0xff] }
 0x1db   : > { %v6366_v32 = vpop.f32.mrf.mxu1  ;;  %v2129_v50 = vpop.f32.mrf.mxu0 }
 0x1dc   : > { %v2210_v53 = vadd.f32 %v2129_v50, %v9210_v9  ;;  %v8482_v54 = vadd.f32 %v6362_v55, %v2212_v11 }
 0x1dd   : > { %v2608_v60 = vpop.f32.mrf.mxu1  ;;  %v6313_v6 = vpop.f32.mrf.mxu0  ;;  %6612 = vmatmul.mubr.bf16.gmra.mxu0 %v9211_v4 }
 0x1de   : > { %v2215_v21 = vadd.f32 %v6313_v6, %v8337_v36  ;;  %6615 = vmatprep.mubr.bf16.mxu0 %v9212_v22  ;;  %v8487_v13 = vadd.f32 %v2592_v28, %v2210_v53 }
 0x1df   : > { %v6369_v61 = vpop.f32.mrf.mxu1  ;;  %v2142_v1 = vpop.f32.mrf.mxu0 }
 0x1e0   : > { %v2213_v31 = vadd.f32 %v2142_v1, %v8340_v18  ;;  %v8490_v37 = vadd.f32 %v6365_v20, %v2215_v21  ;;  %v9214_v20 = vld [vmem:[#allocation15_spill] sm:$0xff]  ;;  %v9215_v1 = vld [vmem:[#allocation16_spill] sm:$0xff] }
 0x1e1   : > { %v2621_v35 = vpop.f32.mrf.mxu1  ;;  %v6314_v19 = vpop.f32.mrf.mxu0 }
 0x1e2   : > { %v2216_v55 = vadd.f32 %v6314_v19, %v8346_v8  ;;  %v8493_v0 = vadd.f32 %v2605_v10, %v2213_v31 }
 0x1e3   : > { %v6370_v38 = vpop.f32.mrf.mxu1  ;;  %v2145_v24 = vpop.f32.mrf.mxu0 }
 0x1e4   : > { %v2214_v36 = vadd.f32 %v2145_v24, %v8350_v45  ;;  %v8496_v46 = vadd.f32 %v6366_v32, %v2216_v55  ;;  %v9217_v55 = vld [vmem:[#allocation17_spill] sm:$0xff] }
 0x1e5   : > { %v2624_v23 = vpop.f32.mrf.mxu1  ;;  %v6317_v28 = vpop.f32.mrf.mxu0  ;;  %6616 = vmatmul.mubr.bf16.gmra.mxu0 %v9213_v2 }
 0x1e6   : > { %v2219_v18 = vadd.f32 %v6317_v28, %v8355_v52  ;;  %6619 = vmatprep.mubr.bf16.mxu0 %v9214_v20  ;;  %v8501_v11 = vadd.f32 %v2608_v60, %v2214_v36  ;;  %v9218_v28 = vld [vmem:[#allocation4_spill] sm:$0xff] }
 0x1e7   : > { %v6373_v25 = vpop.f32.mrf.mxu1  ;;  %v2158_v8 = vpop.f32.mrf.mxu0  ;;  %v1876_v2 = vadd.f32 %v9218_v28, %v8390_v34  ;;  %v2652_v34 = vadd.f32 %v8382_v26, %v8400_v44 }
 0x1e8   : > { %v2217_v10 = vadd.f32 %v2158_v8, %v8358_v16  ;;  %v8504_v9 = vadd.f32 %v6369_v61, %v2219_v18  ;;  %v9216_v16 = vld [vmem:[#allocation6_spill] sm:$0xff] }
 0x1e9   : > { %v2637_v50 = vpop.f32.mrf.mxu1  ;;  %v6318_v45 = vpop.f32.mrf.mxu0  ;;  %v1873_v31 = vadd.f32 %v9216_v16, %v8380_v49 }
 0x1ea   : > { %v2220_v32 = vadd.f32 %v6318_v45, %v8366_v27  ;;  %v8507_v6 = vadd.f32 %v2621_v35, %v2217_v10 }
 0x1eb   : > { %v6374_v53 = vpop.f32.mrf.mxu1  ;;  %v2161_v4 = vpop.f32.mrf.mxu0 }
 0x1ec   : > { %v2218_v52 = vadd.f32 %v2161_v4, %v8370_v15  ;;  %v8510_v22 = vadd.f32 %v6370_v38, %v2220_v32  ;;  %v9219_v32 = vld [vmem:[#allocation18_spill] sm:$0xff] }
 0x1ed   : > { %v2640_v21 = vpop.f32.mrf.mxu1  ;;  %v6321_v60 = vpop.f32.mrf.mxu0  ;;  %6620 = vmatmul.mubr.bf16.gmra.mxu0 %v9215_v1 }
 0x1ee   : > { %v2223_v61 = vadd.f32 %v6321_v60, %v8377_v30  ;;  %6623 = vmatprep.mubr.bf16.mxu0 %v9217_v55  ;;  %v8517_v27 = vadd.f32 %v2624_v23, %v2218_v52  ;;  %v9220_v52 = vld [vmem:[#allocation19_spill] sm:$0xff]  ;;  %v9221_v55 = vld [vmem:[#allocation5_spill] sm:$0xff] }
 0x1ef   : > { %v6445_v19 = vpop.f32.mrf.mxu1  ;;  %v2174_v35 = vpop.f32.mrf.mxu0 }
 0x1f0   : > { %v2221_v24 = vadd.f32 %v2174_v35, %v1873_v31  ;;  %v8519_v15 = vadd.f32 %v6373_v25, %v2223_v61 }
 0x1f1   : > { %v3318_v36 = vpop.f32.mrf.mxu1  ;;  %v6322_v38 = vpop.f32.mrf.mxu0 }
 0x1f2   : > { %v2224_v18 = vadd.f32 %v6322_v38, %v8388_v48  ;;  %v8524_v49 = vadd.f32 %v2637_v50, %v2221_v24 }
 0x1f3   : > { %v6446_v20 = vpop.f32.mrf.mxu1  ;;  %v2177_v30 = vpop.f32.mrf.mxu0 }
 0x1f4   : > { %v2222_v8 = vadd.f32 %v2177_v30, %v1876_v2  ;;  %v8526_v45 = vadd.f32 %v6374_v53, %v2224_v18  ;;  %v9223_v18 = vld [vmem:[#allocation21_spill] sm:$0xff] }
 0x1f5   : > { %v3321_v10 = vpop.f32.mrf.mxu1  ;;  %v6393_v23 = vpop.f32.mrf.mxu0  ;;  %6624 = vmatmul.mubr.bf16.gmra.mxu0 %v9219_v32 }
 0x1f6   : > { %v3125_v25 = vadd.f32 %v6393_v23, %v8403_v5  ;;  %6627 = vmatprep.mubr.bf16.mxu0 %v9220_v52  ;;  %v8533_v48 = vadd.f32 %v2640_v21, %v2222_v8  ;;  %v2653_v5 = vadd.f32 %v9221_v55, %v8408_v41  ;;  %v9222_v21 = vld [vmem:[#allocation20_spill] sm:$0xff] }
 0x1f7   : > { %v6449_v4 = vpop.f32.mrf.mxu1  ;;  %v2980_v50 = vpop.f32.mrf.mxu0 }
 0x1f8   : > { %v3123_v60 = vadd.f32 %v2980_v50, %v2652_v34  ;;  %v8535_v16 = vadd.f32 %v6445_v19, %v3125_v25 }
 0x1f9   : > { %v3334_v1 = vpop.f32.mrf.mxu1  ;;  %v6394_v53 = vpop.f32.mrf.mxu0 }
 0x1fa   : > { %v3126_v31 = vadd.f32 %v6394_v53, %v8411_v33  ;;  %v8540_v35 = vadd.f32 %v3318_v36, %v3123_v60  ;;  %v9224_v60 = vld [vmem:[#allocation22_spill] sm:$0xff] }
 0x1fb   : > { %v6450_v61 = vpop.f32.mrf.mxu1  ;;  %v2983_v24 = vpop.f32.mrf.mxu0 }
 0x1fc   : > { %v3124_v38 = vadd.f32 %v2983_v24, %v2653_v5  ;;  %v8542_v26 = vadd.f32 %v6446_v20, %v3126_v31 }
 0x1fd   : > { %v3337_v28 = vpop.f32.mrf.mxu1  ;;  %v6397_v44 = vpop.f32.mrf.mxu0  ;;  %6628 = vmatmul.mubr.bf16.gmra.mxu0 %v9222_v21 }
 0x1fe   : > { %v3129_v19 = vadd.f32 %v6397_v44, %v8418_v63  ;;  %6631 = vmatprep.mubr.bf16.mxu0 %v9223_v18  ;;  %v8547_v33 = vadd.f32 %v3321_v10, %v3124_v38 }
 0x1ff   : > { %v6453_v2 = vpop.f32.mrf.mxu1  ;;  %v2996_v30 = vpop.f32.mrf.mxu0 }
 0x200   : > { %v3127_v41 = vadd.f32 %v2996_v30, %v8421_v12  ;;  %v8550_v8 = vadd.f32 %v6449_v4, %v3129_v19 }
 0x201   : > { %v3350_v36 = vpop.f32.mrf.mxu1  ;;  %v6398_v23 = vpop.f32.mrf.mxu0 }
 0x202   : > { %v3130_v20 = vadd.f32 %v6398_v23, %v8425_v39  ;;  %v8553_v25 = vadd.f32 %v3334_v1, %v3127_v41 }
 0x203   : > { %v6454_v32 = vpop.f32.mrf.mxu1  ;;  %v2999_v52 = vpop.f32.mrf.mxu0 }
 0x204   : > { %v3128_v63 = vadd.f32 %v2999_v52, %v8431_v7  ;;  %v8556_v50 = vadd.f32 %v6450_v61, %v3130_v20 }
 0x205   : > { %v3353_v34 = vpop.f32.mrf.mxu1  ;;  %v6401_v10 = vpop.f32.mrf.mxu0  ;;  %6632 = vmatmul.mubr.bf16.gmra.mxu0 %v9224_v60 }
 0x206   : > { %v3133_v12 = vadd.f32 %v6401_v10, %v8434_v14  ;;  %v8560_v4 = vadd.f32 %v3337_v28, %v3128_v63 }
 0x207   : > { %v6457_v53 = vpop.f32.mrf.mxu1  ;;  %v3012_v31 = vpop.f32.mrf.mxu0 }
 0x208   : > { %v3131_v39 = vadd.f32 %v3012_v31, %v8437_v17  ;;  %v8563_v1 = vadd.f32 %v6453_v2, %v3133_v12 }
 0x209   : > { %v3366_v55 = vpop.f32.mrf.mxu1  ;;  %v6402_v5 = vpop.f32.mrf.mxu0 }
 0x20a   : > { %v3134_v7 = vadd.f32 %v6402_v5, %v8440_v57  ;;  %v8566_v61 = vadd.f32 %v3350_v36, %v3131_v39 }
 0x20b   : > { %v6458_v24 = vpop.f32.mrf.mxu1  ;;  %v3015_v38 = vpop.f32.mrf.mxu0 }
 0x20c   : > { %v3132_v44 = vadd.f32 %v3015_v38, %v8445_v3  ;;  %v8569_v14 = vadd.f32 %v6454_v32, %v3134_v7 }
 0x20d   : > { %v3369_v21 = vpop.f32.mrf.mxu1  ;;  %v6405_v28 = vpop.f32.mrf.mxu0 }
 0x20e   : > { %v3137_v19 = vadd.f32 %v6405_v28, %v8448_v51  ;;  %v8572_v17 = vadd.f32 %v3353_v34, %v3132_v44 }
 0x20f   : > { %v6461_v18 = vpop.f32.mrf.mxu1  ;;  %v3028_v2 = vpop.f32.mrf.mxu0 }
 0x210   : > { %v3135_v30 = vadd.f32 %v3028_v2, %v8451_v43  ;;  %v8575_v57 = vadd.f32 %v6457_v53, %v3137_v19 }
 0x211   : > { %v3382_v41 = vpop.f32.mrf.mxu1  ;;  %v6406_v36 = vpop.f32.mrf.mxu0 }
 0x212   : > { %v3138_v23 = vadd.f32 %v6406_v36, %v8454_v56  ;;  %v8578_v3 = vadd.f32 %v3366_v55, %v3135_v30 }
 0x213   : > { %v6462_v20 = vpop.f32.mrf.mxu1  ;;  %v3031_v32 = vpop.f32.mrf.mxu0 }
 0x214   : > { %v3136_v52 = vadd.f32 %v3031_v32, %v8459_v42  ;;  %v8581_v51 = vadd.f32 %v6458_v24, %v3138_v23 }
 0x215   : > { %v3385_v63 = vpop.f32.mrf.mxu1  ;;  %v6409_v34 = vpop.f32.mrf.mxu0 }
 0x216   : > { %v3141_v10 = vadd.f32 %v6409_v34, %v8462_v62  ;;  %v8584_v43 = vadd.f32 %v3369_v21, %v3136_v52 }
 0x217   : > { %v6465_v60 = vpop.f32.mrf.mxu1  ;;  %v3044_v12 = vpop.f32.mrf.mxu0 }
 0x218   : > { %v3139_v53 = vadd.f32 %v3044_v12, %v8465_v58  ;;  %v8587_v56 = vadd.f32 %v6461_v18, %v3141_v10 }
 0x219   : > { %v3398_v31 = vpop.f32.mrf.mxu1  ;;  %v6410_v39 = vpop.f32.mrf.mxu0 }
 0x21a   : > { %v3142_v55 = vadd.f32 %v6410_v39, %v8468_v47  ;;  %v8590_v42 = vadd.f32 %v3382_v41, %v3139_v53 }
 0x21b   : > { %v6466_v5 = vpop.f32.mrf.mxu1  ;;  %v3047_v7 = vpop.f32.mrf.mxu0 }
 0x21c   : > { %v3140_v24 = vadd.f32 %v3047_v7, %v8473_v59  ;;  %v8593_v62 = vadd.f32 %v6462_v20, %v3142_v55 }
 0x21d   : > { %v3401_v38 = vpop.f32.mrf.mxu1  ;;  %v6413_v44 = vpop.f32.mrf.mxu0 }
 0x21e   : > { %v3145_v21 = vadd.f32 %v6413_v44, %v8476_v40  ;;  %v8596_v58 = vadd.f32 %v3385_v63, %v3140_v24 }
 0x21f   : > { %v6469_v28 = vpop.f32.mrf.mxu1  ;;  %v3060_v19 = vpop.f32.mrf.mxu0 }
 0x220   : > { %v3143_v18 = vadd.f32 %v3060_v19, %v8479_v29  ;;  %v8599_v47 = vadd.f32 %v6465_v60, %v3145_v21 }
 0x221   : > { %v3414_v2 = vpop.f32.mrf.mxu1  ;;  %v6414_v30 = vpop.f32.mrf.mxu0 }
 0x222   : > { %v3146_v41 = vadd.f32 %v6414_v30, %v8482_v54  ;;  %v8602_v59 = vadd.f32 %v3398_v31, %v3143_v18 }
 0x223   : > { %v6470_v36 = vpop.f32.mrf.mxu1  ;;  %v3063_v23 = vpop.f32.mrf.mxu0 }
 0x224   : > { %v3144_v20 = vadd.f32 %v3063_v23, %v8487_v13  ;;  %v8605_v40 = vadd.f32 %v6466_v5, %v3146_v41 }
 0x225   : > { %v3417_v32 = vpop.f32.mrf.mxu1  ;;  %v6417_v52 = vpop.f32.mrf.mxu0 }
 0x226   : > { %v3149_v63 = vadd.f32 %v6417_v52, %v8490_v37  ;;  %v8608_v29 = vadd.f32 %v3401_v38, %v3144_v20 }
 0x227   : > { %v6473_v34 = vpop.f32.mrf.mxu1  ;;  %v3076_v10 = vpop.f32.mrf.mxu0 }
 0x228   : > { %v3147_v60 = vadd.f32 %v3076_v10, %v8493_v0  ;;  %v8611_v54 = vadd.f32 %v6469_v28, %v3149_v63 }
 0x229   : > { %v3430_v12 = vpop.f32.mrf.mxu1  ;;  %v6418_v53 = vpop.f32.mrf.mxu0 }
 0x22a   : > { %v3150_v31 = vadd.f32 %v6418_v53, %v8496_v46  ;;  %v8614_v13 = vadd.f32 %v3414_v2, %v3147_v60 }
 0x22b   : > { %v6474_v39 = vpop.f32.mrf.mxu1  ;;  %v3079_v55 = vpop.f32.mrf.mxu0 }
 0x22c   : > { %v3148_v5 = vadd.f32 %v3079_v55, %v8501_v11  ;;  %v8617_v37 = vadd.f32 %v6470_v36, %v3150_v31 }
 0x22d   : > { %v3433_v7 = vpop.f32.mrf.mxu1  ;;  %v6421_v24 = vpop.f32.mrf.mxu0 }
 0x22e   : > { %v3153_v38 = vadd.f32 %v6421_v24, %v8504_v9  ;;  %v8620_v0 = vadd.f32 %v3417_v32, %v3148_v5 }
 0x22f   : > { %v6477_v44 = vpop.f32.mrf.mxu1  ;;  %v3092_v21 = vpop.f32.mrf.mxu0 }
 0x230   : > { %v3151_v28 = vadd.f32 %v3092_v21, %v8507_v6  ;;  %v8623_v19 = vadd.f32 %v6473_v34, %v3153_v38 }
 0x231   : > { %v3446_v46 = vpop.f32.mrf.mxu1  ;;  %v6422_v18 = vpop.f32.mrf.mxu0 }
 0x232   : > { %v3154_v2 = vadd.f32 %v6422_v18, %v8510_v22  ;;  %v8626_v30 = vadd.f32 %v3430_v12, %v3151_v28 }
 0x233   : > { %v3095_v11 = vpop.f32.mrf.mxu0  ;;  %v6478_v9 = vpop.f32.mrf.mxu1 }
 0x234   : > { %v3152_v41 = vadd.f32 %v3095_v11, %v8517_v27  ;;  %v8629_v36 = vadd.f32 %v6474_v39, %v3154_v2 }
 0x235   : > { %v6425_v23 = vpop.f32.mrf.mxu0  ;;  %v3449_v34 = vpop.f32.mrf.mxu1 }
 0x236   : > { %v3157_v20 = vadd.f32 %v6425_v23, %v8519_v15  ;;  %v8632_v32 = vadd.f32 %v3433_v7, %v3152_v41 }
 0x237   : > { %v3108_v6 = vpop.f32.mrf.mxu0  ;;  %v8643_v31 = vpop.f32.mrf.mxu1 }
 0x238   : > { %v3155_v52 = vadd.f32 %v3108_v6, %v8524_v49  ;;  %v8635_v63 = vadd.f32 %v6477_v44, %v3157_v20 }
 0x239   : > { %v6426_v22 = vpop.f32.mrf.mxu0 }
 0x23a   : > { %v3158_v10 = vadd.f32 %v6426_v22, %v8526_v45  ;;  %v8638_v60 = vadd.f32 %v3446_v46, %v3155_v52  ;;  %v8653_v45 = vpop.f32.mrf.mxu1 }
 0x23b   : > { %v3111_v27 = vpop.f32.mrf.mxu0 }
 0x23c   : > { %v3156_v12 = vadd.f32 %v3111_v27, %v8533_v48  ;;  %v8641_v53 = vadd.f32 %v6478_v9, %v3158_v10  ;;  %v8661_v44 = vpop.f32.mrf.mxu1 }
 0x23d   : > { %v6497_v15 = vpop.f32.mrf.mxu0 }
 0x23e   : > { %v8646_v39 = vadd.f32 %v6497_v15, %v8535_v16  ;;  %v8648_v49 = vadd.f32 %v3449_v34, %v3156_v12  ;;  %v8669_v46 = vpop.f32.mrf.mxu1 }
 0x23f   : > { %v3781_v55 = vpop.f32.mrf.mxu0 }
 0x240   : > { %v8651_v5 = vadd.f32 %v3781_v55, %v8540_v35  ;;  %v8677_v11 = vpop.f32.mrf.mxu1 }
 0x241   : > { %v6498_v7 = vpop.f32.mrf.mxu0 }
 0x242   : > { %v8656_v24 = vadd.f32 %v6498_v7, %v8542_v26  ;;  %v8685_v23 = vpop.f32.mrf.mxu1 }
 0x243   : > { %v3784_v48 = vpop.f32.mrf.mxu0 }
 0x244   : > { %v8659_v38 = vadd.f32 %v3784_v48, %v8547_v33  ;;  %v8693_v52 = vpop.f32.mrf.mxu1 }
 0x245   : > { %v6501_v16 = vpop.f32.mrf.mxu0 }
 0x246   : > { %v8664_v21 = vadd.f32 %v6501_v16, %v8550_v8  ;;  %v8701_v10 = vpop.f32.mrf.mxu1 }
 0x247   : > { %v3797_v28 = vpop.f32.mrf.mxu0 }
 0x248   : > { %v8667_v35 = vadd.f32 %v3797_v28, %v8553_v25  ;;  %v8709_v15 = vpop.f32.mrf.mxu1 }
 0x249   : > { %v6502_v18 = vpop.f32.mrf.mxu0 }
 0x24a   : > { %v8672_v26 = vadd.f32 %v6502_v18, %v8556_v50  ;;  %v8717_v48 = vpop.f32.mrf.mxu1  ;;  %v4807_v18 = vlaneseq }
 0x24b   : > { %v3800_v2 = vpop.f32.mrf.mxu0 }
 0x24c   : > { %v8675_v33 = vadd.f32 %v3800_v2, %v8560_v4  ;;  %v8725_v2 = vpop.f32.mrf.mxu1 }
 0x24d   : > { %v6505_v41 = vpop.f32.mrf.mxu0 }
 0x24e   : > { %v8680_v8 = vadd.f32 %v6505_v41, %v8563_v1 }
 0x24f   : > { %v3813_v9 = vpop.f32.mrf.mxu0 }
 0x250   : > { %v8683_v25 = vadd.f32 %v3813_v9, %v8566_v61 }
 0x251   : > { %v6506_v20 = vpop.f32.mrf.mxu0 }
 0x252   : > { %v8688_v50 = vadd.f32 %v6506_v20, %v8569_v14 }
 0x253   : > { %v3816_v6 = vpop.f32.mrf.mxu0 }
 0x254   : > { %v8691_v4 = vadd.f32 %v3816_v6, %v8572_v17 }
 0x255   : > { %v6509_v34 = vpop.f32.mrf.mxu0 }
 0x256   : > { %v8696_v1 = vadd.f32 %v6509_v34, %v8575_v57 }
 0x257   : > { %v3829_v22 = vpop.f32.mrf.mxu0 }
 0x258   : > { %v8699_v61 = vadd.f32 %v3829_v22, %v8578_v3 }
 0x259   : > { %v6510_v27 = vpop.f32.mrf.mxu0 }
 0x25a   : > { %v8704_v14 = vadd.f32 %v6510_v27, %v8581_v51 }
 0x25b   : > { %v3832_v12 = vpop.f32.mrf.mxu0 }
 0x25c   : > { %v8707_v17 = vadd.f32 %v3832_v12, %v8584_v43 }
 0x25d   : > { %v6513_v55 = vpop.f32.mrf.mxu0 }
 0x25e   : > { %v8712_v57 = vadd.f32 %v6513_v55, %v8587_v56  ;;  %v4808_v56 = vshrl.u32 %v4807_v18, 7 }
 0x25f   : > { %v3845_v7 = vpop.f32.mrf.mxu0 }
 0x260   : > { %v8715_v3 = vadd.f32 %v3845_v7, %v8590_v42  ;;  %v4805_v42 = vld [vmem:[%s9160_s5] sm:$0x7]  ;;  %v4809_v6 = vsub.s32 0, %v4808_v56  ;;  %v4817_v34 = vsub.s32 2, %v4808_v56 }
 0x261   : > { %v6514_v16 = vpop.f32.mrf.mxu0 }
 0x262   : > { %v8720_v51 = vadd.f32 %v6514_v16, %v8593_v62  ;;  %v4813_v62 = vsub.s32 1, %v4808_v56  ;;  %v8738_v12 = vrot.slane %v4805_v42, %v4809_v6 }
 0x263   : > { %v3848_v28 = vpop.f32.mrf.mxu0 }
 0x264   : > { %v8723_v43 = vadd.f32 %v3848_v28, %v8596_v58  ;;  %v8736_v58 = vpop.f32.mrf.mxu1  ;;  %v8740_v55 = vrot.slane %v4805_v42, %v4813_v62 }
 0x265   : > { %v6517_v41 = vpop.f32.mrf.mxu0 }
 0x266   : > { %v8728_v9 = vadd.f32 %v6517_v41, %v8599_v47  ;;  %9225 = vst [vmem:[#allocation7_spill] sm:$0xff] %v8740_v55  ;;  %v8742_v47 = vrot.slane %v4805_v42, %v4817_v34  ;;  %4888 = vmatprep.mubr.f32.mxu1 %v8740_v55 }
 0x267   : > { %v3861_v20 = vpop.f32.mrf.mxu0 }
 0x268   : > { %v8734_v22 = vadd.f32 %v3861_v20, %v8602_v59  ;;  %9226 = vst [vmem:[#allocation8_spill] sm:$0xff] %v8742_v47  ;;  %v8751_v59 = vpop.f32.mrf.mxu1 }
 0x269   : > { %v6518_v27 = vpop.f32.mrf.mxu0 }
 0x26a   : > { %v8745_v7 = vadd.f32 %v6518_v27, %v8605_v40  ;;  %v8759_v42 = vpop.f32.mrf.mxu1 }
 0x26b   : > { %v3864_v16 = vpop.f32.mrf.mxu0 }
 0x26c   : > { %v8749_v28 = vadd.f32 %v3864_v16, %v8608_v29  ;;  %v8767_v34 = vpop.f32.mrf.mxu1 }
 0x26d   : > { %v6521_v18 = vpop.f32.mrf.mxu0 }
 0x26e   : > { %v8754_v41 = vadd.f32 %v6521_v18, %v8611_v54  ;;  %v8775_v18 = vpop.f32.mrf.mxu1 }
 0x26f   : > { %v3877_v56 = vpop.f32.mrf.mxu0 }
 0x270   : > { %v8757_v20 = vadd.f32 %v3877_v56, %v8614_v13 }
 0x271   : > { %v6522_v40 = vpop.f32.mrf.mxu0 }
 0x272   : > { %v8762_v6 = vadd.f32 %v6522_v40, %v8617_v37 }
 0x273   : > { %v3880_v62 = vpop.f32.mrf.mxu0 }
 0x274   : > { %v8765_v29 = vadd.f32 %v3880_v62, %v8620_v0  ;;  %v8783_v62 = vpop.f32.mrf.mxu1 }
 0x275   : > { %v6525_v27 = vpop.f32.mrf.mxu0 }
 0x276   : > { %v8770_v54 = vadd.f32 %v6525_v27, %v8623_v19 }
 0x277   : > { %v3893_v16 = vpop.f32.mrf.mxu0 }
 0x278   : > { %v8773_v13 = vadd.f32 %v3893_v16, %v8626_v30  ;;  %v8792_v16 = vpop.f32.mrf.mxu1 }
 0x279   : > { %v6526_v56 = vpop.f32.mrf.mxu0 }
 0x27a   : > { %v8778_v37 = vadd.f32 %v6526_v56, %v8629_v36 }
 0x27b   : > { %v3896_v40 = vpop.f32.mrf.mxu0 }
 0x27c   : > { %v8781_v0 = vadd.f32 %v3896_v40, %v8632_v32  ;;  %v4397_v40 = vadd.f32 %v8643_v31, %v8646_v39  ;;  %v4398_v39 = vadd.f32 %v8661_v44, %v8656_v24  ;;  %v4401_v24 = vadd.f32 %v8677_v11, %v8664_v21 }
 0x27d   : > { %v6529_v55 = vpop.f32.mrf.mxu0  ;;  %v4402_v21 = vadd.f32 %v8693_v52, %v8672_v26  ;;  %v4405_v26 = vadd.f32 %v8709_v15, %v8680_v8 }
 0x27e   : > { %v8786_v19 = vadd.f32 %v6529_v55, %v8635_v63  ;;  %v8807_v63 = vpop.f32.mrf.mxu1 }
 0x27f   : > { %v3909_v27 = vpop.f32.mrf.mxu0 }
 0x280   : > { %v8789_v30 = vadd.f32 %v3909_v27, %v8638_v60 }
 0x281   : > { %v6530_v47 = vpop.f32.mrf.mxu0 }
 0x282   : > { %v8795_v36 = vadd.f32 %v6530_v47, %v8641_v53  ;;  %v8819_v47 = vpop.f32.mrf.mxu1 }
 0x283   : > { %v3912_v56 = vpop.f32.mrf.mxu0 }
 0x284   : > { %v8798_v32 = vadd.f32 %v3912_v56, %v8648_v49  ;;  %v4395_v49 = vadd.f32 %v8653_v45, %v8651_v5  ;;  %v4396_v5 = vadd.f32 %v8669_v46, %v8659_v38  ;;  %v8833_v44 = vpop.f32.mrf.mxu1  ;;  %v4399_v38 = vadd.f32 %v8685_v23, %v8667_v35 }
 0x285   : > { %v6601_v60 = vpop.f32.mrf.mxu0  ;;  %v4400_v35 = vadd.f32 %v8701_v10, %v8675_v33 }
 0x286   : > { %v8809_v53 = vadd.f32 %v6601_v60, %v4397_v40  ;;  %v8847_v11 = vpop.f32.mrf.mxu1 }
 0x287   : > { %v4590_v55 = vpop.f32.mrf.mxu0 }
 0x288   : > { %4771 = vst [vmem:[%s8805_s22 + $0x10] sm:$0xff] %v8809_v53  ;;  %v8815_v31 = vadd.f32 %v4590_v55, %v4395_v49  ;;  %v6570_v52 = vpop.f32.mrf.mxu1 }
 0x289   : > { %v6602_v27 = vpop.f32.mrf.mxu0 }
 0x28a   : > { %4769 = vst [vmem:[%s8805_s22] sm:$0xff] %v8815_v31  ;;  %v8823_v56 = vadd.f32 %v6602_v27, %v4398_v39  ;;  %v4335_v8 = vpop.f32.mrf.mxu1 }
 0x28b   : > { %v4593_v45 = vpop.f32.mrf.mxu0 }
 0x28c   : > { %4772 = vst [vmem:[%s8805_s22 + $0x18] sm:$0xff] %v8823_v56  ;;  %v8829_v40 = vadd.f32 %v4593_v45, %v4396_v5 }
 0x28d   : > { %v6605_v60 = vpop.f32.mrf.mxu0 }
 0x28e   : > { %4770 = vst [vmem:[%s8805_s22 + $0x8] sm:$0xff] %v8829_v40  ;;  %v8837_v49 = vadd.f32 %v6605_v60, %v4401_v24  ;;  %v4403_v60 = vadd.f32 %v8717_v48, %v8683_v25 }
 0x28f   : > { %v4606_v46 = vpop.f32.mrf.mxu0 }
 0x290   : > { %4775 = vst [vmem:[%s8805_s22 + $0x30] sm:$0xff] %v8837_v49  ;;  %v8843_v55 = vadd.f32 %v4606_v46, %v4399_v38  ;;  %v4406_v38 = vadd.f32 %v8725_v2, %v8688_v50  ;;  %v6573_v50 = vpop.f32.mrf.mxu1 }
 0x291   : > { %v6606_v39 = vpop.f32.mrf.mxu0 }
 0x292   : > { %4773 = vst [vmem:[%s8805_s22 + $0x20] sm:$0xff] %v8843_v55  ;;  %v8851_v27 = vadd.f32 %v6606_v39, %v4402_v21  ;;  %v4404_v21 = vadd.f32 %v8736_v58, %v8691_v4  ;;  %v4409_v39 = vadd.f32 %v8751_v59, %v8696_v1  ;;  %v4348_v1 = vpop.f32.mrf.mxu1 }
 0x293   : > { %v4609_v23 = vpop.f32.mrf.mxu0 }
 0x294   : > { %4776 = vst [vmem:[%s8805_s22 + $0x38] sm:$0xff] %v8851_v27  ;;  %v8857_v5 = vadd.f32 %v4609_v23, %v4400_v35  ;;  %v4407_v23 = vadd.f32 %v8759_v42, %v8699_v61 }
 0x295   : > { %v6609_v45 = vpop.f32.mrf.mxu0 }
 0x296   : > { %4774 = vst [vmem:[%s8805_s22 + $0x28] sm:$0xff] %v8857_v5  ;;  %v8863_v24 = vadd.f32 %v6609_v45, %v4405_v26  ;;  %v4410_v26 = vadd.f32 %v8767_v34, %v8704_v14  ;;  %v6574_v14 = vpop.f32.mrf.mxu1 }
 0x297   : > { %v4622_v33 = vpop.f32.mrf.mxu0 }
 0x298   : > { %4779 = vst [vmem:[%s8805_s22 + $0x50] sm:$0xff] %v8863_v24  ;;  %v8869_v10 = vadd.f32 %v4622_v33, %v4403_v60  ;;  %v4408_v60 = vadd.f32 %v8775_v18, %v8707_v17  ;;  %v4413_v33 = vadd.f32 %v8783_v62, %v8712_v57  ;;  %v4351_v57 = vpop.f32.mrf.mxu1 }
 0x299   : > { %v6610_v15 = vpop.f32.mrf.mxu0 }
 0x29a   : > { %4777 = vst [vmem:[%s8805_s22 + $0x40] sm:$0xff] %v8869_v10  ;;  %v8875_v46 = vadd.f32 %v6610_v15, %v4406_v38  ;;  %v4411_v15 = vadd.f32 %v8792_v16, %v8715_v3 }
 0x29b   : > { %v4625_v25 = vpop.f32.mrf.mxu0 }
 0x29c   : > { %4780 = vst [vmem:[%s8805_s22 + $0x58] sm:$0xff] %v8875_v46  ;;  %v8881_v48 = vadd.f32 %v4625_v25, %v4404_v21  ;;  %v4414_v21 = vadd.f32 %v8807_v63, %v8720_v51  ;;  %v6577_v51 = vpop.f32.mrf.mxu1 }
 0x29d   : > { %v6613_v2 = vpop.f32.mrf.mxu0 }
 0x29e   : > { %4778 = vst [vmem:[%s8805_s22 + $0x48] sm:$0xff] %v8881_v48  ;;  %v8887_v35 = vadd.f32 %v6613_v2, %v4409_v39  ;;  %v4412_v39 = vadd.f32 %v8819_v47, %v8723_v43  ;;  %v4417_v2 = vadd.f32 %v8833_v44, %v8728_v9  ;;  %v4364_v9 = vpop.f32.mrf.mxu1 }
 0x29f   : > { %v4638_v4 = vpop.f32.mrf.mxu0 }
 0x2a0   : > { %4783 = vst [vmem:[%s8805_s22 + $0x70] sm:$0xff] %v8887_v35  ;;  %v8893_v58 = vadd.f32 %v4638_v4, %v4407_v23  ;;  %v4415_v4 = vadd.f32 %v8847_v11, %v8734_v22  ;;  %v4421_v11 = vadd.f32 %v6573_v50, %v8754_v41 }
 0x2a1   : > { %v6614_v59 = vpop.f32.mrf.mxu0 }
 0x2a2   : > { %4781 = vst [vmem:[%s8805_s22 + $0x60] sm:$0xff] %v8893_v58  ;;  %v8899_v45 = vadd.f32 %v6614_v59, %v4410_v26  ;;  %v4418_v26 = vadd.f32 %v6570_v52, %v8745_v7 }
 0x2a3   : > { %v4641_v61 = vpop.f32.mrf.mxu0 }
 0x2a4   : > { %4784 = vst [vmem:[%s8805_s22 + $0x78] sm:$0xff] %v8899_v45  ;;  %v8905_v42 = vadd.f32 %v4641_v61, %v4408_v60  ;;  %v4416_v60 = vadd.f32 %v4335_v8, %v8749_v28  ;;  %v4422_v8 = vadd.f32 %v6574_v14, %v8762_v6 }
 0x2a5   : > { %v6617_v34 = vpop.f32.mrf.mxu0 }
 0x2a6   : > { %4782 = vst [vmem:[%s8805_s22 + $0x68] sm:$0xff] %v8905_v42  ;;  %v8911_v38 = vadd.f32 %v6617_v34, %v4413_v33  ;;  %v6578_v33 = vpop.f32.mrf.mxu1  ;;  %v4419_v34 = vadd.f32 %v4348_v1, %v8757_v20  ;;  %v4425_v1 = vadd.f32 %v6577_v51, %v8770_v54 }
 0x2a7   : > { %v4654_v17 = vpop.f32.mrf.mxu0 }
 0x2a8   : > { %4787 = vst [vmem:[%s8805_s22 + $0x90] sm:$0xff] %v8911_v38  ;;  %v8917_v18 = vadd.f32 %v4654_v17, %v4411_v15  ;;  %v4367_v17 = vpop.f32.mrf.mxu1 }
 0x2a9   : > { %v6618_v62 = vpop.f32.mrf.mxu0  ;;  %v4424_v51 = vadd.f32 %v4367_v17, %v8781_v0  ;;  %v9227_v17 = vld [vmem:[#allocation8_spill] sm:$0xff] }
 0x2aa   : > { %4785 = vst [vmem:[%s8805_s22 + $0x80] sm:$0xff] %v8917_v18  ;;  %v8923_v25 = vadd.f32 %v6618_v62, %v4414_v21  ;;  %v4420_v21 = vadd.f32 %v4351_v57, %v8765_v29  ;;  %v4426_v57 = vadd.f32 %v6578_v33, %v8778_v37 }
 0x2ab   : > { %v4657_v3 = vpop.f32.mrf.mxu0 }
 0x2ac   : > { %4788 = vst [vmem:[%s8805_s22 + $0x98] sm:$0xff] %v8923_v25  ;;  %v8929_v16 = vadd.f32 %v4657_v3, %v4412_v39  ;;  %v6581_v39 = vpop.f32.mrf.mxu1  ;;  %v4423_v3 = vadd.f32 %v4364_v9, %v8773_v13 }
 0x2ad   : > { %v6621_v63 = vpop.f32.mrf.mxu0 }
 0x2ae   : > { %4786 = vst [vmem:[%s8805_s22 + $0x88] sm:$0xff] %v8929_v16  ;;  %v8935_v23 = vadd.f32 %v6621_v63, %v4417_v2  ;;  %v4380_v63 = vpop.f32.mrf.mxu1 }
 0x2af   : > { %v4670_v43 = vpop.f32.mrf.mxu0  ;;  %v4427_v0 = vadd.f32 %v4380_v63, %v8789_v30 }
 0x2b0   : > { %4791 = vst [vmem:[%s8805_s22 + $0xb0] sm:$0xff] %v8935_v23  ;;  %v8941_v47 = vadd.f32 %v4670_v43, %v4415_v4  ;;  %v6582_v9 = vpop.f32.mrf.mxu1 }
 0x2b1   : > { %v6622_v44 = vpop.f32.mrf.mxu0 }
 0x2b2   : > { %4789 = vst [vmem:[%s8805_s22 + $0xa0] sm:$0xff] %v8941_v47  ;;  %v8946_v59 = vadd.f32 %v6622_v44, %v4418_v26  ;;  %v4429_v26 = vadd.f32 %v6581_v39, %v8786_v19 }
 0x2b3   : > { %v4673_v61 = vpop.f32.mrf.mxu0 }
 0x2b4   : > { %4792 = vst [vmem:[%s8805_s22 + $0xb8] sm:$0xff] %v8946_v59  ;;  %v8951_v22 = vadd.f32 %v4673_v61, %v4416_v60  ;;  %v4430_v61 = vadd.f32 %v6582_v9, %v8795_v36  ;;  %v6849_v36 = vmov 0.0  }
 0x2b5   : > { %v6625_v7 = vpop.f32.mrf.mxu0 }
 0x2b6   : > { %4790 = vst [vmem:[%s8805_s22 + $0xa8] sm:$0xff] %v8951_v22  ;;  %v8956_v52 = vadd.f32 %v6625_v7, %v4421_v11  ;;  %v4383_v11 = vpop.f32.mrf.mxu1 }
 0x2b7   : > { %v4686_v15 = vpop.f32.mrf.mxu0  ;;  %v4428_v7 = vadd.f32 %v4383_v11, %v8798_v32 }
 0x2b8   : > { %4795 = vst [vmem:[%s8805_s22 + $0xd0] sm:$0xff] %v8956_v52  ;;  %v8961_v28 = vadd.f32 %v4686_v15, %v4419_v34 }
 0x2b9   : > { %v6626_v41 = vpop.f32.mrf.mxu0 }
 0x2ba   : > { %4793 = vst [vmem:[%s8805_s22 + $0xc0] sm:$0xff] %v8961_v28  ;;  %v8966_v50 = vadd.f32 %v6626_v41, %v4422_v8  ;;  %v4980_v8 = vmul.f32 %v8899_v45, %v8899_v45 }
 0x2bb   : > { %v4689_v62 = vpop.f32.mrf.mxu0 }
 0x2bc   : > { %4796 = vst [vmem:[%s8805_s22 + $0xd8] sm:$0xff] %v8966_v50  ;;  %v8971_v20 = vadd.f32 %v4689_v62, %v4420_v21  ;;  %v4979_v21 = vmul.f32 %v8887_v35, %v8887_v35  ;;  %v9228_v62 = vld [vmem:[#allocation7_spill] sm:$0xff] }
 0x2bd   : > { %v6629_v6 = vpop.f32.mrf.mxu0 }
 0x2be   : > { %4794 = vst [vmem:[%s8805_s22 + $0xc8] sm:$0xff] %v8971_v20  ;;  %v8976_v14 = vadd.f32 %v6629_v6, %v4425_v1  ;;  %v4977_v6 = vmul.f32 %v8893_v58, %v8893_v58 }
 0x2bf   : > { %v4702_v2 = vpop.f32.mrf.mxu0 }
 0x2c0   : > { %4799 = vst [vmem:[%s8805_s22 + $0xf0] sm:$0xff] %v8976_v14  ;;  %v8981_v29 = vadd.f32 %v4702_v2, %v4423_v3  ;;  %v4995_v41 = vmul.f32 %v8976_v14, %v8976_v14  ;;  %v4975_v3 = vmul.f32 %v8863_v24, %v8863_v24  ;;  %v4974_v2 = vmul.f32 %v8881_v48, %v8881_v48 }
 0x2c1   : > { %v6630_v4 = vpop.f32.mrf.mxu0 }
 0x2c2   : > { %4797 = vst [vmem:[%s8805_s22 + $0xe0] sm:$0xff] %v8981_v29  ;;  %v8986_v54 = vadd.f32 %v6630_v4, %v4426_v57  ;;  %v4993_v39 = vmul.f32 %v8981_v29, %v8981_v29 }
 0x2c3   : > { %v4705_v43 = vpop.f32.mrf.mxu0 }
 0x2c4   : > { %4800 = vst [vmem:[%s8805_s22 + $0xf8] sm:$0xff] %v8986_v54  ;;  %v8991_v13 = vadd.f32 %v4705_v43, %v4424_v51  ;;  %6087 = vmatprep.subr.mxu1 %v8986_v54  ;;  %v4996_v32 = vmul.f32 %v8986_v54, %v8986_v54 }
 0x2c5   : > { %v6633_v37 = vpop.f32.mrf.mxu0  ;;  %6088 = vmatpush3.msra.mxu1 %v8899_v45  ;;  %v4978_v45 = vmul.f32 %v8905_v42, %v8905_v42 }
 0x2c6   : > { %4798 = vst [vmem:[%s8805_s22 + $0xe8] sm:$0xff] %v8991_v13  ;;  %v8998_v44 = vadd.f32 %v6633_v37, %v4429_v26  ;;  %6089 = vmatprep.subr.mxu1 %v8976_v14  ;;  %v4994_v1 = vmul.f32 %v8991_v13, %v8991_v13  ;;  %v4976_v14 = vmul.f32 %v8875_v46, %v8875_v46 }
 0x2c7   : > { %v4718_v60 = vpop.f32.mrf.mxu0  ;;  %6090 = vmatpush3.msra.mxu1 %v8887_v35  ;;  %v4992_v35 = vmul.f32 %v8966_v50, %v8966_v50 }
 0x2c8   : > { %4803 = vst [vmem:[%s8805_s22 + $0x110] sm:$0xff] %v8998_v44  ;;  %v9005_v19 = vadd.f32 %v4718_v60, %v4427_v0  ;;  %6091 = vmatprep.subr.mxu1 %v8991_v13 }
 0x2c9   : > { %v6634_v33 = vpop.f32.mrf.mxu0  ;;  %6092 = vmatpush3.msra.mxu1 %v8905_v42  ;;  %v4991_v42 = vmul.f32 %v8956_v52, %v8956_v52 }
 0x2ca   : > { %4801 = vst [vmem:[%s8805_s22 + $0x100] sm:$0xff] %v9005_v19  ;;  %v9012_v30 = vadd.f32 %v6634_v33, %v4430_v61  ;;  %6093 = vmatprep.subr.mxu1 %v8981_v29 }
 0x2cb   : > { %v4721_v34 = vpop.f32.mrf.mxu0  ;;  %6094 = vmatpush3.msra.mxu1 %v8893_v58  ;;  %v4990_v58 = vmul.f32 %v8971_v20, %v8971_v20 }
 0x2cc   : > { %4804 = vst [vmem:[%s8805_s22 + $0x118] sm:$0xff] %v9012_v30  ;;  %v9019_v15 = vadd.f32 %v4721_v34, %v4428_v7  ;;  %6095 = vmatprep.subr.mxu1 %v8966_v50  ;;  %v4973_v50 = vmul.f32 %v8869_v10, %v8869_v10 }
 0x2cd   : > { %6096 = vmatpush3.msra.mxu1 %v8875_v46  ;;  %v4989_v46 = vmul.f32 %v8961_v28, %v8961_v28 }
 0x2ce   : > { %4802 = vst [vmem:[%s8805_s22 + $0x108] sm:$0xff] %v9019_v15  ;;  %6097 = vmatprep.subr.mxu1 %v8956_v52  ;;  %v4972_v52 = vmul.f32 %v8851_v27, %v8851_v27 }
 0x2cf   : > { %6098 = vmatpush3.msra.mxu1 %v8863_v24  ;;  %v4988_v24 = vmul.f32 %v8946_v59, %v8946_v59 }
 0x2d0   : > { %6099 = vmatprep.subr.mxu1 %v8971_v20  ;;  %v4971_v20 = vmul.f32 %v8837_v49, %v8837_v49 }
 0x2d1   : > { %6100 = vmatpush3.msra.mxu1 %v8881_v48  ;;  %v4987_v48 = vmul.f32 %v8935_v23, %v8935_v23 }
 0x2d2   : > { %6101 = vmatprep.subr.mxu1 %v8961_v28  ;;  %v4970_v28 = vmul.f32 %v8857_v5, %v8857_v5 }
 0x2d3   : > { %6102 = vmatpush3.msra.mxu1 %v8869_v10  ;;  %v4986_v10 = vmul.f32 %v8951_v22, %v8951_v22 }
 0x2d4   : > { %6103 = vmatprep.subr.mxu1 %v8946_v59  ;;  %v4969_v59 = vmul.f32 %v8843_v55, %v8843_v55 }
 0x2d5   : > { %6104 = vmatpush3.msra.mxu1 %v8851_v27  ;;  %v4985_v27 = vmul.f32 %v8941_v47, %v8941_v47 }
 0x2d6   : > { %6105 = vmatprep.subr.mxu1 %v8935_v23  ;;  %v4968_v23 = vmul.f32 %v8823_v56, %v8823_v56 }
 0x2d7   : > { %6106 = vmatpush3.msra.mxu1 %v8837_v49  ;;  %v4984_v49 = vmul.f32 %v8923_v25, %v8923_v25 }
 0x2d8   : > { %6107 = vmatprep.subr.mxu1 %v8951_v22  ;;  %v4967_v22 = vmul.f32 %v8809_v53, %v8809_v53 }
 0x2d9   : > { %6108 = vmatpush3.msra.mxu1 %v8857_v5  ;;  %v4983_v5 = vmul.f32 %v8911_v38, %v8911_v38 }
 0x2da   : > { %6109 = vmatprep.subr.mxu1 %v8941_v47  ;;  %v4966_v47 = vmul.f32 %v8829_v40, %v8829_v40 }
 0x2db   : > { %6110 = vmatpush3.msra.mxu1 %v8843_v55  ;;  %v4982_v55 = vmul.f32 %v8929_v16, %v8929_v16 }
 0x2dc   : > { %6111 = vmatprep.subr.mxu1 %v8923_v25  ;;  %v4965_v25 = vmul.f32 %v8815_v31, %v8815_v31 }
 0x2dd   : > { %6112 = vmatpush3.msra.mxu1 %v8823_v56  ;;  %v4981_v56 = vmul.f32 %v8917_v18, %v8917_v18 }
 0x2de   : > { %6113 = vmatprep.subr.mxu1 %v8911_v38  ;;  %v4997_v38 = vmul.f32 %v9005_v19, %v9005_v19 }
 0x2df   : > { %6114 = vmatpush3.msra.mxu1 %v8809_v53  ;;  %v5000_v53 = vmul.f32 %v9012_v30, %v9012_v30 }
 0x2e0   : > { %6115 = vmatprep.subr.mxu1 %v8929_v16 }
 0x2e1   : > { %6116 = vmatpush3.msra.mxu1 %v8829_v40  ;;  %v4999_v40 = vmul.f32 %v8998_v44, %v8998_v44 }
 0x2e2   : > { %6117 = vmatprep.subr.mxu1 %v8917_v18 }
 0x2e3   : > { %6118 = vmatpush3.msra.mxu1 %v8815_v31  ;;  %v4998_v31 = vmul.f32 %v9019_v15, %v9019_v15 }
 0x2e4   : > { %6635 = vmatprep.subr.mxu1 %v6849_v36  ;;  %4889 = vmatmul.mubr.f32.vlgmr.msra.gmra.mxu1 %v8738_v12 }
 0x2e5   : > { %6636 = vmatpush3.msra.mxu1 %v9012_v30  ;;  %6643 = vmatprep.mubr.msk.f32.mxu1 %vm6850_vm10, %v6849_v36 }
 0x2e6   : > { %6637 = vmatprep.subr.mxu1 %v6849_v36 }
 0x2e7   : > { %6638 = vmatpush3.msra.mxu1 %v8998_v44 }
 0x2e8   : > { %6639 = vmatprep.subr.mxu1 %v6849_v36 }
 0x2e9   : > { %6640 = vmatpush3.msra.mxu1 %v9019_v15 }
 0x2ea   : > { %6641 = vmatprep.subr.mxu1 %v6849_v36 }
 0x2eb   : > { %6642 = vmatpush3.msra.mxu1 %v9005_v19 }
 0x2ec   : > { %6127 = vmatprep.subr.mxu1 %v4996_v32  ;;  %6644 = vmatmul.mubr.msk.f32.vlgmr.msra.gmra.mxu1 %vm4821_vm11, %v9227_v17 }
 0x2ed   : > { %6128 = vmatpush3.msra.mxu1 %v4980_v8  ;;  %5065 = vmatprep.mubr.f32.mxu1 %v9228_v62 }
 0x2ee   : > { %6129 = vmatprep.subr.mxu1 %v4995_v41 }
 0x2ef   : > { %6130 = vmatpush3.msra.mxu1 %v4979_v21 }
 0x2f0   : > { %6131 = vmatprep.subr.mxu1 %v4994_v1 }
 0x2f1   : > { %6132 = vmatpush3.msra.mxu1 %v4978_v45 }
 0x2f2   : > { %6133 = vmatprep.subr.mxu1 %v4993_v39 }
 0x2f3   : > { %6134 = vmatpush3.msra.mxu1 %v4977_v6 }
 0x2f4   : > { %6135 = vmatprep.subr.mxu1 %v4992_v35 }
 0x2f5   : > { %6136 = vmatpush3.msra.mxu1 %v4976_v14 }
 0x2f6   : > { %6137 = vmatprep.subr.mxu1 %v4991_v42 }
 0x2f7   : > { %6138 = vmatpush3.msra.mxu1 %v4975_v3 }
 0x2f8   : > { %6139 = vmatprep.subr.mxu1 %v4990_v58 }
 0x2f9   : > { %6140 = vmatpush3.msra.mxu1 %v4974_v2 }
 0x2fa   : > { %6141 = vmatprep.subr.mxu1 %v4989_v46 }
 0x2fb   : > { %6142 = vmatpush3.msra.mxu1 %v4973_v50 }
 0x2fc   : > { %6143 = vmatprep.subr.mxu1 %v4988_v24 }
 0x2fd   : > { %6144 = vmatpush3.msra.mxu1 %v4972_v52 }
 0x2fe   : > { %6145 = vmatprep.subr.mxu1 %v4987_v48 }
 0x2ff   : > { %6146 = vmatpush3.msra.mxu1 %v4971_v20 }
 0x300   : > { %6147 = vmatprep.subr.mxu1 %v4986_v10 }
 0x301   : > { %6148 = vmatpush3.msra.mxu1 %v4970_v28 }
 0x302   : > { %6149 = vmatprep.subr.mxu1 %v4985_v27 }
 0x303   : > { %6150 = vmatpush3.msra.mxu1 %v4969_v59 }
 0x304   : > { %6151 = vmatprep.subr.mxu1 %v4984_v49 }
 0x305   : > { %6152 = vmatpush3.msra.mxu1 %v4968_v23 }
 0x306   : > { %6153 = vmatprep.subr.mxu1 %v4983_v5 }
 0x307   : > { %6154 = vmatpush3.msra.mxu1 %v4967_v22 }
 0x308   : > { %6155 = vmatprep.subr.mxu1 %v4982_v55 }
 0x309   : > { %6156 = vmatpush3.msra.mxu1 %v4966_v47 }
 0x30a   : > { %6157 = vmatprep.subr.mxu1 %v4981_v56 }
 0x30b   : > { %6158 = vmatpush3.msra.mxu1 %v4965_v25 }
 0x30c   : > { %6646 = vmatprep.subr.mxu1 %v6849_v36  ;;  %5066 = vmatmul.mubr.f32.vlgmr.msra.gmra.mxu1 %v8738_v12 }
 0x30d   : > { %6647 = vmatpush3.msra.mxu1 %v5000_v53  ;;  %6654 = vmatprep.mubr.msk.f32.mxu1 %vm6850_vm10, %v6849_v36 }
 0x30e   : > { %6648 = vmatprep.subr.mxu1 %v6849_v36 }
 0x30f   : > { %6649 = vmatpush3.msra.mxu1 %v4999_v40 }
 0x310   : > { %6650 = vmatprep.subr.mxu1 %v6849_v36 }
 0x311   : > { %6651 = vmatpush3.msra.mxu1 %v4998_v31 }
 0x312   : > { %6652 = vmatprep.subr.mxu1 %v6849_v36 }
 0x313   : > { %6653 = vmatpush3.msra.mxu1 %v4997_v38 }
 0x314   : > { %6655 = vmatmul.mubr.msk.f32.vlgmr.msra.gmra.mxu1 %vm4821_vm11, %v9227_v17 }
 0x3a4   : > { %v6119_v12 = vpop.f32.mrf.mxu1 }
 0x3a6   : > { %v6120_v18 = vpop.f32.mrf.mxu1 }
 0x3a7   : > { %v6121_v16 = vadd.f32 %v6120_v18, %v6119_v12 }
 0x3ac   : > { %v4960_v29 = vpop.f32.mrf.mxu1 }
 0x3ad   : > { %v4961_v57 = vadd.f32 %v6121_v16, %v4960_v29 }
 0x3ae   : > { %v6645_v63 = vpop.f32.mrf.mxu1 }
 0x3af   : > { %4964 = vst [vmem:[%s334_s21] sm:$0x1] %v4961_v57 }
 0x3cc   : > { %v6159_v4 = vpop.f32.mrf.mxu1 }
 0x3ce   : > { %v6160_v54 = vpop.f32.mrf.mxu1 }
 0x3cf   : > { %v6161_v51 = vadd.f32 %v6160_v54, %v6159_v4 }
 0x3d4   : > { %v5137_v43 = vpop.f32.mrf.mxu1 }
 0x3d5   : > { %v5138_v13 = vadd.f32 %v6161_v51, %v5137_v43 }
 0x3d6   : > { %v6656_v26 = vpop.f32.mrf.mxu1 }
 0x3d7   : > { %5141 = vst [vmem:[%s334_s21 + $0x1] sm:$0x1] %v5138_v13 }
 0x3d8 PF: > { %s18_s26 = sadd.s32 1, %s6846_s26   ;;  %s9229_s24 = smov %s6842_s25 }
 0x3d9   : > { %p15_p5 = scmp.ge.s32.totalorder %s18_s26, 4   ;;  %s9230_s25 = smov %s9232_s27 }
 0x3db   :  { %17 = sbr.rel (!%p15_p5) target bundleno = 2 (0x2), region = 97 }

</bundles_post_ra>
